<compile_context>
chip_gen: v6e
topology: v6e:2x2x1
jax: 0.10.0
libtpu: 0.0.40
codegen_flags: <defaults>
</compile_context>

<pallas_src>
import functools

import jax
import jax.numpy as jnp
from jax.experimental import pallas as pl
from jax.experimental.pallas import tpu as pltpu


_VMEM_LIMIT = 32 << 20  # conservative: fits v7x (64 MiB phys), > v5e 16 MiB default


def _num_tensorcores():
    """Best-effort TensorCore-per-chip count; 1 if unknown (v5e/v6e behaviour)."""
    try:
        info = pltpu.get_tpu_info()
        for attr in ("num_cores", "tensorcores_per_chip", "core_count"):
            v = getattr(info, attr, None)
            if v:
                return max(1, int(v))
    except Exception:
        pass
    return 1


_NUM_TC = _num_tensorcores()


# ---------------------------------------------------------------------------
# Kernel A: single-shot fused GEMM (bias + optional ReLU).
#   - grid only over M; full-extent K/N blocks (exempt from the (8,128) rule)
#   - bf16 operands, f32 accumulate
# ---------------------------------------------------------------------------
def _gemm_bias_act_kernel(a_ref, b_ref, bias_ref, o_ref, *, relu):
    acc = jnp.dot(a_ref[...], b_ref[...], preferred_element_type=jnp.float32)
    acc = acc + bias_ref[...]
    if relu:
        acc = jnp.maximum(acc, 0.0)
    o_ref[...] = acc.astype(o_ref.dtype)


def _pick_tm(m):
    # Largest M tile (up to 512) that divides m: fewer grid steps, wider
    # store bursts.  Only split M just to get >=2 programs when the chip
    # actually has >=2 TensorCores (v7x); on v5e/v6e the grid is a serial loop.
    best = m
    for tm in (512, 256, 128, 64, 32, 16, 8):
        if m % tm == 0:
            best = tm
            break
    if _NUM_TC > 1 and best == m and m >= 16:
        for tm in (256, 128, 64, 32, 16, 8):
            if m % tm == 0 and m // tm >= 2:
                return tm
    return best


def pallas_matmul_bias(a, b, bias, relu=False, out_dtype=jnp.float32):
    """(M,K) @ (K,N) + bias[N] (+ReLU). K collapsed into one MXU pass."""
    m, k = a.shape
    k2, n = b.shape
    assert k == k2
    a = a.astype(jnp.bfloat16)
    b = b.astype(jnp.bfloat16)
    bias = bias.reshape(1, n).astype(jnp.float32)
    tm = _pick_tm(m)
    return pl.pallas_call(
        functools.partial(_gemm_bias_act_kernel, relu=relu),
        out_shape=jax.ShapeDtypeStruct((m, n), out_dtype),
        grid=(m // tm,),
        in_specs=[
            pl.BlockSpec((tm, k), lambda i: (i, 0)),
            pl.BlockSpec((k, n), lambda i: (0, 0)),
            pl.BlockSpec((1, n), lambda i: (0, 0)),
        ],
        out_specs=pl.BlockSpec((tm, n), lambda i: (i, 0)),
        compiler_params=pltpu.CompilerParams(
            dimension_semantics=("parallel",),
            vmem_limit_bytes=_VMEM_LIMIT),
    )(a, b, bias)


# ---------------------------------------------------------------------------
# Row-group picker for the slab (shift-and-slice conv) kernels.
# ---------------------------------------------------------------------------
def _pick_rows(oh, wp, k_deep, cout, budget=1 << 21):
    """Output-row group size R.

    R must divide oh and keep the output block's second-to-last dim (R*wp)
    either full-extent or a multiple of 8 (the (8,128) BlockSpec rule).  Pick
    the largest R whose (double-buffered) per-step working set fits a small
    VMEM budget; only prefer >=2 row groups on multi-TensorCore chips.
    """
    def legal(r):
        return r == oh or (r * wp) % 8 == 0

    def step_bytes(r):
        # bf16 col scratch + bf16 input slab + f32 acc + output, x2 buffers
        return 2 * r * wp * (2 * k_deep + 2 * k_deep + 6 * cout)

    cands = [d for d in range(1, oh + 1) if oh % d == 0 and legal(d)]
    fitting = [d for d in cands if step_bytes(d) <= budget] or [min(cands)]
    r = max(fitting)
    if _NUM_TC > 1 and r == oh:
        smaller = [d for d in fitting if d < oh]
        if smaller:
            r = max(smaller)
    return r


# ---------------------------------------------------------------------------
# Kernel B: 3x3 stride-1 "same" conv.
#   In-VMEM im2col: the 9 shifted slabs of the flattened padded image are
#   stacked along K in a VMEM scratch and consumed by ONE deep-K MXU GEMM.
#   Grid = (batch, output-row groups); both axes parallel.
# ---------------------------------------------------------------------------
def _conv3x3_s1_kernel(x_ref, w_ref, b_ref, o_ref, col_ref, *, dilation, wp,
                       rows, cin, n_row_tiles, relu):
    # x_ref  : (1, (Hp+1)*Wp, Cin) bf16  full padded image of one batch element
    # w_ref  : (9*Cin, Cout)       bf16  taps stacked along K
    # b_ref  : (1, Cout)           f32
    # o_ref  : (1, rows*Wp, Cout)        (right 2*pad cols of each row are junk)
    # col_ref: (rows*Wp, 9*Cin)    bf16  in-VMEM im2col scratch
    n_slab = rows * wp
    row0 = 0 if n_row_tiles == 1 else pl.program_id(1) * n_slab
    for t in range(9):
        i, j = t // 3, t % 3
        off = (i * wp + j) * dilation               # static tap offset
        col_ref[:, t * cin:(t + 1) * cin] = x_ref[0, pl.ds(row0 + off, n_slab), :]
    acc = jnp.dot(col_ref[...], w_ref[...], preferred_element_type=jnp.float32)
    acc = acc + b_ref[...]
    if relu:
        acc = jnp.maximum(acc, 0.0)
    o_ref[...] = acc.reshape(1, n_slab, acc.shape[-1]).astype(o_ref.dtype)


def conv3x3_s1(x, w, bias, *, dilation=1, relu=True, out_dtype=jnp.bfloat16):
    """'same' 3x3 stride-1 conv (padding == dilation), NHWC, bf16 I/O."""
    n, h, wd, cin = x.shape
    cout = w.shape[0]
    pad = dilation
    hp, wp = h + 2 * pad, wd + 2 * pad
    oh, ow = h, wd
    # one extra zero row at the bottom so every shifted slab stays in bounds
    xp = jnp.pad(x.astype(jnp.bfloat16), ((0, 0), (pad, pad + 1), (pad, pad), (0, 0)))
    x_flat = xp.reshape(n, (hp + 1) * wp, cin)
    w_deep = _w3x3_taps(w).reshape(9 * cin, cout).astype(jnp.bfloat16)
    b2 = bias.reshape(1, cout).astype(jnp.float32)

    rows = _pick_rows(oh, wp, 9 * cin, cout)
    n_slab = rows * wp
    n_row_tiles = oh // rows
    # TODO(synk): for very large images, switch the input to memory_space=pl.ANY
    # with manual halo DMA per row group instead of a full-image VMEM block.
    out = pl.pallas_call(
        functools.partial(_conv3x3_s1_kernel, dilation=dilation, wp=wp,
                          rows=rows, cin=cin, n_row_tiles=n_row_tiles, relu=relu),
        out_shape=jax.ShapeDtypeStruct((n, oh * wp, cout), out_dtype),
        grid=(n, n_row_tiles),
        in_specs=[
            pl.BlockSpec((1, (hp + 1) * wp, cin), lambda b, r: (b, 0, 0)),
            pl.BlockSpec((9 * cin, cout), lambda b, r: (0, 0)),
            pl.BlockSpec((1, cout), lambda b, r: (0, 0)),
        ],
        out_specs=pl.BlockSpec((1, n_slab, cout), lambda b, r: (b, r, 0)),
        scratch_shapes=[pltpu.VMEM((n_slab, 9 * cin), jnp.bfloat16)],
        compiler_params=pltpu.CompilerParams(
            dimension_semantics=("parallel", "parallel"),
            vmem_limit_bytes=_VMEM_LIMIT),
    )(x_flat, w_deep, b2)
    # un-flatten; drop the 2*pad contaminated columns of each output row
    return out.reshape(n, oh, wp, cout)[:, :, :ow, :]


# ---------------------------------------------------------------------------
# Kernel C: fully fused ASPP.
#   b0 (1x1) + b1 (3x3 d=2) + b2 (3x3 d=3) + concat + 1x1 projection in ONE
#   pallas_call.  Each branch's projection chunk is folded in immediately, so
#   only one branch buffer is ever live; the global-pool branch is pre-folded
#   into the projection bias.  Branch GEMMs use the deep-K in-VMEM im2col.
# ---------------------------------------------------------------------------
def _aspp_fused_kernel(x_ref, w0_ref, w1_ref, w2_ref, bb_ref, pw_ref, pb_ref,
                       o_ref, col_ref, *, wp, rows, c, n_row_tiles):
    # x_ref : (1, (Hp+1)*Wp, C) bf16     shared pad-3 flattened image
    # w0_ref: (C, C)            bf16     1x1 branch
    # w1_ref: (9C, C)           bf16     3x3 dilation-2 branch (taps along K)
    # w2_ref: (9C, C)           bf16     3x3 dilation-3 branch
    # bb_ref: (3, 1, C)         f32      branch biases
    # pw_ref: (3, C, Cp)        bf16     projection weight chunks per branch
    # pb_ref: (1, 1, Cp)        f32      proj bias + global-pool contribution
    # o_ref : (1, rows*Wp, Cp)
    # col_ref: (rows*Wp, 9C)    bf16     in-VMEM im2col scratch (reused)
    n_slab = rows * wp
    row0 = 0 if n_row_tiles == 1 else pl.program_id(1) * n_slab
    cp = o_ref.shape[-1]

    def dilated_branch(starts, w_branch):
        for t, s in enumerate(starts):
            col_ref[:, t * c:(t + 1) * c] = x_ref[0, pl.ds(row0 + s, n_slab), :]
        return jnp.dot(col_ref[...], w_branch[...],
                       preferred_element_type=jnp.float32)

    # branch 0: 1x1 conv -> centre of the pad-3 buffer; project immediately
    b0 = jnp.dot(x_ref[0, pl.ds(row0 + 3 * wp + 3, n_slab), :], w0_ref[...],
                 preferred_element_type=jnp.float32)
    b0 = jnp.maximum(b0 + bb_ref[0], 0.0).astype(jnp.bfloat16)
    acc = pb_ref[0] + jnp.dot(b0, pw_ref[0], preferred_element_type=jnp.float32)

    # branch 1: 3x3, dilation 2 (pad 2 -> +1 offset inside the pad-3 buffer)
    s1 = [(2 * i + 1) * wp + (2 * j + 1) for i in range(3) for j in range(3)]
    b1 = jnp.maximum(dilated_branch(s1, w1_ref) + bb_ref[1], 0.0).astype(jnp.bfloat16)
    acc = acc + jnp.dot(b1, pw_ref[1], preferred_element_type=jnp.float32)

    # branch 2: 3x3, dilation 3 (pad 3)
    s2 = [3 * i * wp + 3 * j for i in range(3) for j in range(3)]
    b2 = jnp.maximum(dilated_branch(s2, w2_ref) + bb_ref[2], 0.0).astype(jnp.bfloat16)
    acc = acc + jnp.dot(b2, pw_ref[2], preferred_element_type=jnp.float32)

    acc = jnp.maximum(acc, 0.0)
    o_ref[...] = acc.reshape(1, n_slab, cp).astype(o_ref.dtype)


def aspp_fused(hi, params):
    n, h, w, c = hi.shape
    pad = 3                                   # max branch padding -> shared buffer
    hp, wp = h + 2 * pad, w + 2 * pad
    xp = jnp.pad(hi.astype(jnp.bfloat16), ((0, 0), (pad, pad + 1), (pad, pad), (0, 0)))
    x_flat = xp.reshape(n, (hp + 1) * wp, c)

    w0, bz0 = fold_bn(params["aspp0"])        # 1x1
    w1, bz1 = fold_bn(params["aspp1"])        # 3x3, dilation 2
    w2, bz2 = fold_bn(params["aspp2"])        # 3x3, dilation 3
    wpl, bpl = fold_bn(params["aspp_pool"])   # 1x1 on pooled vector
    wpj, bpj = fold_bn(params["aspp_proj"])   # 1x1, Cin = 4c
    cp = wpj.shape[0]

    wb0 = _w1x1_mat(w0).astype(jnp.bfloat16)                       # (c, c)
    wb1 = _w3x3_taps(w1).reshape(9 * c, c).astype(jnp.bfloat16)    # (9c, c)
    wb2 = _w3x3_taps(w2).reshape(9 * c, c).astype(jnp.bfloat16)    # (9c, c)
    bb = jnp.stack([bz0, bz1, bz2]).reshape(3, 1, c).astype(jnp.float32)

    projmat = _w1x1_mat(wpj)                                       # (4c, cp)
    pw = jnp.stack([projmat[0:c], projmat[c:2 * c],
                    projmat[2 * c:3 * c]]).astype(jnp.bfloat16)    # (3, c, cp)

    # global-pool branch: degenerate GEMM (M=n) -> plain XLA, folded into bias
    gp = jnp.mean(hi.astype(jnp.float32), axis=(1, 2))             # (n, c)
    gp = jnp.maximum(gp @ _w1x1_mat(wpl) + bpl, 0.0)               # (n, c)
    pbias = (bpj[None, :] + gp @ projmat[3 * c:4 * c])             # (n, cp)
    pbias = pbias.reshape(n, 1, cp).astype(jnp.float32)

    rows = _pick_rows(h, wp, 19 * c, cp)
    n_slab = rows * wp
    n_row_tiles = h // rows
    out = pl.pallas_call(
        functools.partial(_aspp_fused_kernel, wp=wp, rows=rows, c=c,
                          n_row_tiles=n_row_tiles),
        out_shape=jax.ShapeDtypeStruct((n, h * wp, cp), jnp.bfloat16),
        grid=(n, n_row_tiles),
        in_specs=[
            pl.BlockSpec((1, (hp + 1) * wp, c), lambda b, r: (b, 0, 0)),
            pl.BlockSpec((c, c), lambda b, r: (0, 0)),
            pl.BlockSpec((9 * c, c), lambda b, r: (0, 0)),
            pl.BlockSpec((9 * c, c), lambda b, r: (0, 0)),
            pl.BlockSpec((3, 1, c), lambda b, r: (0, 0, 0)),
            pl.BlockSpec((3, c, cp), lambda b, r: (0, 0, 0)),
            pl.BlockSpec((1, 1, cp), lambda b, r: (b, 0, 0)),
        ],
        out_specs=pl.BlockSpec((1, n_slab, cp), lambda b, r: (b, r, 0)),
        scratch_shapes=[pltpu.VMEM((n_slab, 9 * c), jnp.bfloat16)],
        compiler_params=pltpu.CompilerParams(
            dimension_semantics=("parallel", "parallel"),
            vmem_limit_bytes=_VMEM_LIMIT),
    )(x_flat, wb0, wb1, wb2, bb, pw, pbias)
    return out.reshape(n, h, wp, cp)[:, :, :w, :]


# ---------------------------------------------------------------------------
# Strided convs (backbone stem): bf16 im2col + Kernel A GEMM.
# ---------------------------------------------------------------------------
def _im2col(x, kh, kw, stride, dilation, pad):
    n, h, w, c = x.shape
    xp = jnp.pad(x, ((0, 0), (pad, pad), (pad, pad), (0, 0)))
    oh = (h + 2 * pad - dilation * (kh - 1) - 1) // stride + 1
    ow = (w + 2 * pad - dilation * (kw - 1) - 1) // stride + 1
    patches = []
    for i in range(kh):
        for j in range(kw):
            patches.append(
                xp[:, i * dilation: i * dilation + stride * oh: stride,
                      j * dilation: j * dilation + stride * ow: stride, :])
    cols = jnp.concatenate(patches, axis=-1)
    return cols, oh, ow


def conv2d_gemm(x, weight, bias, *, stride=1, dilation=1, pad=0, relu=False,
                out_dtype=jnp.bfloat16):
    # TODO(synk): at real resolutions, replace the HBM im2col with an in-kernel
    # stride-phase shift-and-slice (as in conv3x3_s1); here stem maps are tiny
    # and the bf16 im2col already halves the replicated-copy HBM traffic.
    cout, cin, kh, kw = weight.shape
    cols, oh, ow = _im2col(x.astype(jnp.bfloat16), kh, kw, stride, dilation, pad)
    n = x.shape[0]
    a = cols.reshape(n * oh * ow, kh * kw * cin)
    wmat = jnp.transpose(weight, (2, 3, 1, 0)).reshape(kh * kw * cin, cout)
    out = pallas_matmul_bias(a, wmat, bias, relu=relu, out_dtype=out_dtype)
    return out.reshape(n, oh, ow, cout)


# ---------------------------------------------------------------------------
# Helpers: BN folding, weight reshapes, upsampling
# ---------------------------------------------------------------------------
def fold_bn(p):
    # NOTE: synthetic inference-mode BN (running_mean=0, running_var=1);
    # real pretrained stats would be folded here the same way.
    eps = 1e-5
    scale = p["gamma"] / jnp.sqrt(1.0 + eps)
    w = p["w"] * scale[:, None, None, None]
    return w, p["beta"]


def _w1x1_mat(w):         # (Cout, Cin, 1, 1) -> (Cin, Cout)
    return jnp.transpose(w[:, :, 0, 0], (1, 0))


def _w3x3_taps(w):        # (Cout, Cin, 3, 3) -> (9, Cin, Cout), tap t = 3*i + j
    return jnp.transpose(w, (2, 3, 1, 0)).reshape(9, w.shape[1], w.shape[0])


def upsample_bilinear(x, size):
    n, h, w, c = x.shape
    return jax.image.resize(x.astype(jnp.float32), (n, size[0], size[1], c),
                            method="bilinear")


# ---------------------------------------------------------------------------
# Parameter construction (deterministic, synthetic)
# ---------------------------------------------------------------------------
def _conv_bn_params(key, cin, cout, k):
    return {
        "w": jax.random.normal(key, (cout, cin, k, k), jnp.float32) * 0.1,
        "gamma": jnp.ones((cout,), jnp.float32),
        "beta": jnp.zeros((cout,), jnp.float32),
    }


def init_params(key, in_ch=4, num_classes=3):
    keys = jax.random.split(key, 12)
    p = {}
    p["bb1"] = _conv_bn_params(keys[0], in_ch, 8, 3)    # stride 2
    p["bb2"] = _conv_bn_params(keys[1], 8, 16, 3)       # stride 2
    p["bb3"] = _conv_bn_params(keys[2], 16, 16, 3)      # stride 1
    p["aspp0"] = _conv_bn_params(keys[3], 16, 16, 1)
    p["aspp1"] = _conv_bn_params(keys[4], 16, 16, 3)    # dilation 2
    p["aspp2"] = _conv_bn_params(keys[5], 16, 16, 3)    # dilation 3
    p["aspp_pool"] = _conv_bn_params(keys[6], 16, 16, 1)
    p["aspp_proj"] = _conv_bn_params(keys[7], 64, 16, 1)
    p["low_proj"] = _conv_bn_params(keys[8], 8, 8, 1)
    p["dec"] = _conv_bn_params(keys[9], 24, 16, 3)
    p["cls_w"] = jax.random.normal(keys[10], (num_classes, 16, 1, 1),
                                   jnp.float32) * 0.1
    p["cls_b"] = jax.random.normal(keys[11], (num_classes,), jnp.float32) * 0.1
    return p


# ---------------------------------------------------------------------------
# DeepLabV3Plus branch + baseline wrapper
# ---------------------------------------------------------------------------
def deeplabv3plus_forward(params, x_nchw):
    x = jnp.transpose(x_nchw, (0, 2, 3, 1)).astype(jnp.float32)   # NCHW -> NHWC
    n, h, w, _ = x.shape

    # ---- backbone ----
    w1, b1 = fold_bn(params["bb1"])
    low = conv2d_gemm(x, w1, b1, stride=2, pad=1, relu=True)      # (N,H/2,W/2,8) bf16
    w2, b2 = fold_bn(params["bb2"])
    hi = conv2d_gemm(low, w2, b2, stride=2, pad=1, relu=True)     # (N,H/4,W/4,16) bf16
    w3, b3 = fold_bn(params["bb3"])
    hi = conv3x3_s1(hi, w3, b3, dilation=1, relu=True)            # bf16

    # ---- ASPP (one fused pallas_call) ----
    # TODO(synk): fuse bb3 -> ASPP into one pallas_call (keep `hi` VMEM-resident)
    # to eliminate the pad/slice HBM round trip between the two stages.
    aspp = aspp_fused(hi, params)                                 # (N,H/4,W/4,16) bf16

    # ---- decoder ----
    wl, bl = fold_bn(params["low_proj"])
    low_p = conv2d_gemm(low, wl, bl, pad=0, relu=True)            # 1x1, bf16
    aspp_up = upsample_bilinear(aspp, (low_p.shape[1], low_p.shape[2]))
    dec_in = jnp.concatenate([aspp_up.astype(jnp.bfloat16), low_p], axis=-1)
    wd, bd = fold_bn(params["dec"])
    feature = conv3x3_s1(dec_in, wd, bd, dilation=1, relu=True,
                         out_dtype=jnp.float32)                   # (N,H/2,W/2,16) f32

    # ---- classifier: degenerate GEMM (K=16, N=num_classes) -> plain XLA ----
    wc = params["cls_w"][:, :, 0, 0]                              # (num_classes, 16)
    cdim = feature.shape[-1]
    logits = feature.reshape(-1, cdim) @ wc.T + params["cls_b"]
    logits = logits.reshape(n, feature.shape[1], feature.shape[2], wc.shape[0])
    pred = upsample_bilinear(logits, (h, w))                      # (N,H,W,C) f32

    feature_nchw = jnp.transpose(feature, (0, 3, 1, 2))
    pred_nchw = jnp.transpose(pred, (0, 3, 1, 2))
    return feature_nchw, pred_nchw


def deeplabv3plus_baseline_forward(params, x_nchw):
    """Matches DeepLabV3Plus_Baseline_model.forward: returns a dict of logits."""
    feature, pred = deeplabv3plus_forward(params, x_nchw)
    return {"pred": pred, "feature": feature}


# ---------------------------------------------------------------------------
if __name__ == "__main__":
    key = jax.random.PRNGKey(0)
    k_param, k_input = jax.random.split(key)

    B, C_IN, H, W = 2, 4, 16, 16
    NUM_CLASSES = 3

    params = init_params(k_param, in_ch=C_IN, num_classes=NUM_CLASSES)
    x = jax.random.normal(k_input, (B, C_IN, H, W), jnp.float32)

    fwd = jax.jit(deeplabv3plus_baseline_forward)
    logits = fwd(params, x)
    jax.block_until_ready(logits)

    assert logits["pred"].shape == (B, NUM_CLASSES, H, W)
    assert logits["feature"].shape == (B, 16, H // 2, W // 2)
    print("KERNEL_OK")
</pallas_src>

<mosaic_0001>
module attributes {stable_mosaic.version = 11 : i64} {
  func.func @_gemm_bias_act_kernel(%arg0: i32, %arg1: memref<128x36xbf16, #tpu.memory_space<vmem>>, %arg2: memref<36x8xbf16, #tpu.memory_space<vmem>>, %arg3: memref<1x8xf32, #tpu.memory_space<vmem>>, %arg4: memref<128x8xbf16, #tpu.memory_space<vmem>>) attributes {dimension_semantics = [#tpu.dimension_semantics<parallel>], iteration_bounds = array<i64: 1>, scalar_prefetch = 0 : i64, scratch_operands = 0 : i64, tpu.core_type = #tpu.core_type<tc>, window_params = [{transform_indices = @transform_0, window_bounds = array<i64: 128, 36>}, {pipeline_mode = #tpu.pipeline_mode<synchronous>, transform_indices = @transform_1, window_bounds = array<i64: 36, 8>}, {pipeline_mode = #tpu.pipeline_mode<synchronous>, transform_indices = @transform_2, window_bounds = array<i64: 1, 8>}, {transform_indices = @transform_3, window_bounds = array<i64: 128, 8>}]} {
    %c0 = arith.constant 0 : index
    %c0_0 = arith.constant 0 : index
    %0 = vector.load %arg1[%c0, %c0_0] : memref<128x36xbf16, #tpu.memory_space<vmem>>, vector<128x36xbf16>
    %c0_1 = arith.constant 0 : index
    %c0_2 = arith.constant 0 : index
    %1 = vector.load %arg2[%c0_1, %c0_2] : memref<36x8xbf16, #tpu.memory_space<vmem>>, vector<36x8xbf16>
    %cst = arith.constant dense<0.000000e+00> : vector<128x8xf32>
    %2 = tpu.matmul %0, %1, %cst {dimension_numbers = #tpu.dot_dimension_numbers<[1], [0], [0], [1], [0, 0, 1, 1], [], []>} : vector<128x36xbf16>, vector<36x8xbf16>, vector<128x8xf32> -> vector<128x8xf32>
    %c0_3 = arith.constant 0 : index
    %c0_4 = arith.constant 0 : index
    %3 = vector.load %arg3[%c0_3, %c0_4] : memref<1x8xf32, #tpu.memory_space<vmem>>, vector<1x8xf32>
    %4 = vector.broadcast %3 : vector<1x8xf32> to vector<128x8xf32>
    %5 = arith.addf %2, %4 : vector<128x8xf32>
    %cst_5 = arith.constant 0.000000e+00 : f32
    %6 = vector.broadcast %cst_5 : f32 to vector<128x8xf32>
    %7 = arith.maximumf %5, %6 : vector<128x8xf32>
    %8 = arith.truncf %7 : vector<128x8xf32> to vector<128x8xbf16>
    %c0_6 = arith.constant 0 : index
    %c0_7 = arith.constant 0 : index
    %9 = vector.load %arg4[%c0_6, %c0_7] : memref<128x8xbf16, #tpu.memory_space<vmem>>, vector<128x8xbf16>
    tpu.vector_store %arg4[%c0_6, %c0_7], %8 {strides = array<i32>} : memref<128x8xbf16, #tpu.memory_space<vmem>>, vector<128x8xbf16>,
    return
  }
  func.func @transform_0(%arg0: i32) -> (i32, i32) {
    %c0_i32 = arith.constant 0 : i32
    %c0_i32_0 = arith.constant 0 : i32
    return %arg0, %c0_i32 : i32, i32
  }
  func.func @transform_1(%arg0: i32) -> (i32, i32) {
    %c0_i32 = arith.constant 0 : i32
    %c0_i32_0 = arith.constant 0 : i32
    %c0_i32_1 = arith.constant 0 : i32
    return %c0_i32, %c0_i32_0 : i32, i32
  }
  func.func @transform_2(%arg0: i32) -> (i32, i32) {
    %c0_i32 = arith.constant 0 : i32
    %c0_i32_0 = arith.constant 0 : i32
    %c0_i32_1 = arith.constant 0 : i32
    return %c0_i32, %c0_i32_0 : i32, i32
  }
  func.func @transform_3(%arg0: i32) -> (i32, i32) {
    %c0_i32 = arith.constant 0 : i32
    %c0_i32_0 = arith.constant 0 : i32
    return %arg0, %c0_i32 : i32, i32
  }
}

module attributes {stable_mosaic.version = 11 : i64} {
  func.func @_gemm_bias_act_kernel(%arg0: i32, %arg1: memref<32x72xbf16, #tpu.memory_space<vmem>>, %arg2: memref<72x16xbf16, #tpu.memory_space<vmem>>, %arg3: memref<1x16xf32, #tpu.memory_space<vmem>>, %arg4: memref<32x16xbf16, #tpu.memory_space<vmem>>) attributes {dimension_semantics = [#tpu.dimension_semantics<parallel>], iteration_bounds = array<i64: 1>, scalar_prefetch = 0 : i64, scratch_operands = 0 : i64, tpu.core_type = #tpu.core_type<tc>, window_params = [{transform_indices = @transform_0, window_bounds = array<i64: 32, 72>}, {pipeline_mode = #tpu.pipeline_mode<synchronous>, transform_indices = @transform_1, window_bounds = array<i64: 72, 16>}, {pipeline_mode = #tpu.pipeline_mode<synchronous>, transform_indices = @transform_2, window_bounds = array<i64: 1, 16>}, {transform_indices = @transform_3, window_bounds = array<i64: 32, 16>}]} {
    %c0 = arith.constant 0 : index
    %c0_0 = arith.constant 0 : index
    %0 = vector.load %arg1[%c0, %c0_0] : memref<32x72xbf16, #tpu.memory_space<vmem>>, vector<32x72xbf16>
    %c0_1 = arith.constant 0 : index
    %c0_2 = arith.constant 0 : index
    %1 = vector.load %arg2[%c0_1, %c0_2] : memref<72x16xbf16, #tpu.memory_space<vmem>>, vector<72x16xbf16>
    %cst = arith.constant dense<0.000000e+00> : vector<32x16xf32>
    %2 = tpu.matmul %0, %1, %cst {dimension_numbers = #tpu.dot_dimension_numbers<[1], [0], [0], [1], [0, 0, 1, 1], [], []>} : vector<32x72xbf16>, vector<72x16xbf16>, vector<32x16xf32> -> vector<32x16xf32>
    %c0_3 = arith.constant 0 : index
    %c0_4 = arith.constant 0 : index
    %3 = vector.load %arg3[%c0_3, %c0_4] : memref<1x16xf32, #tpu.memory_space<vmem>>, vector<1x16xf32>
    %4 = vector.broadcast %3 : vector<1x16xf32> to vector<32x16xf32>
    %5 = arith.addf %2, %4 : vector<32x16xf32>
    %cst_5 = arith.constant 0.000000e+00 : f32
    %6 = vector.broadcast %cst_5 : f32 to vector<32x16xf32>
    %7 = arith.maximumf %5, %6 : vector<32x16xf32>
    %8 = arith.truncf %7 : vector<32x16xf32> to vector<32x16xbf16>
    %c0_6 = arith.constant 0 : index
    %c0_7 = arith.constant 0 : index
    %9 = vector.load %arg4[%c0_6, %c0_7] : memref<32x16xbf16, #tpu.memory_space<vmem>>, vector<32x16xbf16>
    tpu.vector_store %arg4[%c0_6, %c0_7], %8 {strides = array<i32>} : memref<32x16xbf16, #tpu.memory_space<vmem>>, vector<32x16xbf16>,
    return
  }
  func.func @transform_0(%arg0: i32) -> (i32, i32) {
    %c0_i32 = arith.constant 0 : i32
    %c0_i32_0 = arith.constant 0 : i32
    return %arg0, %c0_i32 : i32, i32
  }
  func.func @transform_1(%arg0: i32) -> (i32, i32) {
    %c0_i32 = arith.constant 0 : i32
    %c0_i32_0 = arith.constant 0 : i32
    %c0_i32_1 = arith.constant 0 : i32
    return %c0_i32, %c0_i32_0 : i32, i32
  }
  func.func @transform_2(%arg0: i32) -> (i32, i32) {
    %c0_i32 = arith.constant 0 : i32
    %c0_i32_0 = arith.constant 0 : i32
    %c0_i32_1 = arith.constant 0 : i32
    return %c0_i32, %c0_i32_0 : i32, i32
  }
  func.func @transform_3(%arg0: i32) -> (i32, i32) {
    %c0_i32 = arith.constant 0 : i32
    %c0_i32_0 = arith.constant 0 : i32
    return %arg0, %c0_i32 : i32, i32
  }
}

module attributes {stable_mosaic.version = 11 : i64} {
  func.func @_conv3x3_s1_kernel(%arg0: i32, %arg1: i32, %arg2: memref<1x42x16xbf16, #tpu.memory_space<vmem>>, %arg3: memref<144x16xbf16, #tpu.memory_space<vmem>>, %arg4: memref<1x16xf32, #tpu.memory_space<vmem>>, %arg5: memref<1x24x16xbf16, #tpu.memory_space<vmem>>, %arg6: memref<24x144xbf16, #tpu.memory_space<vmem>>) attributes {dimension_semantics = [#tpu.dimension_semantics<parallel>, #tpu.dimension_semantics<parallel>], iteration_bounds = array<i64: 2, 1>, scalar_prefetch = 0 : i64, scratch_operands = 1 : i64, tpu.core_type = #tpu.core_type<tc>, window_params = [{transform_indices = @transform_0, window_bounds = array<i64: 1, 42, 16>}, {pipeline_mode = #tpu.pipeline_mode<synchronous>, transform_indices = @transform_1, window_bounds = array<i64: 144, 16>}, {pipeline_mode = #tpu.pipeline_mode<synchronous>, transform_indices = @transform_2, window_bounds = array<i64: 1, 16>}, {transform_indices = @transform_3, window_bounds = array<i64: 1, 24, 16>}]} {
    %c0 = arith.constant 0 : index
    %c0_0 = arith.constant 0 : index
    %c0_1 = arith.constant 0 : index
    %0 = vector.load %arg2[%c0, %c0_0, %c0_1] : memref<1x42x16xbf16, #tpu.memory_space<vmem>>, vector<1x24x16xbf16>
    %1 = vector.shape_cast %0 : vector<1x24x16xbf16> to vector<24x16xbf16>
    %c0_2 = arith.constant 0 : index
    %c0_3 = arith.constant 0 : index
    %2 = vector.load %arg6[%c0_2, %c0_3] : memref<24x144xbf16, #tpu.memory_space<vmem>>, vector<24x16xbf16>
    tpu.vector_store %arg6[%c0_2, %c0_3], %1 {strides = array<i32>} : memref<24x144xbf16, #tpu.memory_space<vmem>>, vector<24x16xbf16>,
    %c0_4 = arith.constant 0 : index
    %c1 = arith.constant 1 : index
    %c0_5 = arith.constant 0 : index
    %3 = vector.load %arg2[%c0_4, %c1, %c0_5] : memref<1x42x16xbf16, #tpu.memory_space<vmem>>, vector<1x24x16xbf16>
    %4 = vector.shape_cast %3 : vector<1x24x16xbf16> to vector<24x16xbf16>
    %c0_6 = arith.constant 0 : index
    %c16 = arith.constant 16 : index
    %5 = vector.load %arg6[%c0_6, %c16] : memref<24x144xbf16, #tpu.memory_space<vmem>>, vector<24x16xbf16>
    tpu.vector_store %arg6[%c0_6, %c16], %4 {strides = array<i32>} : memref<24x144xbf16, #tpu.memory_space<vmem>>, vector<24x16xbf16>,
    %c0_7 = arith.constant 0 : index
    %c2 = arith.constant 2 : index
    %c0_8 = arith.constant 0 : index
    %6 = vector.load %arg2[%c0_7, %c2, %c0_8] : memref<1x42x16xbf16, #tpu.memory_space<vmem>>, vector<1x24x16xbf16>
    %7 = vector.shape_cast %6 : vector<1x24x16xbf16> to vector<24x16xbf16>
    %c0_9 = arith.constant 0 : index
    %c32 = arith.constant 32 : index
    %8 = vector.load %arg6[%c0_9, %c32] : memref<24x144xbf16, #tpu.memory_space<vmem>>, vector<24x16xbf16>
    tpu.vector_store %arg6[%c0_9, %c32], %7 {strides = array<i32>} : memref<24x144xbf16, #tpu.memory_space<vmem>>, vector<24x16xbf16>,
    %c0_10 = arith.constant 0 : index
    %c6 = arith.constant 6 : index
    %c0_11 = arith.constant 0 : index
    %9 = vector.load %arg2[%c0_10, %c6, %c0_11] : memref<1x42x16xbf16, #tpu.memory_space<vmem>>, vector<1x24x16xbf16>
    %10 = vector.shape_cast %9 : vector<1x24x16xbf16> to vector<24x16xbf16>
    %c0_12 = arith.constant 0 : index
    %c48 = arith.constant 48 : index
    %11 = vector.load %arg6[%c0_12, %c48] : memref<24x144xbf16, #tpu.memory_space<vmem>>, vector<24x16xbf16>
    tpu.vector_store %arg6[%c0_12, %c48], %10 {strides = array<i32>} : memref<24x144xbf16, #tpu.memory_space<vmem>>, vector<24x16xbf16>,
    %c0_13 = arith.constant 0 : index
    %c7 = arith.constant 7 : index
    %c0_14 = arith.constant 0 : index
    %12 = vector.load %arg2[%c0_13, %c7, %c0_14] : memref<1x42x16xbf16, #tpu.memory_space<vmem>>, vector<1x24x16xbf16>
    %13 = vector.shape_cast %12 : vector<1x24x16xbf16> to vector<24x16xbf16>
    %c0_15 = arith.constant 0 : index
    %c64 = arith.constant 64 : index
    %14 = vector.load %arg6[%c0_15, %c64] : memref<24x144xbf16, #tpu.memory_space<vmem>>, vector<24x16xbf16>
    tpu.vector_store %arg6[%c0_15, %c64], %13 {strides = array<i32>} : memref<24x144xbf16, #tpu.memory_space<vmem>>, vector<24x16xbf16>,
    %c0_16 = arith.constant 0 : index
    %c8 = arith.constant 8 : index
    %c0_17 = arith.constant 0 : index
    %15 = vector.load %arg2[%c0_16, %c8, %c0_17] : memref<1x42x16xbf16, #tpu.memory_space<vmem>>, vector<1x24x16xbf16>
    %16 = vector.shape_cast %15 : vector<1x24x16xbf16> to vector<24x16xbf16>
    %c0_18 = arith.constant 0 : index
    %c80 = arith.constant 80 : index
    %17 = vector.load %arg6[%c0_18, %c80] : memref<24x144xbf16, #tpu.memory_space<vmem>>, vector<24x16xbf16>
    tpu.vector_store %arg6[%c0_18, %c80], %16 {strides = array<i32>} : memref<24x144xbf16, #tpu.memory_space<vmem>>, vector<24x16xbf16>,
    %c0_19 = arith.constant 0 : index
    %c12 = arith.constant 12 : index
    %c0_20 = arith.constant 0 : index
    %18 = vector.load %arg2[%c0_19, %c12, %c0_20] : memref<1x42x16xbf16, #tpu.memory_space<vmem>>, vector<1x24x16xbf16>
    %19 = vector.shape_cast %18 : vector<1x24x16xbf16> to vector<24x16xbf16>
    %c0_21 = arith.constant 0 : index
    %c96 = arith.constant 96 : index
    %20 = vector.load %arg6[%c0_21, %c96] : memref<24x144xbf16, #tpu.memory_space<vmem>>, vector<24x16xbf16>
    tpu.vector_store %arg6[%c0_21, %c96], %19 {strides = array<i32>} : memref<24x144xbf16, #tpu.memory_space<vmem>>, vector<24x16xbf16>,
    %c0_22 = arith.constant 0 : index
    %c13 = arith.constant 13 : index
    %c0_23 = arith.constant 0 : index
    %21 = vector.load %arg2[%c0_22, %c13, %c0_23] : memref<1x42x16xbf16, #tpu.memory_space<vmem>>, vector<1x24x16xbf16>
    %22 = vector.shape_cast %21 : vector<1x24x16xbf16> to vector<24x16xbf16>
    %c0_24 = arith.constant 0 : index
    %c112 = arith.constant 112 : index
    %23 = vector.load %arg6[%c0_24, %c112] : memref<24x144xbf16, #tpu.memory_space<vmem>>, vector<24x16xbf16>
    tpu.vector_store %arg6[%c0_24, %c112], %22 {strides = array<i32>} : memref<24x144xbf16, #tpu.memory_space<vmem>>, vector<24x16xbf16>,
    %c0_25 = arith.constant 0 : index
    %c14 = arith.constant 14 : index
    %c0_26 = arith.constant 0 : index
    %24 = vector.load %arg2[%c0_25, %c14, %c0_26] : memref<1x42x16xbf16, #tpu.memory_space<vmem>>, vector<1x24x16xbf16>
    %25 = vector.shape_cast %24 : vector<1x24x16xbf16> to vector<24x16xbf16>
    %c0_27 = arith.constant 0 : index
    %c128 = arith.constant 128 : index
    %26 = vector.load %arg6[%c0_27, %c128] : memref<24x144xbf16, #tpu.memory_space<vmem>>, vector<24x16xbf16>
    tpu.vector_store %arg6[%c0_27, %c128], %25 {strides = array<i32>} : memref<24x144xbf16, #tpu.memory_space<vmem>>, vector<24x16xbf16>,
    %c0_28 = arith.constant 0 : index
    %c0_29 = arith.constant 0 : index
    %27 = vector.load %arg6[%c0_28, %c0_29] : memref<24x144xbf16, #tpu.memory_space<vmem>>, vector<24x144xbf16>
    %c0_30 = arith.constant 0 : index
    %c0_31 = arith.constant 0 : index
    %28 = vector.load %arg3[%c0_30, %c0_31] : memref<144x16xbf16, #tpu.memory_space<vmem>>, vector<144x16xbf16>
    %cst = arith.constant dense<0.000000e+00> : vector<24x16xf32>
    %29 = tpu.matmul %27, %28, %cst {dimension_numbers = #tpu.dot_dimension_numbers<[1], [0], [0], [1], [0, 0, 1, 1], [], []>} : vector<24x144xbf16>, vector<144x16xbf16>, vector<24x16xf32> -> vector<24x16xf32>
    %c0_32 = arith.constant 0 : index
    %c0_33 = arith.constant 0 : index
    %30 = vector.load %arg4[%c0_32, %c0_33] : memref<1x16xf32, #tpu.memory_space<vmem>>, vector<1x16xf32>
    %31 = vector.broadcast %30 : vector<1x16xf32> to vector<24x16xf32>
    %32 = arith.addf %29, %31 : vector<24x16xf32>
    %cst_34 = arith.constant 0.000000e+00 : f32
    %33 = vector.broadcast %cst_34 : f32 to vector<24x16xf32>
    %34 = arith.maximumf %32, %33 : vector<24x16xf32>
    %35 = vector.shape_cast %34 : vector<24x16xf32> to vector<1x24x16xf32>
    %36 = arith.truncf %35 : vector<1x24x16xf32> to vector<1x24x16xbf16>
    %c0_35 = arith.constant 0 : index
    %c0_36 = arith.constant 0 : index
    %c0_37 = arith.constant 0 : index
    %37 = vector.load %arg5[%c0_35, %c0_36, %c0_37] : memref<1x24x16xbf16, #tpu.memory_space<vmem>>, vector<1x24x16xbf16>
    tpu.vector_store %arg5[%c0_35, %c0_36, %c0_37], %36 {strides = array<i32>} : memref<1x24x16xbf16, #tpu.memory_space<vmem>>, vector<1x24x16xbf16>,
    return
  }
  func.func @transform_0(%arg0: i32, %arg1: i32) -> (i32, i32, i32) {
    %c0_i32 = arith.constant 0 : i32
    %c0_i32_0 = arith.constant 0 : i32
    %c0_i32_1 = arith.constant 0 : i32
    return %arg0, %c0_i32, %c0_i32_0 : i32, i32, i32
  }
  func.func @transform_1(%arg0: i32, %arg1: i32) -> (i32, i32) {
    %c0_i32 = arith.constant 0 : i32
    %c0_i32_0 = arith.constant 0 : i32
    %c0_i32_1 = arith.constant 0 : i32
    return %c0_i32, %c0_i32_0 : i32, i32
  }
  func.func @transform_2(%arg0: i32, %arg1: i32) -> (i32, i32) {
    %c0_i32 = arith.constant 0 : i32
    %c0_i32_0 = arith.constant 0 : i32
    %c0_i32_1 = arith.constant 0 : i32
    return %c0_i32, %c0_i32_0 : i32, i32
  }
  func.func @transform_3(%arg0: i32, %arg1: i32) -> (i32, i32, i32) {
    %c0_i32 = arith.constant 0 : i32
    %c0_i32_0 = arith.constant 0 : i32
    return %arg0, %arg1, %c0_i32 : i32, i32, i32
  }
}

module attributes {stable_mosaic.version = 11 : i64} {
  func.func @_aspp_fused_kernel(%arg0: i32, %arg1: i32, %arg2: memref<1x110x16xbf16, #tpu.memory_space<vmem>>, %arg3: memref<16x16xbf16, #tpu.memory_space<vmem>>, %arg4: memref<144x16xbf16, #tpu.memory_space<vmem>>, %arg5: memref<144x16xbf16, #tpu.memory_space<vmem>>, %arg6: memref<3x1x16xf32, #tpu.memory_space<vmem>>, %arg7: memref<3x16x16xbf16, #tpu.memory_space<vmem>>, %arg8: memref<1x1x16xf32, #tpu.memory_space<vmem>>, %arg9: memref<1x40x16xbf16, #tpu.memory_space<vmem>>, %arg10: memref<40x144xbf16, #tpu.memory_space<vmem>>) attributes {dimension_semantics = [#tpu.dimension_semantics<parallel>, #tpu.dimension_semantics<parallel>], iteration_bounds = array<i64: 2, 1>, scalar_prefetch = 0 : i64, scratch_operands = 1 : i64, tpu.core_type = #tpu.core_type<tc>, window_params = [{transform_indices = @transform_0, window_bounds = array<i64: 1, 110, 16>}, {pipeline_mode = #tpu.pipeline_mode<synchronous>, transform_indices = @transform_1, window_bounds = array<i64: 16, 16>}, {pipeline_mode = #tpu.pipeline_mode<synchronous>, transform_indices = @transform_2, window_bounds = array<i64: 144, 16>}, {pipeline_mode = #tpu.pipeline_mode<synchronous>, transform_indices = @transform_3, window_bounds = array<i64: 144, 16>}, {pipeline_mode = #tpu.pipeline_mode<synchronous>, transform_indices = @transform_4, window_bounds = array<i64: 3, 1, 16>}, {pipeline_mode = #tpu.pipeline_mode<synchronous>, transform_indices = @transform_5, window_bounds = array<i64: 3, 16, 16>}, {transform_indices = @transform_6, window_bounds = array<i64: 1, 1, 16>}, {transform_indices = @transform_7, window_bounds = array<i64: 1, 40, 16>}]} {
    %c0 = arith.constant 0 : index
    %c33 = arith.constant 33 : index
    %c0_0 = arith.constant 0 : index
    %0 = vector.load %arg2[%c0, %c33, %c0_0] : memref<1x110x16xbf16, #tpu.memory_space<vmem>>, vector<1x40x16xbf16>
    %1 = vector.shape_cast %0 : vector<1x40x16xbf16> to vector<40x16xbf16>
    %c0_1 = arith.constant 0 : index
    %c0_2 = arith.constant 0 : index
    %2 = vector.load %arg3[%c0_1, %c0_2] : memref<16x16xbf16, #tpu.memory_space<vmem>>, vector<16x16xbf16>
    %cst = arith.constant dense<0.000000e+00> : vector<40x16xf32>
    %3 = tpu.matmul %1, %2, %cst {dimension_numbers = #tpu.dot_dimension_numbers<[1], [0], [0], [1], [0, 0, 1, 1], [], []>} : vector<40x16xbf16>, vector<16x16xbf16>, vector<40x16xf32> -> vector<40x16xf32>
    %c0_3 = arith.constant 0 : index
    %c0_4 = arith.constant 0 : index
    %c0_5 = arith.constant 0 : index
    %4 = vector.load %arg6[%c0_3, %c0_4, %c0_5] : memref<3x1x16xf32, #tpu.memory_space<vmem>>, vector<1x1x16xf32>
    %5 = vector.shape_cast %4 : vector<1x1x16xf32> to vector<1x16xf32>
    %6 = vector.broadcast %5 : vector<1x16xf32> to vector<40x16xf32>
    %7 = arith.addf %3, %6 : vector<40x16xf32>
    %cst_6 = arith.constant 0.000000e+00 : f32
    %8 = vector.broadcast %cst_6 : f32 to vector<40x16xf32>
    %9 = arith.maximumf %7, %8 : vector<40x16xf32>
    %10 = arith.truncf %9 : vector<40x16xf32> to vector<40x16xbf16>
    %c0_7 = arith.constant 0 : index
    %c0_8 = arith.constant 0 : index
    %c0_9 = arith.constant 0 : index
    %11 = vector.load %arg8[%c0_7, %c0_8, %c0_9] : memref<1x1x16xf32, #tpu.memory_space<vmem>>, vector<1x1x16xf32>
    %12 = vector.shape_cast %11 : vector<1x1x16xf32> to vector<1x16xf32>
    %c0_10 = arith.constant 0 : index
    %c0_11 = arith.constant 0 : index
    %c0_12 = arith.constant 0 : index
    %13 = vector.load %arg7[%c0_10, %c0_11, %c0_12] : memref<3x16x16xbf16, #tpu.memory_space<vmem>>, vector<1x16x16xbf16>
    %14 = vector.shape_cast %13 : vector<1x16x16xbf16> to vector<16x16xbf16>
    %cst_13 = arith.constant dense<0.000000e+00> : vector<40x16xf32>
    %15 = tpu.matmul %10, %14, %cst_13 {dimension_numbers = #tpu.dot_dimension_numbers<[1], [0], [0], [1], [0, 0, 1, 1], [], []>} : vector<40x16xbf16>, vector<16x16xbf16>, vector<40x16xf32> -> vector<40x16xf32>
    %16 = vector.broadcast %12 : vector<1x16xf32> to vector<40x16xf32>
    %17 = arith.addf %16, %15 : vector<40x16xf32>
    %c0_14 = arith.constant 0 : index
    %c11 = arith.constant 11 : index
    %c0_15 = arith.constant 0 : index
    %18 = vector.load %arg2[%c0_14, %c11, %c0_15] : memref<1x110x16xbf16, #tpu.memory_space<vmem>>, vector<1x40x16xbf16>
    %19 = vector.shape_cast %18 : vector<1x40x16xbf16> to vector<40x16xbf16>
    %c0_16 = arith.constant 0 : index
    %c0_17 = arith.constant 0 : index
    %20 = vector.load %arg10[%c0_16, %c0_17] : memref<40x144xbf16, #tpu.memory_space<vmem>>, vector<40x16xbf16>
    tpu.vector_store %arg10[%c0_16, %c0_17], %19 {strides = array<i32>} : memref<40x144xbf16, #tpu.memory_space<vmem>>, vector<40x16xbf16>,
    %c0_18 = arith.constant 0 : index
    %c13 = arith.constant 13 : index
    %c0_19 = arith.constant 0 : index
    %21 = vector.load %arg2[%c0_18, %c13, %c0_19] : memref<1x110x16xbf16, #tpu.memory_space<vmem>>, vector<1x40x16xbf16>
    %22 = vector.shape_cast %21 : vector<1x40x16xbf16> to vector<40x16xbf16>
    %c0_20 = arith.constant 0 : index
    %c16 = arith.constant 16 : index
    %23 = vector.load %arg10[%c0_20, %c16] : memref<40x144xbf16, #tpu.memory_space<vmem>>, vector<40x16xbf16>
    tpu.vector_store %arg10[%c0_20, %c16], %22 {strides = array<i32>} : memref<40x144xbf16, #tpu.memory_space<vmem>>, vector<40x16xbf16>,
    %c0_21 = arith.constant 0 : index
    %c15 = arith.constant 15 : index
    %c0_22 = arith.constant 0 : index
    %24 = vector.load %arg2[%c0_21, %c15, %c0_22] : memref<1x110x16xbf16, #tpu.memory_space<vmem>>, vector<1x40x16xbf16>
    %25 = vector.shape_cast %24 : vector<1x40x16xbf16> to vector<40x16xbf16>
    %c0_23 = arith.constant 0 : index
    %c32 = arith.constant 32 : index
    %26 = vector.load %arg10[%c0_23, %c32] : memref<40x144xbf16, #tpu.memory_space<vmem>>, vector<40x16xbf16>
    tpu.vector_store %arg10[%c0_23, %c32], %25 {strides = array<i32>} : memref<40x144xbf16, #tpu.memory_space<vmem>>, vector<40x16xbf16>,
    %c0_24 = arith.constant 0 : index
    %c31 = arith.constant 31 : index
    %c0_25 = arith.constant 0 : index
    %27 = vector.load %arg2[%c0_24, %c31, %c0_25] : memref<1x110x16xbf16, #tpu.memory_space<vmem>>, vector<1x40x16xbf16>
    %28 = vector.shape_cast %27 : vector<1x40x16xbf16> to vector<40x16xbf16>
    %c0_26 = arith.constant 0 : index
    %c48 = arith.constant 48 : index
    %29 = vector.load %arg10[%c0_26, %c48] : memref<40x144xbf16, #tpu.memory_space<vmem>>, vector<40x16xbf16>
    tpu.vector_store %arg10[%c0_26, %c48], %28 {strides = array<i32>} : memref<40x144xbf16, #tpu.memory_space<vmem>>, vector<40x16xbf16>,
    %c0_27 = arith.constant 0 : index
    %c33_28 = arith.constant 33 : index
    %c0_29 = arith.constant 0 : index
    %30 = vector.load %arg2[%c0_27, %c33_28, %c0_29] : memref<1x110x16xbf16, #tpu.memory_space<vmem>>, vector<1x40x16xbf16>
    %31 = vector.shape_cast %30 : vector<1x40x16xbf16> to vector<40x16xbf16>
    %c0_30 = arith.constant 0 : index
    %c64 = arith.constant 64 : index
    %32 = vector.load %arg10[%c0_30, %c64] : memref<40x144xbf16, #tpu.memory_space<vmem>>, vector<40x16xbf16>
    tpu.vector_store %arg10[%c0_30, %c64], %31 {strides = array<i32>} : memref<40x144xbf16, #tpu.memory_space<vmem>>, vector<40x16xbf16>,
    %c0_31 = arith.constant 0 : index
    %c35 = arith.constant 35 : index
    %c0_32 = arith.constant 0 : index
    %33 = vector.load %arg2[%c0_31, %c35, %c0_32] : memref<1x110x16xbf16, #tpu.memory_space<vmem>>, vector<1x40x16xbf16>
    %34 = vector.shape_cast %33 : vector<1x40x16xbf16> to vector<40x16xbf16>
    %c0_33 = arith.constant 0 : index
    %c80 = arith.constant 80 : index
    %35 = vector.load %arg10[%c0_33, %c80] : memref<40x144xbf16, #tpu.memory_space<vmem>>, vector<40x16xbf16>
    tpu.vector_store %arg10[%c0_33, %c80], %34 {strides = array<i32>} : memref<40x144xbf16, #tpu.memory_space<vmem>>, vector<40x16xbf16>,
    %c0_34 = arith.constant 0 : index
    %c51 = arith.constant 51 : index
    %c0_35 = arith.constant 0 : index
    %36 = vector.load %arg2[%c0_34, %c51, %c0_35] : memref<1x110x16xbf16, #tpu.memory_space<vmem>>, vector<1x40x16xbf16>
    %37 = vector.shape_cast %36 : vector<1x40x16xbf16> to vector<40x16xbf16>
    %c0_36 = arith.constant 0 : index
    %c96 = arith.constant 96 : index
    %38 = vector.load %arg10[%c0_36, %c96] : memref<40x144xbf16, #tpu.memory_space<vmem>>, vector<40x16xbf16>
    tpu.vector_store %arg10[%c0_36, %c96], %37 {strides = array<i32>} : memref<40x144xbf16, #tpu.memory_space<vmem>>, vector<40x16xbf16>,
    %c0_37 = arith.constant 0 : index
    %c53 = arith.constant 53 : index
    %c0_38 = arith.constant 0 : index
    %39 = vector.load %arg2[%c0_37, %c53, %c0_38] : memref<1x110x16xbf16, #tpu.memory_space<vmem>>, vector<1x40x16xbf16>
    %40 = vector.shape_cast %39 : vector<1x40x16xbf16> to vector<40x16xbf16>
    %c0_39 = arith.constant 0 : index
    %c112 = arith.constant 112 : index
    %41 = vector.load %arg10[%c0_39, %c112] : memref<40x144xbf16, #tpu.memory_space<vmem>>, vector<40x16xbf16>
    tpu.vector_store %arg10[%c0_39, %c112], %40 {strides = array<i32>} : memref<40x144xbf16, #tpu.memory_space<vmem>>, vector<40x16xbf16>,
    %c0_40 = arith.constant 0 : index
    %c55 = arith.constant 55 : index
    %c0_41 = arith.constant 0 : index
    %42 = vector.load %arg2[%c0_40, %c55, %c0_41] : memref<1x110x16xbf16, #tpu.memory_space<vmem>>, vector<1x40x16xbf16>
    %43 = vector.shape_cast %42 : vector<1x40x16xbf16> to vector<40x16xbf16>
    %c0_42 = arith.constant 0 : index
    %c128 = arith.constant 128 : index
    %44 = vector.load %arg10[%c0_42, %c128] : memref<40x144xbf16, #tpu.memory_space<vmem>>, vector<40x16xbf16>
    tpu.vector_store %arg10[%c0_42, %c128], %43 {strides = array<i32>} : memref<40x144xbf16, #tpu.memory_space<vmem>>, vector<40x16xbf16>,
    %c0_43 = arith.constant 0 : index
    %c0_44 = arith.constant 0 : index
    %45 = vector.load %arg10[%c0_43, %c0_44] : memref<40x144xbf16, #tpu.memory_space<vmem>>, vector<40x144xbf16>
    %c0_45 = arith.constant 0 : index
    %c0_46 = arith.constant 0 : index
    %46 = vector.load %arg4[%c0_45, %c0_46] : memref<144x16xbf16, #tpu.memory_space<vmem>>, vector<144x16xbf16>
    %cst_47 = arith.constant dense<0.000000e+00> : vector<40x16xf32>
    %47 = tpu.matmul %45, %46, %cst_47 {dimension_numbers = #tpu.dot_dimension_numbers<[1], [0], [0], [1], [0, 0, 1, 1], [], []>} : vector<40x144xbf16>, vector<144x16xbf16>, vector<40x16xf32> -> vector<40x16xf32>
    %c1 = arith.constant 1 : index
    %c0_48 = arith.constant 0 : index
    %c0_49 = arith.constant 0 : index
    %48 = vector.load %arg6[%c1, %c0_48, %c0_49] : memref<3x1x16xf32, #tpu.memory_space<vmem>>, vector<1x1x16xf32>
    %49 = vector.shape_cast %48 : vector<1x1x16xf32> to vector<1x16xf32>
    %50 = vector.broadcast %49 : vector<1x16xf32> to vector<40x16xf32>
    %51 = arith.addf %47, %50 : vector<40x16xf32>
    %cst_50 = arith.constant 0.000000e+00 : f32
    %52 = vector.broadcast %cst_50 : f32 to vector<40x16xf32>
    %53 = arith.maximumf %51, %52 : vector<40x16xf32>
    %54 = arith.truncf %53 : vector<40x16xf32> to vector<40x16xbf16>
    %c1_51 = arith.constant 1 : index
    %c0_52 = arith.constant 0 : index
    %c0_53 = arith.constant 0 : index
    %55 = vector.load %arg7[%c1_51, %c0_52, %c0_53] : memref<3x16x16xbf16, #tpu.memory_space<vmem>>, vector<1x16x16xbf16>
    %56 = vector.shape_cast %55 : vector<1x16x16xbf16> to vector<16x16xbf16>
    %cst_54 = arith.constant dense<0.000000e+00> : vector<40x16xf32>
    %57 = tpu.matmul %54, %56, %cst_54 {dimension_numbers = #tpu.dot_dimension_numbers<[1], [0], [0], [1], [0, 0, 1, 1], [], []>} : vector<40x16xbf16>, vector<16x16xbf16>, vector<40x16xf32> -> vector<40x16xf32>
    %58 = arith.addf %17, %57 : vector<40x16xf32>
    %c0_55 = arith.constant 0 : index
    %c0_56 = arith.constant 0 : index
    %c0_57 = arith.constant 0 : index
    %59 = vector.load %arg2[%c0_55, %c0_56, %c0_57] : memref<1x110x16xbf16, #tpu.memory_space<vmem>>, vector<1x40x16xbf16>
    %60 = vector.shape_cast %59 : vector<1x40x16xbf16> to vector<40x16xbf16>
    %c0_58 = arith.constant 0 : index
    %c0_59 = arith.constant 0 : index
    %61 = vector.load %arg10[%c0_58, %c0_59] : memref<40x144xbf16, #tpu.memory_space<vmem>>, vector<40x16xbf16>
    tpu.vector_store %arg10[%c0_58, %c0_59], %60 {strides = array<i32>} : memref<40x144xbf16, #tpu.memory_space<vmem>>, vector<40x16xbf16>,
    %c0_60 = arith.constant 0 : index
    %c3 = arith.constant 3 : index
    %c0_61 = arith.constant 0 : index
    %62 = vector.load %arg2[%c0_60, %c3, %c0_61] : memref<1x110x16xbf16, #tpu.memory_space<vmem>>, vector<1x40x16xbf16>
    %63 = vector.shape_cast %62 : vector<1x40x16xbf16> to vector<40x16xbf16>
    %c0_62 = arith.constant 0 : index
    %c16_63 = arith.constant 16 : index
    %64 = vector.load %arg10[%c0_62, %c16_63] : memref<40x144xbf16, #tpu.memory_space<vmem>>, vector<40x16xbf16>
    tpu.vector_store %arg10[%c0_62, %c16_63], %63 {strides = array<i32>} : memref<40x144xbf16, #tpu.memory_space<vmem>>, vector<40x16xbf16>,
    %c0_64 = arith.constant 0 : index
    %c6 = arith.constant 6 : index
    %c0_65 = arith.constant 0 : index
    %65 = vector.load %arg2[%c0_64, %c6, %c0_65] : memref<1x110x16xbf16, #tpu.memory_space<vmem>>, vector<1x40x16xbf16>
    %66 = vector.shape_cast %65 : vector<1x40x16xbf16> to vector<40x16xbf16>
    %c0_66 = arith.constant 0 : index
    %c32_67 = arith.constant 32 : index
    %67 = vector.load %arg10[%c0_66, %c32_67] : memref<40x144xbf16, #tpu.memory_space<vmem>>, vector<40x16xbf16>
    tpu.vector_store %arg10[%c0_66, %c32_67], %66 {strides = array<i32>} : memref<40x144xbf16, #tpu.memory_space<vmem>>, vector<40x16xbf16>,
    %c0_68 = arith.constant 0 : index
    %c30 = arith.constant 30 : index
    %c0_69 = arith.constant 0 : index
    %68 = vector.load %arg2[%c0_68, %c30, %c0_69] : memref<1x110x16xbf16, #tpu.memory_space<vmem>>, vector<1x40x16xbf16>
    %69 = vector.shape_cast %68 : vector<1x40x16xbf16> to vector<40x16xbf16>
    %c0_70 = arith.constant 0 : index
    %c48_71 = arith.constant 48 : index
    %70 = vector.load %arg10[%c0_70, %c48_71] : memref<40x144xbf16, #tpu.memory_space<vmem>>, vector<40x16xbf16>
    tpu.vector_store %arg10[%c0_70, %c48_71], %69 {strides = array<i32>} : memref<40x144xbf16, #tpu.memory_space<vmem>>, vector<40x16xbf16>,
    %c0_72 = arith.constant 0 : index
    %c33_73 = arith.constant 33 : index
    %c0_74 = arith.constant 0 : index
    %71 = vector.load %arg2[%c0_72, %c33_73, %c0_74] : memref<1x110x16xbf16, #tpu.memory_space<vmem>>, vector<1x40x16xbf16>
    %72 = vector.shape_cast %71 : vector<1x40x16xbf16> to vector<40x16xbf16>
    %c0_75 = arith.constant 0 : index
    %c64_76 = arith.constant 64 : index
    %73 = vector.load %arg10[%c0_75, %c64_76] : memref<40x144xbf16, #tpu.memory_space<vmem>>, vector<40x16xbf16>
    tpu.vector_store %arg10[%c0_75, %c64_76], %72 {strides = array<i32>} : memref<40x144xbf16, #tpu.memory_space<vmem>>, vector<40x16xbf16>,
    %c0_77 = arith.constant 0 : index
    %c36 = arith.constant 36 : index
    %c0_78 = arith.constant 0 : index
    %74 = vector.load %arg2[%c0_77, %c36, %c0_78] : memref<1x110x16xbf16, #tpu.memory_space<vmem>>, vector<1x40x16xbf16>
    %75 = vector.shape_cast %74 : vector<1x40x16xbf16> to vector<40x16xbf16>
    %c0_79 = arith.constant 0 : index
    %c80_80 = arith.constant 80 : index
    %76 = vector.load %arg10[%c0_79, %c80_80] : memref<40x144xbf16, #tpu.memory_space<vmem>>, vector<40x16xbf16>
    tpu.vector_store %arg10[%c0_79, %c80_80], %75 {strides = array<i32>} : memref<40x144xbf16, #tpu.memory_space<vmem>>, vector<40x16xbf16>,
    %c0_81 = arith.constant 0 : index
    %c60 = arith.constant 60 : index
    %c0_82 = arith.constant 0 : index
    %77 = vector.load %arg2[%c0_81, %c60, %c0_82] : memref<1x110x16xbf16, #tpu.memory_space<vmem>>, vector<1x40x16xbf16>
    %78 = vector.shape_cast %77 : vector<1x40x16xbf16> to vector<40x16xbf16>
    %c0_83 = arith.constant 0 : index
    %c96_84 = arith.constant 96 : index
    %79 = vector.load %arg10[%c0_83, %c96_84] : memref<40x144xbf16, #tpu.memory_space<vmem>>, vector<40x16xbf16>
    tpu.vector_store %arg10[%c0_83, %c96_84], %78 {strides = array<i32>} : memref<40x144xbf16, #tpu.memory_space<vmem>>, vector<40x16xbf16>,
    %c0_85 = arith.constant 0 : index
    %c63 = arith.constant 63 : index
    %c0_86 = arith.constant 0 : index
    %80 = vector.load %arg2[%c0_85, %c63, %c0_86] : memref<1x110x16xbf16, #tpu.memory_space<vmem>>, vector<1x40x16xbf16>
    %81 = vector.shape_cast %80 : vector<1x40x16xbf16> to vector<40x16xbf16>
    %c0_87 = arith.constant 0 : index
    %c112_88 = arith.constant 112 : index
    %82 = vector.load %arg10[%c0_87, %c112_88] : memref<40x144xbf16, #tpu.memory_space<vmem>>, vector<40x16xbf16>
    tpu.vector_store %arg10[%c0_87, %c112_88], %81 {strides = array<i32>} : memref<40x144xbf16, #tpu.memory_space<vmem>>, vector<40x16xbf16>,
    %c0_89 = arith.constant 0 : index
    %c66 = arith.constant 66 : index
    %c0_90 = arith.constant 0 : index
    %83 = vector.load %arg2[%c0_89, %c66, %c0_90] : memref<1x110x16xbf16, #tpu.memory_space<vmem>>, vector<1x40x16xbf16>
    %84 = vector.shape_cast %83 : vector<1x40x16xbf16> to vector<40x16xbf16>
    %c0_91 = arith.constant 0 : index
    %c128_92 = arith.constant 128 : index
    %85 = vector.load %arg10[%c0_91, %c128_92] : memref<40x144xbf16, #tpu.memory_space<vmem>>, vector<40x16xbf16>
    tpu.vector_store %arg10[%c0_91, %c128_92], %84 {strides = array<i32>} : memref<40x144xbf16, #tpu.memory_space<vmem>>, vector<40x16xbf16>,
    %c0_93 = arith.constant 0 : index
    %c0_94 = arith.constant 0 : index
    %86 = vector.load %arg10[%c0_93, %c0_94] : memref<40x144xbf16, #tpu.memory_space<vmem>>, vector<40x144xbf16>
    %c0_95 = arith.constant 0 : index
    %c0_96 = arith.constant 0 : index
    %87 = vector.load %arg5[%c0_95, %c0_96] : memref<144x16xbf16, #tpu.memory_space<vmem>>, vector<144x16xbf16>
    %cst_97 = arith.constant dense<0.000000e+00> : vector<40x16xf32>
    %88 = tpu.matmul %86, %87, %cst_97 {dimension_numbers = #tpu.dot_dimension_numbers<[1], [0], [0], [1], [0, 0, 1, 1], [], []>} : vector<40x144xbf16>, vector<144x16xbf16>, vector<40x16xf32> -> vector<40x16xf32>
    %c2 = arith.constant 2 : index
    %c0_98 = arith.constant 0 : index
    %c0_99 = arith.constant 0 : index
    %89 = vector.load %arg6[%c2, %c0_98, %c0_99] : memref<3x1x16xf32, #tpu.memory_space<vmem>>, vector<1x1x16xf32>
    %90 = vector.shape_cast %89 : vector<1x1x16xf32> to vector<1x16xf32>
    %91 = vector.broadcast %90 : vector<1x16xf32> to vector<40x16xf32>
    %92 = arith.addf %88, %91 : vector<40x16xf32>
    %cst_100 = arith.constant 0.000000e+00 : f32
    %93 = vector.broadcast %cst_100 : f32 to vector<40x16xf32>
    %94 = arith.maximumf %92, %93 : vector<40x16xf32>
    %95 = arith.truncf %94 : vector<40x16xf32> to vector<40x16xbf16>
    %c2_101 = arith.constant 2 : index
    %c0_102 = arith.constant 0 : index
    %c0_103 = arith.constant 0 : index
    %96 = vector.load %arg7[%c2_101, %c0_102, %c0_103] : memref<3x16x16xbf16, #tpu.memory_space<vmem>>, vector<1x16x16xbf16>
    %97 = vector.shape_cast %96 : vector<1x16x16xbf16> to vector<16x16xbf16>
    %cst_104 = arith.constant dense<0.000000e+00> : vector<40x16xf32>
    %98 = tpu.matmul %95, %97, %cst_104 {dimension_numbers = #tpu.dot_dimension_numbers<[1], [0], [0], [1], [0, 0, 1, 1], [], []>} : vector<40x16xbf16>, vector<16x16xbf16>, vector<40x16xf32> -> vector<40x16xf32>
    %99 = arith.addf %58, %98 : vector<40x16xf32>
    %cst_105 = arith.constant 0.000000e+00 : f32
    %100 = vector.broadcast %cst_105 : f32 to vector<40x16xf32>
    %101 = arith.maximumf %99, %100 : vector<40x16xf32>
    %102 = vector.shape_cast %101 : vector<40x16xf32> to vector<1x40x16xf32>
    %103 = arith.truncf %102 : vector<1x40x16xf32> to vector<1x40x16xbf16>
    %c0_106 = arith.constant 0 : index
    %c0_107 = arith.constant 0 : index
    %c0_108 = arith.constant 0 : index
    %104 = vector.load %arg9[%c0_106, %c0_107, %c0_108] : memref<1x40x16xbf16, #tpu.memory_space<vmem>>, vector<1x40x16xbf16>
    tpu.vector_store %arg9[%c0_106, %c0_107, %c0_108], %103 {strides = array<i32>} : memref<1x40x16xbf16, #tpu.memory_space<vmem>>, vector<1x40x16xbf16>,
    return
  }
  func.func @transform_0(%arg0: i32, %arg1: i32) -> (i32, i32, i32) {
    %c0_i32 = arith.constant 0 : i32
    %c0_i32_0 = arith.constant 0 : i32
    %c0_i32_1 = arith.constant 0 : i32
    return %arg0, %c0_i32, %c0_i32_0 : i32, i32, i32
  }
  func.func @transform_1(%arg0: i32, %arg1: i32) -> (i32, i32) {
    %c0_i32 = arith.constant 0 : i32
    %c0_i32_0 = arith.constant 0 : i32
    %c0_i32_1 = arith.constant 0 : i32
    return %c0_i32, %c0_i32_0 : i32, i32
  }
  func.func @transform_2(%arg0: i32, %arg1: i32) -> (i32, i32) {
    %c0_i32 = arith.constant 0 : i32
    %c0_i32_0 = arith.constant 0 : i32
    %c0_i32_1 = arith.constant 0 : i32
    return %c0_i32, %c0_i32_0 : i32, i32
  }
  func.func @transform_3(%arg0: i32, %arg1: i32) -> (i32, i32) {
    %c0_i32 = arith.constant 0 : i32
    %c0_i32_0 = arith.constant 0 : i32
    %c0_i32_1 = arith.constant 0 : i32
    return %c0_i32, %c0_i32_0 : i32, i32
  }
  func.func @transform_4(%arg0: i32, %arg1: i32) -> (i32, i32, i32) {
    %c0_i32 = arith.constant 0 : i32
    %c0_i32_0 = arith.constant 0 : i32
    %c0_i32_1 = arith.constant 0 : i32
    %c0_i32_2 = arith.constant 0 : i32
    return %c0_i32, %c0_i32_0, %c0_i32_1 : i32, i32, i32
  }
  func.func @transform_5(%arg0: i32, %arg1: i32) -> (i32, i32, i32) {
    %c0_i32 = arith.constant 0 : i32
    %c0_i32_0 = arith.constant 0 : i32
    %c0_i32_1 = arith.constant 0 : i32
    %c0_i32_2 = arith.constant 0 : i32
    return %c0_i32, %c0_i32_0, %c0_i32_1 : i32, i32, i32
  }
  func.func @transform_6(%arg0: i32, %arg1: i32) -> (i32, i32, i32) {
    %c0_i32 = arith.constant 0 : i32
    %c0_i32_0 = arith.constant 0 : i32
    %c0_i32_1 = arith.constant 0 : i32
    return %arg0, %c0_i32, %c0_i32_0 : i32, i32, i32
  }
  func.func @transform_7(%arg0: i32, %arg1: i32) -> (i32, i32, i32) {
    %c0_i32 = arith.constant 0 : i32
    %c0_i32_0 = arith.constant 0 : i32
    return %arg0, %arg1, %c0_i32 : i32, i32, i32
  }
}

module attributes {stable_mosaic.version = 11 : i64} {
  func.func @_gemm_bias_act_kernel(%arg0: i32, %arg1: memref<128x8xbf16, #tpu.memory_space<vmem>>, %arg2: memref<8x8xbf16, #tpu.memory_space<vmem>>, %arg3: memref<1x8xf32, #tpu.memory_space<vmem>>, %arg4: memref<128x8xbf16, #tpu.memory_space<vmem>>) attributes {dimension_semantics = [#tpu.dimension_semantics<parallel>], iteration_bounds = array<i64: 1>, scalar_prefetch = 0 : i64, scratch_operands = 0 : i64, tpu.core_type = #tpu.core_type<tc>, window_params = [{transform_indices = @transform_0, window_bounds = array<i64: 128, 8>}, {pipeline_mode = #tpu.pipeline_mode<synchronous>, transform_indices = @transform_1, window_bounds = array<i64: 8, 8>}, {pipeline_mode = #tpu.pipeline_mode<synchronous>, transform_indices = @transform_2, window_bounds = array<i64: 1, 8>}, {transform_indices = @transform_3, window_bounds = array<i64: 128, 8>}]} {
    %c0 = arith.constant 0 : index
    %c0_0 = arith.constant 0 : index
    %0 = vector.load %arg1[%c0, %c0_0] : memref<128x8xbf16, #tpu.memory_space<vmem>>, vector<128x8xbf16>
    %c0_1 = arith.constant 0 : index
    %c0_2 = arith.constant 0 : index
    %1 = vector.load %arg2[%c0_1, %c0_2] : memref<8x8xbf16, #tpu.memory_space<vmem>>, vector<8x8xbf16>
    %cst = arith.constant dense<0.000000e+00> : vector<128x8xf32>
    %2 = tpu.matmul %0, %1, %cst {dimension_numbers = #tpu.dot_dimension_numbers<[1], [0], [0], [1], [0, 0, 1, 1], [], []>} : vector<128x8xbf16>, vector<8x8xbf16>, vector<128x8xf32> -> vector<128x8xf32>
    %c0_3 = arith.constant 0 : index
    %c0_4 = arith.constant 0 : index
    %3 = vector.load %arg3[%c0_3, %c0_4] : memref<1x8xf32, #tpu.memory_space<vmem>>, vector<1x8xf32>
    %4 = vector.broadcast %3 : vector<1x8xf32> to vector<128x8xf32>
    %5 = arith.addf %2, %4 : vector<128x8xf32>
    %cst_5 = arith.constant 0.000000e+00 : f32
    %6 = vector.broadcast %cst_5 : f32 to vector<128x8xf32>
    %7 = arith.maximumf %5, %6 : vector<128x8xf32>
    %8 = arith.truncf %7 : vector<128x8xf32> to vector<128x8xbf16>
    %c0_6 = arith.constant 0 : index
    %c0_7 = arith.constant 0 : index
    %9 = vector.load %arg4[%c0_6, %c0_7] : memref<128x8xbf16, #tpu.memory_space<vmem>>, vector<128x8xbf16>
    tpu.vector_store %arg4[%c0_6, %c0_7], %8 {strides = array<i32>} : memref<128x8xbf16, #tpu.memory_space<vmem>>, vector<128x8xbf16>,
    return
  }
  func.func @transform_0(%arg0: i32) -> (i32, i32) {
    %c0_i32 = arith.constant 0 : i32
    %c0_i32_0 = arith.constant 0 : i32
    return %arg0, %c0_i32 : i32, i32
  }
  func.func @transform_1(%arg0: i32) -> (i32, i32) {
    %c0_i32 = arith.constant 0 : i32
    %c0_i32_0 = arith.constant 0 : i32
    %c0_i32_1 = arith.constant 0 : i32
    return %c0_i32, %c0_i32_0 : i32, i32
  }
  func.func @transform_2(%arg0: i32) -> (i32, i32) {
    %c0_i32 = arith.constant 0 : i32
    %c0_i32_0 = arith.constant 0 : i32
    %c0_i32_1 = arith.constant 0 : i32
    return %c0_i32, %c0_i32_0 : i32, i32
  }
  func.func @transform_3(%arg0: i32) -> (i32, i32) {
    %c0_i32 = arith.constant 0 : i32
    %c0_i32_0 = arith.constant 0 : i32
    return %arg0, %c0_i32 : i32, i32
  }
}

module attributes {stable_mosaic.version = 11 : i64} {
  func.func @_conv3x3_s1_kernel(%arg0: i32, %arg1: i32, %arg2: memref<1x110x24xbf16, #tpu.memory_space<vmem>>, %arg3: memref<216x16xbf16, #tpu.memory_space<vmem>>, %arg4: memref<1x16xf32, #tpu.memory_space<vmem>>, %arg5: memref<1x80x16xf32, #tpu.memory_space<vmem>>, %arg6: memref<80x216xbf16, #tpu.memory_space<vmem>>) attributes {dimension_semantics = [#tpu.dimension_semantics<parallel>, #tpu.dimension_semantics<parallel>], iteration_bounds = array<i64: 2, 1>, scalar_prefetch = 0 : i64, scratch_operands = 1 : i64, tpu.core_type = #tpu.core_type<tc>, window_params = [{transform_indices = @transform_0, window_bounds = array<i64: 1, 110, 24>}, {pipeline_mode = #tpu.pipeline_mode<synchronous>, transform_indices = @transform_1, window_bounds = array<i64: 216, 16>}, {pipeline_mode = #tpu.pipeline_mode<synchronous>, transform_indices = @transform_2, window_bounds = array<i64: 1, 16>}, {transform_indices = @transform_3, window_bounds = array<i64: 1, 80, 16>}]} {
    %c0 = arith.constant 0 : index
    %c0_0 = arith.constant 0 : index
    %c0_1 = arith.constant 0 : index
    %0 = vector.load %arg2[%c0, %c0_0, %c0_1] : memref<1x110x24xbf16, #tpu.memory_space<vmem>>, vector<1x80x24xbf16>
    %1 = vector.shape_cast %0 : vector<1x80x24xbf16> to vector<80x24xbf16>
    %c0_2 = arith.constant 0 : index
    %c0_3 = arith.constant 0 : index
    %2 = vector.load %arg6[%c0_2, %c0_3] : memref<80x216xbf16, #tpu.memory_space<vmem>>, vector<80x24xbf16>
    tpu.vector_store %arg6[%c0_2, %c0_3], %1 {strides = array<i32>} : memref<80x216xbf16, #tpu.memory_space<vmem>>, vector<80x24xbf16>,
    %c0_4 = arith.constant 0 : index
    %c1 = arith.constant 1 : index
    %c0_5 = arith.constant 0 : index
    %3 = vector.load %arg2[%c0_4, %c1, %c0_5] : memref<1x110x24xbf16, #tpu.memory_space<vmem>>, vector<1x80x24xbf16>
    %4 = vector.shape_cast %3 : vector<1x80x24xbf16> to vector<80x24xbf16>
    %c0_6 = arith.constant 0 : index
    %c24 = arith.constant 24 : index
    %5 = vector.load %arg6[%c0_6, %c24] : memref<80x216xbf16, #tpu.memory_space<vmem>>, vector<80x24xbf16>
    tpu.vector_store %arg6[%c0_6, %c24], %4 {strides = array<i32>} : memref<80x216xbf16, #tpu.memory_space<vmem>>, vector<80x24xbf16>,
    %c0_7 = arith.constant 0 : index
    %c2 = arith.constant 2 : index
    %c0_8 = arith.constant 0 : index
    %6 = vector.load %arg2[%c0_7, %c2, %c0_8] : memref<1x110x24xbf16, #tpu.memory_space<vmem>>, vector<1x80x24xbf16>
    %7 = vector.shape_cast %6 : vector<1x80x24xbf16> to vector<80x24xbf16>
    %c0_9 = arith.constant 0 : index
    %c48 = arith.constant 48 : index
    %8 = vector.load %arg6[%c0_9, %c48] : memref<80x216xbf16, #tpu.memory_space<vmem>>, vector<80x24xbf16>
    tpu.vector_store %arg6[%c0_9, %c48], %7 {strides = array<i32>} : memref<80x216xbf16, #tpu.memory_space<vmem>>, vector<80x24xbf16>,
    %c0_10 = arith.constant 0 : index
    %c10 = arith.constant 10 : index
    %c0_11 = arith.constant 0 : index
    %9 = vector.load %arg2[%c0_10, %c10, %c0_11] : memref<1x110x24xbf16, #tpu.memory_space<vmem>>, vector<1x80x24xbf16>
    %10 = vector.shape_cast %9 : vector<1x80x24xbf16> to vector<80x24xbf16>
    %c0_12 = arith.constant 0 : index
    %c72 = arith.constant 72 : index
    %11 = vector.load %arg6[%c0_12, %c72] : memref<80x216xbf16, #tpu.memory_space<vmem>>, vector<80x24xbf16>
    tpu.vector_store %arg6[%c0_12, %c72], %10 {strides = array<i32>} : memref<80x216xbf16, #tpu.memory_space<vmem>>, vector<80x24xbf16>,
    %c0_13 = arith.constant 0 : index
    %c11 = arith.constant 11 : index
    %c0_14 = arith.constant 0 : index
    %12 = vector.load %arg2[%c0_13, %c11, %c0_14] : memref<1x110x24xbf16, #tpu.memory_space<vmem>>, vector<1x80x24xbf16>
    %13 = vector.shape_cast %12 : vector<1x80x24xbf16> to vector<80x24xbf16>
    %c0_15 = arith.constant 0 : index
    %c96 = arith.constant 96 : index
    %14 = vector.load %arg6[%c0_15, %c96] : memref<80x216xbf16, #tpu.memory_space<vmem>>, vector<80x24xbf16>
    tpu.vector_store %arg6[%c0_15, %c96], %13 {strides = array<i32>} : memref<80x216xbf16, #tpu.memory_space<vmem>>, vector<80x24xbf16>,
    %c0_16 = arith.constant 0 : index
    %c12 = arith.constant 12 : index
    %c0_17 = arith.constant 0 : index
    %15 = vector.load %arg2[%c0_16, %c12, %c0_17] : memref<1x110x24xbf16, #tpu.memory_space<vmem>>, vector<1x80x24xbf16>
    %16 = vector.shape_cast %15 : vector<1x80x24xbf16> to vector<80x24xbf16>
    %c0_18 = arith.constant 0 : index
    %c120 = arith.constant 120 : index
    %17 = vector.load %arg6[%c0_18, %c120] : memref<80x216xbf16, #tpu.memory_space<vmem>>, vector<80x24xbf16>
    tpu.vector_store %arg6[%c0_18, %c120], %16 {strides = array<i32>} : memref<80x216xbf16, #tpu.memory_space<vmem>>, vector<80x24xbf16>,
    %c0_19 = arith.constant 0 : index
    %c20 = arith.constant 20 : index
    %c0_20 = arith.constant 0 : index
    %18 = vector.load %arg2[%c0_19, %c20, %c0_20] : memref<1x110x24xbf16, #tpu.memory_space<vmem>>, vector<1x80x24xbf16>
    %19 = vector.shape_cast %18 : vector<1x80x24xbf16> to vector<80x24xbf16>
    %c0_21 = arith.constant 0 : index
    %c144 = arith.constant 144 : index
    %20 = vector.load %arg6[%c0_21, %c144] : memref<80x216xbf16, #tpu.memory_space<vmem>>, vector<80x24xbf16>
    tpu.vector_store %arg6[%c0_21, %c144], %19 {strides = array<i32>} : memref<80x216xbf16, #tpu.memory_space<vmem>>, vector<80x24xbf16>,
    %c0_22 = arith.constant 0 : index
    %c21 = arith.constant 21 : index
    %c0_23 = arith.constant 0 : index
    %21 = vector.load %arg2[%c0_22, %c21, %c0_23] : memref<1x110x24xbf16, #tpu.memory_space<vmem>>, vector<1x80x24xbf16>
    %22 = vector.shape_cast %21 : vector<1x80x24xbf16> to vector<80x24xbf16>
    %c0_24 = arith.constant 0 : index
    %c168 = arith.constant 168 : index
    %23 = vector.load %arg6[%c0_24, %c168] : memref<80x216xbf16, #tpu.memory_space<vmem>>, vector<80x24xbf16>
    tpu.vector_store %arg6[%c0_24, %c168], %22 {strides = array<i32>} : memref<80x216xbf16, #tpu.memory_space<vmem>>, vector<80x24xbf16>,
    %c0_25 = arith.constant 0 : index
    %c22 = arith.constant 22 : index
    %c0_26 = arith.constant 0 : index
    %24 = vector.load %arg2[%c0_25, %c22, %c0_26] : memref<1x110x24xbf16, #tpu.memory_space<vmem>>, vector<1x80x24xbf16>
    %25 = vector.shape_cast %24 : vector<1x80x24xbf16> to vector<80x24xbf16>
    %c0_27 = arith.constant 0 : index
    %c192 = arith.constant 192 : index
    %26 = vector.load %arg6[%c0_27, %c192] : memref<80x216xbf16, #tpu.memory_space<vmem>>, vector<80x24xbf16>
    tpu.vector_store %arg6[%c0_27, %c192], %25 {strides = array<i32>} : memref<80x216xbf16, #tpu.memory_space<vmem>>, vector<80x24xbf16>,
    %c0_28 = arith.constant 0 : index
    %c0_29 = arith.constant 0 : index
    %27 = vector.load %arg6[%c0_28, %c0_29] : memref<80x216xbf16, #tpu.memory_space<vmem>>, vector<80x216xbf16>
    %c0_30 = arith.constant 0 : index
    %c0_31 = arith.constant 0 : index
    %28 = vector.load %arg3[%c0_30, %c0_31] : memref<216x16xbf16, #tpu.memory_space<vmem>>, vector<216x16xbf16>
    %cst = arith.constant dense<0.000000e+00> : vector<80x16xf32>
    %29 = tpu.matmul %27, %28, %cst {dimension_numbers = #tpu.dot_dimension_numbers<[1], [0], [0], [1], [0, 0, 1, 1], [], []>} : vector<80x216xbf16>, vector<216x16xbf16>, vector<80x16xf32> -> vector<80x16xf32>
    %c0_32 = arith.constant 0 : index
    %c0_33 = arith.constant 0 : index
    %30 = vector.load %arg4[%c0_32, %c0_33] : memref<1x16xf32, #tpu.memory_space<vmem>>, vector<1x16xf32>
    %31 = vector.broadcast %30 : vector<1x16xf32> to vector<80x16xf32>
    %32 = arith.addf %29, %31 : vector<80x16xf32>
    %cst_34 = arith.constant 0.000000e+00 : f32
    %33 = vector.broadcast %cst_34 : f32 to vector<80x16xf32>
    %34 = arith.maximumf %32, %33 : vector<80x16xf32>
    %35 = vector.shape_cast %34 : vector<80x16xf32> to vector<1x80x16xf32>
    %c0_35 = arith.constant 0 : index
    %c0_36 = arith.constant 0 : index
    %c0_37 = arith.constant 0 : index
    %36 = vector.load %arg5[%c0_35, %c0_36, %c0_37] : memref<1x80x16xf32, #tpu.memory_space<vmem>>, vector<1x80x16xf32>
    tpu.vector_store %arg5[%c0_35, %c0_36, %c0_37], %35 {strides = array<i32>} : memref<1x80x16xf32, #tpu.memory_space<vmem>>, vector<1x80x16xf32>,
    return
  }
  func.func @transform_0(%arg0: i32, %arg1: i32) -> (i32, i32, i32) {
    %c0_i32 = arith.constant 0 : i32
    %c0_i32_0 = arith.constant 0 : i32
    %c0_i32_1 = arith.constant 0 : i32
    return %arg0, %c0_i32, %c0_i32_0 : i32, i32, i32
  }
  func.func @transform_1(%arg0: i32, %arg1: i32) -> (i32, i32) {
    %c0_i32 = arith.constant 0 : i32
    %c0_i32_0 = arith.constant 0 : i32
    %c0_i32_1 = arith.constant 0 : i32
    return %c0_i32, %c0_i32_0 : i32, i32
  }
  func.func @transform_2(%arg0: i32, %arg1: i32) -> (i32, i32) {
    %c0_i32 = arith.constant 0 : i32
    %c0_i32_0 = arith.constant 0 : i32
    %c0_i32_1 = arith.constant 0 : i32
    return %c0_i32, %c0_i32_0 : i32, i32
  }
  func.func @transform_3(%arg0: i32, %arg1: i32) -> (i32, i32, i32) {
    %c0_i32 = arith.constant 0 : i32
    %c0_i32_0 = arith.constant 0 : i32
    return %arg0, %arg1, %c0_i32 : i32, i32, i32
  }
}

</mosaic_0001>

<bundles_post_ra>
// kernel: deeplabv3plus_baseline_forward.6
= control target key start
LH: loop header
LB: loop body
LE: loop exit
PB: predicated region body
PF: predicated region fallthrough
CT: control target
= control target key end

     0   :  { %vm123_vm0 = vcmask 1041408   ;;  %vm98_vm1 = vcmask 293888   ;;  %vm304_vm2 = vcmask 60416   ;;  %s575_s1 = inlined_call_operand.vmem [shape: bf16[36,8], index: 1, kind: input, shape index: {}]   ;;  %s576_s0 = inlined_call_operand.vmem [shape: bf16[128,36], index: 0, kind: input, shape index: {}]   ;;  %s577_s2 = inlined_call_operand.vmem [shape: f32[1,8], index: 2, kind: input, shape index: {}]   ;;  %s578_s3 = inlined_call_operand.vmem [shape: bf16[128,8], index: 3, kind: output, shape index: {}]  }
   0x1   :  { %v418_v0 = vld [vmem:[%s575_s1 + $0x10] ss:$0 sps:$4 sm:$0x33]   ;;  %v419_v1 = vld [vmem:[%s575_s1 + $0x8] sm:$0xff]   ;;  %v420_v3 = vld [vmem:[%s575_s1] sm:$0xff]  }
   0x2   :  { %416 = vmatprep.subr.msk.bf16.mxu0 %vm123_vm0, %v418_v0  ;;  %417 = vmatprep.subr.msk.bf16.mxu1 %vm123_vm0, %v418_v0  ;;  %v125_v2 = vsel %vm123_vm0, %v418_v0, 0  ;;  %v421_v4 = vld [vmem:[%s576_s0] sm:$0xff]   ;;  %v423_v6 = vld [vmem:[%s576_s0 + $0x8] sm:$0xff]   ;;  %v425_v8 = vld [vmem:[%s576_s0 + $0x10] sm:$0xff]  }
   0x3   :  { %389 = vmatpush3.bf16.msra.mxu0 %v125_v2  ;;  %413 = vmatpush3.bf16.msra.mxu1 %v125_v2  ;;  %v422_v5 = vld [vmem:[%s576_s0 + $0x20] sm:$0xff]   ;;  %v424_v7 = vld [vmem:[%s576_s0 + $0x28] sm:$0xff]   ;;  %v426_v9 = vld [vmem:[%s576_s0 + $0x30] sm:$0xff]  }
   0x4   :  { %390 = vmatprep.subr.bf16.mxu0 %v419_v1  ;;  %411 = vmatprep.subr.bf16.mxu1 %v419_v1  ;;  %v427_v10 = vld [vmem:[%s576_s0 + $0x18] sm:$0xff]   ;;  %v493_v12 = vld [vmem:[%s577_s2] ss:$0 sm:$0xff] }
   0x5   :  { %394 = vmatprep.mubr.msk.bf16.mxu0 %vm98_vm1, %v421_v4  ;;  %402 = vmatprep.mubr.msk.bf16.mxu1 %vm98_vm1, %v422_v5  ;;  %v428_v11 = vld [vmem:[%s576_s0 + $0x38] sm:$0xff]  }
   0x7   :  { %391 = vmatpush3.bf16.msra.mxu0 %v419_v1  ;;  %414 = vmatpush3.bf16.msra.mxu1 %v419_v1 }
   0x8   :  { %392 = vmatprep.subr.bf16.mxu0 %v420_v3  ;;  %412 = vmatprep.subr.bf16.mxu1 %v420_v3 }
   0xb   :  { %393 = vmatpush3.bf16.msra.mxu0 %v420_v3  ;;  %415 = vmatpush3.bf16.msra.mxu1 %v420_v3 }
   0xe   :  { %395 = vmatmul.mubr.msk.bf16.vlgmr.msra.gmra.mxu0 %vm98_vm1, %v423_v6  ;;  %403 = vmatmul.mubr.msk.bf16.vlgmr.msra.gmra.mxu1 %vm98_vm1, %v424_v7 }
   0xf   :  { %398 = vmatprep.mubr.msk.bf16.mxu0 %vm98_vm1, %v425_v8  ;;  %406 = vmatprep.mubr.msk.bf16.mxu1 %vm98_vm1, %v426_v9 }
  0x16   :  { %399 = vmatmul.mubr.msk.bf16.gmra.mxu0 %vm98_vm1, %v427_v10  ;;  %407 = vmatmul.mubr.msk.bf16.gmra.mxu1 %vm98_vm1, %v428_v11 }
  0xce   :  { %v396_v13 = vpop.f32.mrf.mxu0  ;;  %v404_v14 = vpop.f32.mrf.mxu1 }
  0xcf   :  { %v170_v15 = vadd.f32 %v396_v13, %v493_v12  ;;  %v202_v16 = vadd.f32 %v404_v14, %v493_v12 }
  0xd0   :  { %v161_v17 = vpop.f32.mrf.mxu0  ;;  %v193_v18 = vpop.f32.mrf.mxu1 }
  0xd1   :  { %v226_v19 = vmax.f32 %v170_v15, 0.0  ;;  %v234_v20 = vmax.f32 %v202_v16, 0.0  ;;  %v162_v21 = vadd.f32 %v493_v12, %v161_v17  ;;  %v194_v22 = vadd.f32 %v493_v12, %v193_v18 }
  0xd2   :  { %v397_v23 = vpop.f32.mrf.mxu0  ;;  %v405_v24 = vpop.f32.mrf.mxu1 }
  0xd3   :  { %v363_v25 = vpack.c.bf16 %v226_v19, %v226_v19  ;;  %v371_v26 = vpack.c.bf16 %v234_v20, %v234_v20  ;;  %v224_v27 = vmax.f32 %v162_v21, 0.0  ;;  %v232_v28 = vmax.f32 %v194_v22, 0.0 }
  0xd4   :  { %v173_v29 = vadd.f32 %v397_v23, %v493_v12  ;;  %v205_v30 = vadd.f32 %v405_v24, %v493_v12  ;;  %v164_v31 = vpop.f32.mrf.mxu0  ;;  %v196_v32 = vpop.f32.mrf.mxu1 }
  0xd5   :  { %307 = vst.msk [vmem:[%s578_s3 + $0x8] sm:$0xf] %vm304_vm2, %v363_v25  ;;  %315 = vst.msk [vmem:[%s578_s3 + $0x28] sm:$0xf] %vm304_vm2, %v371_v26  ;;  %v361_v33 = vpack.c.bf16 %v224_v27, %v224_v27  ;;  %v369_v34 = vpack.c.bf16 %v232_v28, %v232_v28  ;;  %v165_v35 = vadd.f32 %v493_v12, %v164_v31 }
  0xd6   :  { %v197_v36 = vadd.f32 %v493_v12, %v196_v32  ;;  %v227_v37 = vmax.f32 %v173_v29, 0.0  ;;  %v235_v38 = vmax.f32 %v205_v30, 0.0  ;;  %v400_v39 = vpop.f32.mrf.mxu0  ;;  %v408_v40 = vpop.f32.mrf.mxu1 }
  0xd7   :  { %305 = vst.msk [vmem:[%s578_s3] sm:$0xf] %vm304_vm2, %v361_v33  ;;  %313 = vst.msk [vmem:[%s578_s3 + $0x20] sm:$0xf] %vm304_vm2, %v369_v34  ;;  %v225_v41 = vmax.f32 %v165_v35, 0.0  ;;  %v186_v43 = vadd.f32 %v400_v39, %v493_v12  ;;  %v218_v44 = vadd.f32 %v408_v40, %v493_v12 }
  0xd8   :  { %v233_v42 = vmax.f32 %v197_v36, 0.0  ;;  %v364_v45 = vpack.c.bf16 %v227_v37, %v227_v37  ;;  %v372_v46 = vpack.c.bf16 %v235_v38, %v235_v38  ;;  %v177_v47 = vpop.f32.mrf.mxu0  ;;  %v209_v48 = vpop.f32.mrf.mxu1 }
  0xd9   :  { %v362_v49 = vpack.c.bf16 %v225_v41, %v225_v41  ;;  %v230_v51 = vmax.f32 %v186_v43, 0.0  ;;  %v238_v52 = vmax.f32 %v218_v44, 0.0  ;;  %v178_v53 = vadd.f32 %v493_v12, %v177_v47 }
  0xda   :  { %v370_v50 = vpack.c.bf16 %v233_v42, %v233_v42  ;;  %308 = vst.msk [vmem:[%s578_s3 + $0xc] sm:$0xf] %vm304_vm2, %v364_v45  ;;  %316 = vst.msk [vmem:[%s578_s3 + $0x2c] sm:$0xf] %vm304_vm2, %v372_v46  ;;  %v210_v54 = vadd.f32 %v493_v12, %v209_v48  ;;  %v401_v55 = vpop.f32.mrf.mxu0  ;;  %v409_v56 = vpop.f32.mrf.mxu1 }
  0xdb   :  { %306 = vst.msk [vmem:[%s578_s3 + $0x4] sm:$0xf] %vm304_vm2, %v362_v49  ;;  %v367_v57 = vpack.c.bf16 %v230_v51, %v230_v51  ;;  %v375_v58 = vpack.c.bf16 %v238_v52, %v238_v52  ;;  %v189_v59 = vadd.f32 %v401_v55, %v493_v12  ;;  %v221_v60 = vadd.f32 %v409_v56, %v493_v12 }
  0xdc   :  { %314 = vst.msk [vmem:[%s578_s3 + $0x24] sm:$0xf] %vm304_vm2, %v370_v50  ;;  %v228_v61 = vmax.f32 %v178_v53, 0.0  ;;  %v236_v62 = vmax.f32 %v210_v54, 0.0  ;;  %v180_v63 = vpop.f32.mrf.mxu0  ;;  %v212_v0 = vpop.f32.mrf.mxu1 }
  0xdd   :  { %311 = vst.msk [vmem:[%s578_s3 + $0x18] sm:$0xf] %vm304_vm2, %v367_v57  ;;  %319 = vst.msk [vmem:[%s578_s3 + $0x38] sm:$0xf] %vm304_vm2, %v375_v58  ;;  %v231_v1 = vmax.f32 %v189_v59, 0.0  ;;  %v239_v2 = vmax.f32 %v221_v60, 0.0  ;;  %v181_v3 = vadd.f32 %v493_v12, %v180_v63  ;;  %v213_v4 = vadd.f32 %v493_v12, %v212_v0 }
  0xde   :  { %v365_v5 = vpack.c.bf16 %v228_v61, %v228_v61  ;;  %v373_v6 = vpack.c.bf16 %v236_v62, %v236_v62 }
  0xdf   :  { %v368_v7 = vpack.c.bf16 %v231_v1, %v231_v1  ;;  %v376_v8 = vpack.c.bf16 %v239_v2, %v239_v2  ;;  %v229_v9 = vmax.f32 %v181_v3, 0.0  ;;  %v237_v10 = vmax.f32 %v213_v4, 0.0 }
  0xe0   :  { %309 = vst.msk [vmem:[%s578_s3 + $0x10] sm:$0xf] %vm304_vm2, %v365_v5  ;;  %317 = vst.msk [vmem:[%s578_s3 + $0x30] sm:$0xf] %vm304_vm2, %v373_v6 }
  0xe1   :  { %312 = vst.msk [vmem:[%s578_s3 + $0x1c] sm:$0xf] %vm304_vm2, %v368_v7  ;;  %320 = vst.msk [vmem:[%s578_s3 + $0x3c] sm:$0xf] %vm304_vm2, %v376_v8  ;;  %v366_v11 = vpack.c.bf16 %v229_v9, %v229_v9  ;;  %v374_v12 = vpack.c.bf16 %v237_v10, %v237_v10 }
  0xe3   :  { %310 = vst.msk [vmem:[%s578_s3 + $0x14] sm:$0xf] %vm304_vm2, %v366_v11  ;;  %318 = vst.msk [vmem:[%s578_s3 + $0x34] sm:$0xf] %vm304_vm2, %v374_v12 }

// kernel: deeplabv3plus_baseline_forward.7
= control target key start
LH: loop header
LB: loop body
LE: loop exit
PB: predicated region body
PF: predicated region fallthrough
CT: control target
= control target key end

     0   :  { %vm79_vm0 = vcmask 1043456   ;;  %vm72_vm1 = vcmask 588800   ;;  %vm152_vm2 = vcmask 125952   ;;  %s264_s1 = inlined_call_operand.vmem [shape: bf16[72,16], index: 1, kind: input, shape index: {}]   ;;  %s265_s0 = inlined_call_operand.vmem [shape: bf16[32,72], index: 0, kind: input, shape index: {}]   ;;  %s266_s2 = inlined_call_operand.vmem [shape: f32[1,16], index: 2, kind: input, shape index: {}]   ;;  %s267_s3 = inlined_call_operand.vmem [shape: bf16[32,16], index: 3, kind: output, shape index: {}]  }
   0x1   :  { %v201_v0 = vld [vmem:[%s264_s1 + $0x20] ss:$0 sps:$4 sm:$0xff]   ;;  %v202_v1 = vld [vmem:[%s264_s1 + $0x18] sm:$0xff]   ;;  %v203_v3 = vld [vmem:[%s264_s1 + $0x10] sm:$0xff]  }
   0x2   :  { %200 = vmatprep.subr.msk.bf16.mxu0 %vm79_vm0, %v201_v0  ;;  %v81_v2 = vsel %vm79_vm0, %v201_v0, 0  ;;  %v206_v4 = vld [vmem:[%s265_s0] sm:$0xff]   ;;  %v204_v5 = vld [vmem:[%s264_s1 + $0x8] sm:$0xff]  }
   0x3   :  { %187 = vmatpush3.bf16.msra.mxu0 %v81_v2  ;;  %196 = vmatprep.mubr.msk.bf16.mxu0 %vm72_vm1, %v206_v4  ;;  %v205_v6 = vld [vmem:[%s264_s1] sm:$0xff]   ;;  %v207_v7 = vld [vmem:[%s265_s0 + $0x8] sm:$0xff]  }
   0x4   :  { %188 = vmatprep.subr.bf16.mxu0 %v202_v1  ;;  %v161_v8 = vld [vmem:[%s266_s2] ss:$0 sm:$0xff] }
   0x7   :  { %189 = vmatpush3.bf16.msra.mxu0 %v202_v1 }
   0x8   :  { %190 = vmatprep.subr.bf16.mxu0 %v203_v3 }
   0xb   :  { %191 = vmatpush3.bf16.msra.mxu0 %v203_v3 }
   0xc   :  { %192 = vmatprep.subr.bf16.mxu0 %v204_v5 }
   0xf   :  { %193 = vmatpush3.bf16.msra.mxu0 %v204_v5 }
  0x10   :  { %194 = vmatprep.subr.bf16.mxu0 %v205_v6 }
  0x13   :  { %195 = vmatpush3.bf16.msra.mxu0 %v205_v6 }
  0x16   :  { %197 = vmatmul.mubr.msk.bf16.vlgmr.msra.gmra.mxu0 %vm72_vm1, %v207_v7 }
  0xd6   :  { %v198_v9 = vpop.f32.mrf.mxu0 }
  0xd7   :  { %v126_v10 = vadd.f32 %v198_v9, %v161_v8 }
  0xd8   :  { %v117_v11 = vpop.f32.mrf.mxu0 }
  0xd9   :  { %v134_v12 = vmax.f32 %v126_v10, 0.0  ;;  %v118_v13 = vadd.f32 %v161_v8, %v117_v11 }
  0xda   :  { %v199_v14 = vpop.f32.mrf.mxu0 }
  0xdb   :  { %v177_v15 = vpack.c.bf16 %v134_v12, %v134_v12  ;;  %v132_v16 = vmax.f32 %v118_v13, 0.0  ;;  %v129_v17 = vadd.f32 %v199_v14, %v161_v8 }
  0xdc   :  { %v120_v18 = vpop.f32.mrf.mxu0 }
  0xdd   :  { %155 = vst.msk [vmem:[%s267_s3 + $0x8] sm:$0xf] %vm152_vm2, %v177_v15  ;;  %v175_v19 = vpack.c.bf16 %v132_v16, %v132_v16  ;;  %v135_v20 = vmax.f32 %v129_v17, 0.0  ;;  %v121_v21 = vadd.f32 %v161_v8, %v120_v18 }
  0xdf   :  { %153 = vst.msk [vmem:[%s267_s3] sm:$0xf] %vm152_vm2, %v175_v19  ;;  %v178_v22 = vpack.c.bf16 %v135_v20, %v135_v20  ;;  %v133_v23 = vmax.f32 %v121_v21, 0.0 }
  0xe1   :  { %156 = vst.msk [vmem:[%s267_s3 + $0xc] sm:$0xf] %vm152_vm2, %v178_v22  ;;  %v176_v24 = vpack.c.bf16 %v133_v23, %v133_v23 }
  0xe3   :  { %154 = vst.msk [vmem:[%s267_s3 + $0x4] sm:$0xf] %vm152_vm2, %v176_v24 }

// kernel: deeplabv3plus_baseline_forward.8
= control target key start
LH: loop header
LB: loop body
LE: loop exit
PB: predicated region body
PF: predicated region fallthrough
CT: control target
= control target key end

     0   :  { %s916_s12 = smov 0   ;;  %s918_s13 = smov 0   ;;  %s1192_s0 = inlined_call_operand.vmem [shape: bf16[2,42,16], index: 0, kind: input, shape index: {}]   ;;  %s1193_s1 = inlined_call_operand.vmem [shape: bf16[144,16], index: 1, kind: input, shape index: {}]   ;;  %s1194_s2 = inlined_call_operand.vmem [shape: f32[1,16], index: 2, kind: input, shape index: {}]   ;;  %s1195_s3 = inlined_call_operand.vmem [shape: bf16[2,24,16], index: 3, kind: output, shape index: {}]  }
   0x1   :  { %s920_s14 = smov 0  }
   0x2 LB: > { %s25_s15 = sadd.s32 1, %s882_s13  ;;  %p766_p0 = scmp.ge.s32.totalorder %s886_s14, 1  ;;  %s886_s14 = sphi %s920_s14, %s13_s14   ;;  %s882_s13 = sphi %s918_s13, %s1209_s13   ;;  %s878_s12 = sphi %s916_s12, %s1208_s12  }
   0x3   : > { %p27_p1 = scmp.ge.s32.totalorder %s25_s15, 2  ;;  %p151_p2 = scmp.lt.s32.totalorder %s886_s14, 3 }
   0x5   : > { %s1211_s15 = smov (%p27_p1, %s25_s15), 0  ;;  %p152_p3 = pnand %p766_p0, %p151_p2 }
   0x6   : > { %p179_p4 = scmp.lt.s32.totalorder (!%p152_p3), %s878_s12, 1  ;;  %s889_s22 = smov (!%p152_p3), 48  }
   0x7   : > { %155 = sbr.rel (%p152_p3) target bundleno = 392 (0x188), region = 32  ;;  %s890_s25 = smov (!%p152_p3), 32  }
   0x8   : > { %s891_s28 = smov (!%p152_p3), 64   ;;  %s892_s4 = smov (!%p152_p3), 16  }
   0x9   : > { %s893_s9 = smov (!%p152_p3), 80   ;;  %s894_s18 = smov (!%p152_p3), 96  }
   0xa   : > { %s895_s23 = smov (!%p152_p3), 112  }
   0xc   : > { %s1213_s12 = smov (!%p179_p4, %s878_s12), 1  ;;  %vm298_vm0 = vcmask 1040384   ;;  %vm299_vm1 = vcmask 1044484   ;;  %vm198_vm2 = vcmask 125952   ;;  %vm264_vm3 = vcmask 1042432   ;;  %v850_v13 = vld [vmem:[%s1193_s1 + $0x38] sm:$0xff]  }
   0xd   : > { %s816_s16 = smul.u32 24, %s1213_s12  ;;  %vm328_vm4 = vsmask.f32 256  ;;  %vm942_vm5 = vmor %vm298_vm0, %vm299_vm1  ;;  %vm265_vm6 = vcmask 1046532   ;;  %vm329_vm7 = vsmask.f32 4368 }
   0xe   : > { %v888_v4 = vmov 0   ;;  %vm206_vm8 = vsmask.f32 3328  ;;  %vm207_vm9 = vsmask.f32 7440  ;;  %vm968_vm10 = vmor %vm264_vm3, %vm265_vm6  ;;  %v851_v40 = vld [vmem:[%s1193_s1 + $0x30] sm:$0xff]  }
   0xf   : > { %s940_s19 = scalar_lea.vmem %s1192_s0, %s816_s16  ;;  %614 = vmatprep.subr.bf16.mxu0 %v888_v4  ;;  %798 = vmatprep.subr.bf16.mxu1 %v888_v4  ;;  %vm1001_vm11 = vmor %vm328_vm4, %vm329_vm7  ;;  %v852_v52 = vld [vmem:[%s1193_s1 + $0x28] sm:$0xff]   ;;  %vm402_vm13 = vcmask 1041408   ;;  %vm432_vm14 = vsmask.f32 1280  ;;  %vm433_vm15 = vsmask.f32 5392 }
  0x10   : > { %v290_v1 = vld [vmem:[%s940_s19] sm:$0x8]  ;;  %v291_v2 = vld [vmem:[%s940_s19 + $0x4] sm:$0xf]  ;;  %v487_v7 = vld [vmem:[%s940_s19 + $0x8] sm:$0xf]  ;;  %615 = vmatpush1.bf16.msra.mxu0 %v850_v13  ;;  %807 = vmatpush1.bf16.msra.mxu1 %v850_v13 }
  0x11   : > { %v486_v3 = vld [vmem:[%s940_s19 + $0x4] sm:$0x8]  ;;  %v770_v5 = vrot.slane %v290_v1, 11  ;;  %v303_v6 = vrot.slane %v291_v2, 7  ;;  %v488_v8 = vld [vmem:[%s940_s19 + $0xc] sm:$0xf]  ;;  %616 = vmatprep.subr.bf16.mxu0 %v888_v4  ;;  %799 = vmatprep.subr.bf16.mxu1 %v888_v4  ;;  %vm1023_vm12 = vmor %vm206_vm8, %vm207_vm9 }
  0x12   : > { %v489_v9 = vld [vmem:[%s940_s19 + $0x10] sm:$0x7]  ;;  %v773_v10 = vrot.slane %v486_v3, 11  ;;  %v496_v11 = vrot.slane %v487_v7, 7  ;;  %v499_v12 = vrot.slane %v488_v8, 7  ;;  %v853_v7 = vld [vmem:[%s1193_s1 + $0x20] sm:$0xff]   ;;  %vm1110_vm3 = vmor %vm432_vm14, %vm433_vm15 }
  0x13   : > { %v304_v14 = vsel %vm942_vm5, %v770_v5, %v303_v6  ;;  %v502_v15 = vrot.slane %v489_v9, 7  ;;  %v256_v16 = vld [vmem:[%s940_s19] sm:$0xe]  ;;  %v257_v17 = vld [vmem:[%s940_s19 + $0x4] sm:$0xf]  ;;  %v961_v18 = vrot.slane %v303_v6, 4 }
  0x14   : > { %v497_v19 = vsel %vm942_vm5, %v773_v10, %v496_v11  ;;  %v498_v20 = vrot.slane %v496_v11, 4  ;;  %v501_v21 = vrot.slane %v499_v12, 4  ;;  %311 = vrot.lane.b32.xlu0 %v304_v14, %s889_s22  ;;  %v769_v23 = vrot.slane %v256_v16, 9  ;;  %v324_v24 = vld [vmem:[%s940_s19] sm:$0x8]  ;;  %617 = vmatpush1.bf16.msra.mxu0 %v851_v40  ;;  %s817_s24 = smul.u32 12, %s1213_s12 }
  0x15   : > { %507 = vst.msk [vmem:[#allocation2 + $0x4] sm:$0xf] %vm198_vm2, %v497_v19  ;;  %v269_v25 = vrot.slane %v257_v17, 5  ;;  %v325_v26 = vld [vmem:[%s940_s19 + $0x4] sm:$0xf]  ;;  %v332_v27 = vshrl.u32 %v324_v24, 16  ;;  %808 = vmatpush1.bf16.msra.mxu1 %v851_v40  ;;  %618 = vmatprep.subr.bf16.mxu0 %v888_v4 }
  0x16   : > { %v976_v28 = vld [vmem:[%s940_s19 + $0x8] sm:$0xf]  ;;  %v500_v29 = vsel %vm942_vm5, %v498_v20, %v499_v12  ;;  %v503_v30 = vsel %vm942_vm5, %v501_v21, %v502_v15  ;;  %v337_v31 = vshrl.u32 %v325_v26, 16  ;;  %v340_v32 = vshll.u32 %v325_v26, 16  ;;  %v202_v33 = vld [vmem:[%s940_s19] sm:$0xf]  ;;  %800 = vmatprep.subr.bf16.mxu1 %v888_v4  ;;  %s192_s27 = scalar_lea.vmem %s1195_s3, %s817_s24 }
  0x17   : > { %v203_v34 = vld [vmem:[%s940_s19 + $0x4] sm:$0xf]  ;;  %508 = vst.msk [vmem:[#allocation2 + $0xc] sm:$0xf] %vm198_vm2, %v500_v29  ;;  %509 = vst.msk [vmem:[#allocation2 + $0x14] sm:$0xf] %vm198_vm2, %v503_v30  ;;  %v270_v35 = vsel %vm968_vm10, %v769_v23, %v269_v25 }
  0x18   : > { %v771_v36 = vrot.slane %v332_v27, 11  ;;  %v271_v37 = vrot.slane %v269_v25, 4  ;;  %v272_v38 = vrot.slane %v976_v28, 5  ;;  %v992_v39 = vld [vmem:[%s940_s19 + $0x8] sm:$0xf]  ;;  %277 = vrot.lane.b32.xlu1 %v270_v35, %s890_s25  ;;  %v339_v41 = vrot.slane %v337_v31, 7  ;;  %619 = vmatpush1.bf16.msra.mxu0 %v852_v52 }
  0x19   : > { %v210_v42 = vshrl.u32 %v202_v33, 16  ;;  %v213_v43 = vshll.u32 %v202_v33, 16  ;;  %v219_v44 = vshll.u32 %v203_v34, 16  ;;  %v204_v45 = vld [vmem:[%s940_s19 + $0x8] sm:$0xf]  ;;  %v223_v48 = vshrl.u32 %v203_v34, 16  ;;  %620 = vmatprep.subr.bf16.mxu0 %v888_v4  ;;  %809 = vmatpush1.bf16.msra.mxu1 %v852_v52 }
  0x1a   : > { %v273_v47 = vsel %vm968_vm10, %v271_v37, %v272_v38  ;;  %v306_v49 = vrot.slane %v992_v39, 7  ;;  %v229_v50 = vshll.u32 %v204_v45, 16  ;;  %v326_v51 = vld [vmem:[%s940_s19 + $0x8] sm:$0xf]  ;;  %v342_v53 = vor.u32 %v340_v32, %v339_v41  ;;  %v205_v60 = vld [vmem:[%s940_s19 + $0xc] sm:$0x1]  ;;  %801 = vmatprep.subr.bf16.mxu1 %v888_v4 }
  0x1b   : > { %v212_v54 = vrot.slane %v210_v42, 4  ;;  %v215_v55 = vrot.slane %v213_v43, 5  ;;  %v221_v56 = vrot.slane %v219_v44, 5  ;;  %v225_v57 = vrot.slane %v223_v48, 4  ;;  %v428_v16 = vld [vmem:[%s940_s19 + $0x4] sm:$0xc] }
  0x1c   : > { %v231_v58 = vrot.slane %v229_v50, 5  ;;  %v233_v59 = vshrl.u32 %v204_v45, 16  ;;  %v343_v61 = vsel %vm1001_vm11, %v771_v36, %v342_v53  ;;  %279 = vrot.lane.b32.xlu1 %v273_v47, %s890_s25  ;;  %v346_v63 = vshrl.u32 %v326_v51, 16  ;;  %v259_v17 = vld [vmem:[%s940_s19 + $0xc] sm:$0x1]  ;;  %621 = vmatpush1.bf16.msra.mxu0 %v853_v7  ;;  %v854_v19 = vld [vmem:[%s1193_s1 + $0x18] sm:$0xff]  }
  0x1d   : > { %v216_v62 = vor.u32 %v215_v55, %v212_v54  ;;  %362 = vrot.lane.b32.xlu0 %v343_v61, %s891_s28  ;;  %v307_v2 = vsel %vm942_vm5, %v961_v18, %v306_v49  ;;  %v226_v3 = vor.u32 %v225_v57, %v221_v56  ;;  %v349_v5 = vshll.u32 %v326_v51, 16  ;;  %v1047_v18 = vld [vmem:[%s940_s19 + $0x8] sm:$0xf]  ;;  %622 = vmatprep.subr.bf16.mxu0 %v888_v4  ;;  %v375_v26 = vld [vmem:[%s940_s19 + $0x4] sm:$0xf]  ;;  %v855_v48 = vld [vmem:[%s1193_s1 + $0x10] sm:$0xff]  }
  0x1e   : > { %v235_v6 = vrot.slane %v233_v59, 4  ;;  %v344_v9 = vrot.slane %v339_v41, 4  ;;  %v1035_v10 = vrot.slane %v346_v63, 7  ;;  %v239_v11 = vshll.u32 %v205_v60, 16  ;;  %v429_v25 = vld [vmem:[%s940_s19 + $0x8] sm:$0xf]  ;;  %810 = vmatpush1.bf16.msra.mxu1 %v853_v7 }
  0x1f   : > { %v217_v8 = vrot.slane %v216_v62, 4  ;;  %v227_v12 = vrot.slane %v226_v3, 4  ;;  %v274_v27 = vrot.slane %v272_v38, 4  ;;  %v1062_v29 = vld [vmem:[%s940_s19 + $0xc] sm:$0xf]  ;;  %v436_v30 = vshrl.u32 %v428_v16, 16  ;;  %802 = vmatprep.subr.bf16.mxu1 %v888_v4 }
  0x20   : > { %v236_v13 = vor.u32 %v235_v6, %v231_v58  ;;  %313 = vrot.lane.b32.xlu1 %v307_v2, %s889_s22  ;;  %v351_v15 = vor.u32 %v349_v5, %v1035_v10  ;;  %v241_v24 = vrot.slane %v239_v11, 5  ;;  %v439_v31 = vshll.u32 %v428_v16, 16  ;;  %v430_v34 = vld [vmem:[%s940_s19 + $0xc] sm:$0xf]  ;;  %v195_v40 = vld [vmem:[%s940_s19] sm:$0xf]  ;;  %623 = vmatpush1.bf16.msra.mxu0 %v854_v19 }
  0x21   : > { %v222_v14 = vsel %vm1023_vm12, %v217_v8, %v221_v56  ;;  %v232_v20 = vsel %vm1023_vm12, %v227_v12, %v231_v58  ;;  %v275_v32 = vrot.slane %v259_v17, 5  ;;  %v407_v33 = vrot.slane %v1047_v18, 6  ;;  %v1069_v35 = vld [vmem:[%s940_s19 + $0xc] sm:$0xf]  ;;  %v394_v42 = vld [vmem:[%s940_s19 + $0x4] sm:$0xc]  ;;  %624 = vmatprep.subr.bf16.mxu0 %v888_v4 }
  0x22   : > { %243 = vrot.lane.b32.xlu0 %v222_v14, %s892_s4  ;;  %v352_v21 = vsel %vm1001_vm11, %v344_v9, %v351_v15  ;;  %v237_v23 = vrot.slane %v236_v13, 4  ;;  %v438_v28 = vrot.slane %v436_v30, 6  ;;  %v441_v36 = vrot.slane %v439_v31, 7  ;;  %199 = vst.msk [vmem:[#allocation2] sm:$0xf] %vm198_vm2, %v195_v40  ;;  %811 = vmatpush1.bf16.msra.mxu1 %v854_v19  ;;  %v856_v59 = vld [vmem:[%s1193_s1 + $0x8] sm:$0xff]  }
  0x23   : > { %v445_v37 = vshrl.u32 %v429_v25, 16  ;;  %v448_v38 = vshll.u32 %v429_v25, 16  ;;  %v196_v43 = vld [vmem:[%s940_s19 + $0x4] sm:$0xf]  ;;  %vm403_vm0 = vcmask 1045508   ;;  %v455_v44 = vshrl.u32 %v430_v34, 16  ;;  %803 = vmatprep.subr.bf16.mxu1 %v888_v4 }
  0x24   : > { %364 = vrot.lane.b32.xlu1 %v352_v21, %s891_s28  ;;  %v242_v41 = vsel %vm1023_vm12, %v237_v23, %v241_v24  ;;  %v458_v45 = vshll.u32 %v430_v34, 16  ;;  %200 = vst.msk [vmem:[#allocation2 + $0x8] sm:$0xf] %vm198_vm2, %v196_v43  ;;  %v197_v47 = vld [vmem:[%s940_s19 + $0x8] sm:$0xf]  ;;  %v276_v51 = vsel %vm968_vm10, %v274_v27, %v275_v32  ;;  %v410_v52 = vrot.slane %v1062_v29, 6  ;;  %625 = vmatpush1.bf16.msra.mxu0 %v855_v48  ;;  %vm1100_vm1 = vmor %vm402_vm13, %vm403_vm0 }
  0x25   : > { %v376_v50 = vld [vmem:[%s940_s19 + $0x8] sm:$0xf]  ;;  %v293_v53 = vld [vmem:[%s940_s19 + $0xc] sm:$0x7]  ;;  %v355_v54 = vshrl.u32 %v1069_v35, 16  ;;  %v409_v55 = vrot.slane %v407_v33, 4  ;;  %v442_v56 = vor.u32 %v441_v36, %v438_v28  ;;  %626 = vmatprep.subr.bf16.mxu0 %v888_v4 }
  0x26   : > { %245 = vrot.lane.b32.xlu0 %v232_v20, %s892_s4  ;;  %201 = vst.msk [vmem:[#allocation2 + $0x10] sm:$0xf] %vm198_vm2, %v197_v47  ;;  %v447_v57 = vrot.slane %v445_v37, 6  ;;  %v450_v58 = vrot.slane %v448_v38, 7  ;;  %v772_v22 = vrot.slane %v394_v42, 10  ;;  %812 = vmatpush1.bf16.msra.mxu1 %v855_v48  ;;  %v308_v61 = vrot.slane %v306_v49, 4 }
  0x27   : > { %v309_v62 = vrot.slane %v293_v53, 7  ;;  %v457_v63 = vrot.slane %v455_v44, 6  ;;  %v460_v1 = vrot.slane %v458_v45, 7  ;;  %804 = vmatprep.subr.bf16.mxu1 %v888_v4  ;;  %v357_v3 = vrot.slane %v355_v54, 7  ;;  %v857_v7 = vld [vmem:[%s1193_s1] sm:$0xff]  }
  0x28   : > { %381 = vrot.lane.b32.xlu1 %v375_v26, %s893_s9  ;;  %v358_v5 = vshll.u32 %v1069_v35, 16  ;;  %v411_v39 = vsel %vm1100_vm1, %v409_v55, %v410_v52  ;;  %v443_v49 = vrot.slane %v442_v56, 4  ;;  %v451_v6 = vor.u32 %v450_v58, %v447_v57  ;;  %627 = vmatpush1.bf16.msra.mxu0 %v856_v59  ;;  %v431_v9 = vld [vmem:[%s940_s19 + $0x10] sm:$0x7]  ;;  %v858_v15 = vld [vmem:[%s1193_s1 + $0x40] sm:$0xff]  }
  0x29   : > { %v408_v8 = vsel %vm1100_vm1, %v772_v22, %v407_v33  ;;  %628 = vmatprep.subr.bf16.mxu0 %v888_v4  ;;  %v310_v11 = vsel %vm942_vm5, %v308_v61, %v309_v62  ;;  %v353_v13 = vrot.slane %v1035_v10, 4  ;;  %v461_v17 = vor.u32 %v460_v1, %v457_v63  ;;  %v397_v18 = vld [vmem:[%s940_s19 + $0x10] sm:$0x3]  ;;  %v377_v26 = vld [vmem:[%s940_s19 + $0xc] sm:$0xf] }
  0x2a   : > { %247 = vrot.lane.b32.xlu0 %v242_v41, %s892_s4  ;;  %813 = vmatpush1.bf16.msra.mxu1 %v856_v59  ;;  %v452_v12 = vsel %vm1110_vm3, %v443_v49, %v451_v6  ;;  %v360_v14 = vor.u32 %v358_v5, %v357_v3  ;;  %v453_v16 = vrot.slane %v451_v6, 4  ;;  %v465_v19 = vshrl.u32 %v431_v9, 16  ;;  %v861_v54 = vld [vmem:[#allocation2 + $0x4] ss:$8 sps:$4 sm:$0xff]   ;;  %v774_v58 = vld [vmem:[%s1194_s2] ss:$0 sm:$0xff] }
  0x2b   : > { %805 = vmatprep.subr.bf16.mxu1 %v888_v4  ;;  %v468_v20 = vshll.u32 %v431_v9, 16  ;;  %v412_v10 = vrot.slane %v410_v52, 4  ;;  %v413_v21 = vrot.slane %v397_v18, 6  ;;  %v463_v27 = vrot.slane %v461_v17, 4 }
  0x2c   : > { %281 = vrot.lane.b32.xlu1 %v276_v51, %s890_s25  ;;  %629 = vmatpush1.bf16.msra.mxu0 %v857_v7  ;;  %v361_v0 = vsel %vm1001_vm11, %v353_v13, %v360_v14  ;;  %v462_v23 = vsel %vm1110_vm3, %v453_v16, %v461_v17  ;;  %v467_v24 = vrot.slane %v465_v19, 6  ;;  %vm252_vm4 = vcmask 257152  }
  0x2d   : > { %644 = vmatprep.subr.bf16.mxu0 %v888_v4  ;;  %v470_v25 = vrot.slane %v468_v20, 7  ;;  %vm286_vm5 = vcmask 388352   ;;  %vm320_vm6 = vcmask 519552   ;;  %vm371_vm7 = vcmask 650752  }
  0x2e   : > { %383 = vrot.lane.b32.xlu0 %v376_v50, %s893_s9  ;;  %814 = vmatpush1.bf16.msra.mxu1 %v857_v7  ;;  %vm390_vm8 = vcmask 781952   ;;  %vm424_vm9 = vcmask 913152   ;;  %vm482_vm10 = vcmask 1044352   ;;  %vm607_vm11 = vcmask 130048  }
  0x2f   : > { %806 = vmatprep.subr.bf16.mxu1 %v888_v4  ;;  %v414_v4 = vsel %vm1100_vm1, %v412_v10, %v413_v21  ;;  %v471_v29 = vor.u32 %v470_v25, %v467_v24  ;;  %788 = vmatprep.mubr.msk.bf16.mxu0 %vm607_vm11, %v861_v54 }
  0x30   : > { %417 = vrot.lane.b32.xlu1 %v411_v39, %s894_s18  ;;  %645 = vmatpush2.bf16.msra.mxu0 %v858_v15 }
  0x31   : > { %v472_v46 = vsel %vm1110_vm3, %v463_v27, %v471_v29 }
  0x32   : > { %415 = vrot.lane.b32.xlu0 %v408_v8, %s894_s18  ;;  %815 = vmatpush2.bf16.msra.mxu1 %v858_v15 }
  0x34   : > { %473 = vrot.lane.b32.xlu1 %v452_v12, %s895_s23 }
  0x36   : > { %315 = vrot.lane.b32.xlu0 %v310_v11, %s889_s22 }
  0x38   : > { %366 = vrot.lane.b32.xlu1 %v361_v0, %s891_s28 }
  0x3a   : > { %475 = vrot.lane.b32.xlu0 %v462_v23, %s895_s23 }
  0x3c   : > { %419 = vrot.lane.b32.xlu1 %v414_v4, %s894_s18 }
  0x3e   : > { %385 = vrot.lane.b32.xlu0 %v377_v26, %s893_s9 }
  0x42   : > { %477 = vrot.lane.b32.xlu0 %v472_v46, %s895_s23 }
  0x86   : > { %v312_v30 = vpop.permute.xlu0 %311 }
  0x8a   : > { %v278_v31 = vpop.permute.xlu1 %277 }
  0x8e   : > { %v280_v32 = vpop.permute.xlu1 %279 }
  0x8f   : > { %v363_v33 = vpop.permute.xlu0 %362 }
  0x92   : > { %v314_v34 = vpop.permute.xlu1 %313 }
  0x94   : > { %v244_v35 = vpop.permute.xlu0 %243 }
  0x95   : > { %253 = vst.msk [vmem:[#allocation2] sm:$0xf] %vm252_vm4, %v244_v35 }
  0x96   : > { %287 = vst.msk [vmem:[#allocation2] sm:$0xf] %vm286_vm5, %v278_v31  ;;  %v365_v28 = vpop.permute.xlu1 %364 }
  0x97   : > { %321 = vst.msk [vmem:[#allocation2] sm:$0xf] %vm320_vm6, %v312_v30 }
  0x98   : > { %v246_v36 = vpop.permute.xlu0 %245  ;;  %372 = vst.msk [vmem:[#allocation2] sm:$0xf] %vm371_vm7, %v363_v33 }
  0x99   : > { %254 = vst.msk [vmem:[#allocation2 + $0x8] sm:$0xf] %vm252_vm4, %v246_v36 }
  0x9a   : > { %288 = vst.msk [vmem:[#allocation2 + $0x8] sm:$0xf] %vm286_vm5, %v280_v32  ;;  %v382_v37 = vpop.permute.xlu1 %381 }
  0x9b   : > { %322 = vst.msk [vmem:[#allocation2 + $0x8] sm:$0xf] %vm320_vm6, %v314_v34 }
  0x9c   : > { %373 = vst.msk [vmem:[#allocation2 + $0x8] sm:$0xf] %vm371_vm7, %v365_v28  ;;  %v248_v38 = vpop.permute.xlu0 %247 }
  0x9d   : > { %391 = vst.msk [vmem:[#allocation2] sm:$0xf] %vm390_vm8, %v382_v37 }
  0x9e   : > { %255 = vst.msk [vmem:[#allocation2 + $0x10] sm:$0xf] %vm252_vm4, %v248_v38  ;;  %v282_v40 = vpop.permute.xlu1 %281 }
  0x9f   : > { %289 = vst.msk [vmem:[#allocation2 + $0x10] sm:$0xf] %vm286_vm5, %v282_v40 }
  0xa0   : > { %v384_v41 = vpop.permute.xlu0 %383 }
  0xa1   : > { %392 = vst.msk [vmem:[#allocation2 + $0x8] sm:$0xf] %vm390_vm8, %v384_v41 }
  0xa2   : > { %v418_v42 = vpop.permute.xlu1 %417 }
  0xa3   : > { %426 = vst.msk [vmem:[#allocation2 + $0x8] sm:$0xf] %vm424_vm9, %v418_v42 }
  0xa4   : > { %v416_v43 = vpop.permute.xlu0 %415 }
  0xa5   : > { %425 = vst.msk [vmem:[#allocation2] sm:$0xf] %vm424_vm9, %v416_v43 }
  0xa6   : > { %v474_v44 = vpop.permute.xlu1 %473 }
  0xa7   : > { %483 = vst.msk [vmem:[#allocation2] sm:$0xf] %vm482_vm10, %v474_v44 }
  0xa8   : > { %v316_v45 = vpop.permute.xlu0 %315 }
  0xa9   : > { %323 = vst.msk [vmem:[#allocation2 + $0x10] sm:$0xf] %vm320_vm6, %v316_v45 }
  0xaa   : > { %v367_v47 = vpop.permute.xlu1 %366 }
  0xab   : > { %374 = vst.msk [vmem:[#allocation2 + $0x10] sm:$0xf] %vm371_vm7, %v367_v47 }
  0xac   : > { %v476_v48 = vpop.permute.xlu0 %475 }
  0xad   : > { %484 = vst.msk [vmem:[#allocation2 + $0x8] sm:$0xf] %vm482_vm10, %v476_v48 }
  0xae   : > { %v420_v50 = vpop.permute.xlu1 %419 }
  0xb0   : > { %v386_v51 = vpop.permute.xlu0 %385 }
  0xb1   : > { %393 = vst.msk [vmem:[#allocation2 + $0x10] sm:$0xf] %vm390_vm8, %v386_v51 }
  0xb2   : > { %427 = vst.msk [vmem:[#allocation2 + $0x10] sm:$0xf] %vm424_vm9, %v420_v50 }
  0xb4   : > { %v478_v52 = vpop.permute.xlu0 %477  ;;  %v859_v53 = vld [vmem:[#allocation2] ss:$8 sps:$4 sm:$0xff]  }
  0xb5   : > { %485 = vst.msk [vmem:[#allocation2 + $0x10] sm:$0xf] %vm482_vm10, %v478_v52  ;;  %647 = vmatmul.mubr.bf16.vlgmr.msra.gmra.mxu0 %v859_v53 }
  0xbc   : > { %v512_v55 = vld [vmem:[#allocation2 + $0x10] sm:$0xff] }
  0xbd   : > { %v777_v56 = vcombine.low %v512_v55, %v512_v55  ;;  %v778_v57 = vcombine.high %v512_v55, %v512_v55 }
  0xbf   : > { %789 = vmatprep.mubr.msk.bf16.mxu1 %vm607_vm11, %v778_v57 }
  0xc0   : > { %655 = vmatmul.mubr.bf16.vlgmr.msra.gmra.mxu1 %v777_v56 }
 0x175   : > { %v648_v59 = vpop.f32.mrf.mxu0 }
 0x176   : > { %v649_v22 = vadd.f32 %v774_v58, %v648_v59 }
 0x177   : > { %v650_v60 = vpop.f32.mrf.mxu0 }
 0x178   : > { %v662_v61 = vmax.f32 %v649_v22, 0.0 }
 0x179   : > { %v651_v62 = vpop.f32.mrf.mxu0 }
 0x17a   : > { %v795_v63 = vpack.c.bf16 %v662_v61, %v662_v61  ;;  %v652_v1 = vadd.f32 %v774_v58, %v651_v62 }
 0x17b   : > { %v653_v2 = vpop.f32.mrf.mxu0 }
 0x17c   : > { %678 = vst.msk [vmem:[%s192_s27] sm:$0xf] %vm198_vm2, %v795_v63  ;;  %v663_v3 = vmax.f32 %v652_v1, 0.0 }
 0x17e   : > { %v796_v5 = vpack.c.bf16 %v663_v3, %v663_v3 }
 0x180   : > { %v656_v39 = vpop.f32.mrf.mxu1  ;;  %679 = vst.msk [vmem:[%s192_s27 + $0x4] sm:$0xf] %vm198_vm2, %v796_v5 }
 0x181   : > { %v657_v49 = vadd.f32 %v774_v58, %v656_v39 }
 0x182   : > { %v658_v6 = vpop.f32.mrf.mxu1 }
 0x183   : > { %v664_v7 = vmax.f32 %v657_v49, 0.0 }
 0x184   : > { %v659_v8 = vpop.f32.mrf.mxu1 }
 0x185   : > { %v797_v9 = vpack.c.bf16 %v664_v7, %v664_v7 }
 0x186   : > { %v660_v11 = vpop.f32.mrf.mxu1 }
 0x187   : > { %680 = vst.msk [vmem:[%s192_s27 + $0x8] sm:$0xf] %vm198_vm2, %v797_v9 }
 0x188 PF: > { %s13_s14 = sadd.s32 1, %s886_s14   ;;  %s1208_s12 = smov %s882_s13 }
 0x189   : > { %p10_p5 = scmp.ge.s32.totalorder %s13_s14, 4   ;;  %s1209_s13 = smov %s1211_s15 }
 0x18b   :  { %12 = sbr.rel (!%p10_p5) target bundleno = 2 (0x2), region = 62 }

// kernel: deeplabv3plus_baseline_forward.10
= control target key start
LH: loop header
LB: loop body
LE: loop exit
PB: predicated region body
PF: predicated region fallthrough
CT: control target
= control target key end

     0   :  { %vm104_vm0 = vcmask 1043456   ;;  %vm79_vm1 = vcmask 64512   ;;  %vm285_vm2 = vcmask 60416   ;;  %s534_s1 = inlined_call_operand.vmem [shape: bf16[8,8], index: 1, kind: input, shape index: {}]   ;;  %s535_s0 = inlined_call_operand.vmem [shape: bf16[128,8], index: 0, kind: input, shape index: {}]   ;;  %s536_s2 = inlined_call_operand.vmem [shape: f32[1,8], index: 2, kind: input, shape index: {}]   ;;  %s537_s3 = inlined_call_operand.vmem [shape: bf16[128,8], index: 3, kind: output, shape index: {}]  }
   0x1   :  { %v31_v0 = vld [vmem:[%s534_s1] sm:$0xf]  ;;  %v388_v4 = vld [vmem:[%s535_s0 + $0x8] sm:$0xff]   ;;  %v390_v6 = vld [vmem:[%s535_s0 + $0x10] sm:$0xff]  }
   0x2   :  { %384 = vmatprep.subr.msk.bf16.mxu0 %vm104_vm0, %v31_v0  ;;  %385 = vmatprep.subr.msk.bf16.mxu1 %vm104_vm0, %v31_v0  ;;  %v106_v1 = vsel %vm104_vm0, %v31_v0, 0  ;;  %v386_v2 = vld [vmem:[%s535_s0] sm:$0xff]   ;;  %v389_v5 = vld [vmem:[%s535_s0 + $0x28] sm:$0xff]   ;;  %v391_v7 = vld [vmem:[%s535_s0 + $0x30] sm:$0xff]  }
   0x3   :  { %365 = vmatpush3.bf16.msra.mxu0 %v106_v1  ;;  %383 = vmatpush3.bf16.msra.mxu1 %v106_v1  ;;  %v387_v3 = vld [vmem:[%s535_s0 + $0x20] sm:$0xff]   ;;  %v392_v8 = vld [vmem:[%s535_s0 + $0x18] sm:$0xff]  }
   0x4   :  { %366 = vmatprep.mubr.msk.bf16.mxu0 %vm79_vm1, %v386_v2  ;;  %374 = vmatprep.mubr.msk.bf16.mxu1 %vm79_vm1, %v387_v3  ;;  %v393_v9 = vld [vmem:[%s535_s0 + $0x38] sm:$0xff]   ;;  %v452_v10 = vld [vmem:[%s536_s2] ss:$0 sm:$0xff] }
   0x6   :  { %367 = vmatmul.mubr.msk.bf16.vlgmr.msra.gmra.mxu0 %vm79_vm1, %v388_v4  ;;  %375 = vmatmul.mubr.msk.bf16.vlgmr.msra.gmra.mxu1 %vm79_vm1, %v389_v5 }
   0x7   :  { %370 = vmatprep.mubr.msk.bf16.mxu0 %vm79_vm1, %v390_v6  ;;  %378 = vmatprep.mubr.msk.bf16.mxu1 %vm79_vm1, %v391_v7 }
   0xe   :  { %371 = vmatmul.mubr.msk.bf16.gmra.mxu0 %vm79_vm1, %v392_v8  ;;  %379 = vmatmul.mubr.msk.bf16.gmra.mxu1 %vm79_vm1, %v393_v9 }
  0xc6   :  { %v368_v11 = vpop.f32.mrf.mxu0  ;;  %v376_v13 = vpop.f32.mrf.mxu1 }
  0xc7   :  { %v151_v12 = vadd.f32 %v368_v11, %v452_v10  ;;  %v183_v14 = vadd.f32 %v376_v13, %v452_v10 }
  0xc8   :  { %v142_v15 = vpop.f32.mrf.mxu0  ;;  %v174_v18 = vpop.f32.mrf.mxu1 }
  0xc9   :  { %v207_v16 = vmax.f32 %v151_v12, 0.0  ;;  %v143_v17 = vadd.f32 %v452_v10, %v142_v15  ;;  %v215_v19 = vmax.f32 %v183_v14, 0.0  ;;  %v175_v20 = vadd.f32 %v452_v10, %v174_v18 }
  0xca   :  { %v369_v21 = vpop.f32.mrf.mxu0  ;;  %v377_v25 = vpop.f32.mrf.mxu1 }
  0xcb   :  { %v341_v22 = vpack.c.bf16 %v207_v16, %v207_v16  ;;  %v205_v23 = vmax.f32 %v143_v17, 0.0  ;;  %v154_v24 = vadd.f32 %v369_v21, %v452_v10  ;;  %v349_v26 = vpack.c.bf16 %v215_v19, %v215_v19 }
  0xcc   :  { %v213_v27 = vmax.f32 %v175_v20, 0.0  ;;  %v186_v28 = vadd.f32 %v377_v25, %v452_v10  ;;  %v145_v29 = vpop.f32.mrf.mxu0  ;;  %v177_v33 = vpop.f32.mrf.mxu1 }
  0xcd   :  { %288 = vst.msk [vmem:[%s537_s3 + $0x8] sm:$0xf] %vm285_vm2, %v341_v22  ;;  %v339_v30 = vpack.c.bf16 %v205_v23, %v205_v23  ;;  %v208_v31 = vmax.f32 %v154_v24, 0.0  ;;  %v146_v32 = vadd.f32 %v452_v10, %v145_v29  ;;  %296 = vst.msk [vmem:[%s537_s3 + $0x28] sm:$0xf] %vm285_vm2, %v349_v26  ;;  %v178_v36 = vadd.f32 %v452_v10, %v177_v33 }
  0xce   :  { %v347_v34 = vpack.c.bf16 %v213_v27, %v213_v27  ;;  %v216_v35 = vmax.f32 %v186_v28, 0.0  ;;  %v372_v37 = vpop.f32.mrf.mxu0  ;;  %v380_v41 = vpop.f32.mrf.mxu1 }
  0xcf   :  { %286 = vst.msk [vmem:[%s537_s3] sm:$0xf] %vm285_vm2, %v339_v30  ;;  %v342_v38 = vpack.c.bf16 %v208_v31, %v208_v31  ;;  %v206_v39 = vmax.f32 %v146_v32, 0.0  ;;  %v167_v40 = vadd.f32 %v372_v37, %v452_v10  ;;  %v214_v43 = vmax.f32 %v178_v36, 0.0 }
  0xd0   :  { %294 = vst.msk [vmem:[%s537_s3 + $0x20] sm:$0xf] %vm285_vm2, %v347_v34  ;;  %v350_v42 = vpack.c.bf16 %v216_v35, %v216_v35  ;;  %v199_v44 = vadd.f32 %v380_v41, %v452_v10  ;;  %v158_v45 = vpop.f32.mrf.mxu0  ;;  %v190_v49 = vpop.f32.mrf.mxu1 }
  0xd1   :  { %289 = vst.msk [vmem:[%s537_s3 + $0xc] sm:$0xf] %vm285_vm2, %v342_v38  ;;  %v340_v46 = vpack.c.bf16 %v206_v39, %v206_v39  ;;  %v211_v47 = vmax.f32 %v167_v40, 0.0  ;;  %v159_v48 = vadd.f32 %v452_v10, %v158_v45  ;;  %v348_v50 = vpack.c.bf16 %v214_v43, %v214_v43 }
  0xd2   :  { %297 = vst.msk [vmem:[%s537_s3 + $0x2c] sm:$0xf] %vm285_vm2, %v350_v42  ;;  %v219_v51 = vmax.f32 %v199_v44, 0.0  ;;  %v191_v52 = vadd.f32 %v452_v10, %v190_v49  ;;  %v373_v53 = vpop.f32.mrf.mxu0  ;;  %v381_v57 = vpop.f32.mrf.mxu1 }
  0xd3   :  { %287 = vst.msk [vmem:[%s537_s3 + $0x4] sm:$0xf] %vm285_vm2, %v340_v46  ;;  %v345_v54 = vpack.c.bf16 %v211_v47, %v211_v47  ;;  %v209_v55 = vmax.f32 %v159_v48, 0.0  ;;  %v170_v56 = vadd.f32 %v373_v53, %v452_v10  ;;  %295 = vst.msk [vmem:[%s537_s3 + $0x24] sm:$0xf] %vm285_vm2, %v348_v50  ;;  %v202_v60 = vadd.f32 %v381_v57, %v452_v10 }
  0xd4   :  { %v353_v58 = vpack.c.bf16 %v219_v51, %v219_v51  ;;  %v217_v59 = vmax.f32 %v191_v52, 0.0  ;;  %v161_v61 = vpop.f32.mrf.mxu0  ;;  %v193_v1 = vpop.f32.mrf.mxu1 }
  0xd5   :  { %292 = vst.msk [vmem:[%s537_s3 + $0x18] sm:$0xf] %vm285_vm2, %v345_v54  ;;  %v343_v62 = vpack.c.bf16 %v209_v55, %v209_v55  ;;  %v212_v63 = vmax.f32 %v170_v56, 0.0  ;;  %v162_v0 = vadd.f32 %v452_v10, %v161_v61  ;;  %v220_v3 = vmax.f32 %v202_v60, 0.0 }
  0xd6   :  { %300 = vst.msk [vmem:[%s537_s3 + $0x38] sm:$0xf] %vm285_vm2, %v353_v58  ;;  %v351_v2 = vpack.c.bf16 %v217_v59, %v217_v59  ;;  %v194_v4 = vadd.f32 %v452_v10, %v193_v1 }
  0xd7   :  { %290 = vst.msk [vmem:[%s537_s3 + $0x10] sm:$0xf] %vm285_vm2, %v343_v62  ;;  %v346_v5 = vpack.c.bf16 %v212_v63, %v212_v63  ;;  %v210_v6 = vmax.f32 %v162_v0, 0.0  ;;  %v354_v7 = vpack.c.bf16 %v220_v3, %v220_v3 }
  0xd8   :  { %298 = vst.msk [vmem:[%s537_s3 + $0x30] sm:$0xf] %vm285_vm2, %v351_v2  ;;  %v218_v8 = vmax.f32 %v194_v4, 0.0 }
  0xd9   :  { %293 = vst.msk [vmem:[%s537_s3 + $0x1c] sm:$0xf] %vm285_vm2, %v346_v5  ;;  %v344_v9 = vpack.c.bf16 %v210_v6, %v210_v6  ;;  %301 = vst.msk [vmem:[%s537_s3 + $0x3c] sm:$0xf] %vm285_vm2, %v354_v7 }
  0xda   :  { %v352_v10 = vpack.c.bf16 %v218_v8, %v218_v8 }
  0xdb   :  { %291 = vst.msk [vmem:[%s537_s3 + $0x14] sm:$0xf] %vm285_vm2, %v344_v9 }
  0xdc   :  { %299 = vst.msk [vmem:[%s537_s3 + $0x34] sm:$0xf] %vm285_vm2, %v352_v10 }

// kernel: deeplabv3plus_baseline_forward.9
= control target key start
LH: loop header
LB: loop body
LE: loop exit
PB: predicated region body
PF: predicated region fallthrough
CT: control target
= control target key end

     0   :  { %s2699_s24 = smov 0   ;;  %s2701_s25 = smov 0   ;;  %s3530_s0 = inlined_call_operand.vmem [shape: bf16[2,110,16], index: 0, kind: input, shape index: {}]   ;;  %s3531_s1 = inlined_call_operand.vmem [shape: bf16[16,16], index: 1, kind: input, shape index: {}]   ;;  %s3532_s2 = inlined_call_operand.vmem [shape: bf16[144,16], index: 2, kind: input, shape index: {}]   ;;  %s3533_s3 = inlined_call_operand.vmem [shape: bf16[144,16], index: 3, kind: input, shape index: {}]   ;;  %s3534_s4 = inlined_call_operand.vmem [shape: f32[3,1,16], index: 4, kind: input, shape index: {}]   ;;  %s3535_s5 = inlined_call_operand.vmem [shape: bf16[3,16,16], index: 5, kind: input, shape index: {}]   ;;  %s3536_s6 = inlined_call_operand.vmem [shape: f32[2,1,16], index: 6, kind: input, shape index: {}]   ;;  %s3537_s7 = inlined_call_operand.vmem [shape: bf16[2,40,16], index: 7, kind: output, shape index: {}]  }
   0x1   :  { %s2703_s26 = smov 0  }
   0x2 LB: > { %s29_s27 = sadd.s32 1, %s2643_s25  ;;  %p2396_p0 = scmp.ge.s32.totalorder %s2647_s26, 1  ;;  %s2647_s26 = sphi %s2703_s26, %s17_s26   ;;  %s2643_s25 = sphi %s2701_s25, %s3553_s25   ;;  %s2639_s24 = sphi %s2699_s24, %s3552_s24  }
   0x3   : > { %p31_p1 = scmp.ge.s32.totalorder %s29_s27, 2  ;;  %p259_p2 = scmp.lt.s32.totalorder %s2647_s26, 3 }
   0x5   : > { %s3555_s27 = smov (%p31_p1, %s29_s27), 0  ;;  %p260_p3 = pnand %p2396_p0, %p259_p2 }
   0x6   : > { %p298_p4 = scmp.lt.s32.totalorder (!%p260_p3), %s2639_s24, 1  ;;  %s2652_s11 = smov (!%p260_p3), 48  }
   0x7   : > { %263 = sbr.rel (%p260_p3) target bundleno = 849 (0x351), region = 48  ;;  %s2653_s12 = smov (!%p260_p3), 32  }
   0x8   : > { %s2654_s13 = smov (!%p260_p3), 16   ;;  %s2655_s14 = smov (!%p260_p3), 64  }
   0x9   : > { %s2656_s15 = smov (!%p260_p3), 80   ;;  %s2657_s16 = smov (!%p260_p3), 96  }
   0xa   : > { %s2658_s17 = smov (!%p260_p3), 112  }
   0xc   : > { %s3557_s24 = smov (!%p298_p4, %s2639_s24), 1  ;;  %vm708_vm0 = vsmask.f32 256  ;;  %vm709_vm1 = vsmask.f32 4368  ;;  %v2649_v0 = vmov 0.0  }
   0xd   : > { %2501 = vmatprep.subr.bf16.mxu0 %v2649_v0  ;;  %2515 = vmatprep.subr.bf16.mxu1 %v2649_v0  ;;  %s2557_s28 = smul.u32 56, %s3557_s24  ;;  %vm620_vm2 = vsmask.f32 1280  ;;  %v2593_v1 = vld [vmem:[%s3531_s1] sm:$0xff]   ;;  %vm621_vm3 = vsmask.f32 5392  ;;  %vm2746_vm5 = vmor %vm708_vm0, %vm709_vm1  ;;  %s305_s9 = scalar_lea.vmem %s3536_s6, %s3557_s24 }
   0xe   : > { %vm2650_vm4 = vmmov 0   ;;  %2502 = vmatpush3.bf16.msra.mxu0 %v2593_v1  ;;  %v2651_v10 = vmov 0   ;;  %vm863_vm6 = vsmask.f32 3328  ;;  %vm864_vm7 = vsmask.f32 7440  ;;  %vm2771_vm8 = vmor %vm620_vm2, %vm621_vm3 }
   0xf   : > { %s2728_s10 = scalar_lea.vmem %s3530_s0, %s2557_s28  ;;  %2503 = vmatprep.mubr.msk.bf16.mxu0 %vm2650_vm4, %v2649_v0  ;;  %2517 = vmatprep.mubr.msk.bf16.mxu1 %vm2650_vm4, %v2649_v0  ;;  %vm542_vm9 = vsmask.f32 2304  ;;  %vm543_vm10 = vsmask.f32 6416  ;;  %vm2799_vm11 = vmor %vm863_vm6, %vm864_vm7  ;;  %vm347_vm13 = vsmask.f32 7424 }
  0x10   : > { %v781_v2 = vld [vmem:[%s2728_s10 + $0xc] sm:$0x8]  ;;  %v782_v3 = vld [vmem:[%s2728_s10 + $0x10] sm:$0xf]  ;;  %v702_v4 = vld [vmem:[%s2728_s10 + $0x4] sm:$0x8]  ;;  %1379 = vmatprep.subr.bf16.mxu0 %v2651_v10 }
  0x11   : > { %v788_v5 = vshrl.u32 %v781_v2, 16  ;;  %v793_v6 = vshrl.u32 %v782_v3, 16  ;;  %v796_v7 = vshll.u32 %v782_v3, 16  ;;  %v703_v8 = vld [vmem:[%s2728_s10 + $0x8] sm:$0xf]  ;;  %v712_v9 = vshrl.u32 %v702_v4, 16  ;;  %vm2812_vm12 = vmor %vm542_vm9, %vm543_vm10 }
  0x12   : > { %v717_v11 = vshrl.u32 %v703_v8, 16  ;;  %v720_v12 = vshll.u32 %v703_v8, 16  ;;  %v704_v13 = vld [vmem:[%s2728_s10 + $0xc] sm:$0xf]  ;;  %v614_v14 = vld [vmem:[%s2728_s10 + $0x4] sm:$0xc] }
  0x13   : > { %v2413_v15 = vrot.slane %v788_v5, 11  ;;  %v2741_v16 = vrot.slane %v793_v6, 7  ;;  %v2412_v17 = vrot.slane %v712_v9, 11  ;;  %v726_v18 = vshrl.u32 %v704_v13, 16  ;;  %v615_v19 = vld [vmem:[%s2728_s10 + $0x8] sm:$0xf] }
  0x14   : > { %v719_v21 = vrot.slane %v717_v11, 7  ;;  %v729_v22 = vshll.u32 %v704_v13, 16  ;;  %v624_v23 = vshrl.u32 %v614_v14, 16  ;;  %v627_v24 = vshll.u32 %v614_v14, 16  ;;  %v783_v29 = vld [vmem:[%s2728_s10 + $0x14] sm:$0xf] }
  0x15   : > { %v798_v25 = vor.u32 %v796_v7, %v2741_v16  ;;  %v2751_v26 = vrot.slane %v726_v18, 7  ;;  %v633_v27 = vshrl.u32 %v615_v19, 16  ;;  %v636_v28 = vshll.u32 %v615_v19, 16  ;;  %v616_v34 = vld [vmem:[%s2728_s10 + $0xc] sm:$0xf]  ;;  %s2558_s20 = smul.u32 20, %s3557_s24 }
  0x16   : > { %v722_v30 = vor.u32 %v720_v12, %v719_v21  ;;  %v724_v31 = vrot.slane %v719_v21, 4  ;;  %v626_v32 = vrot.slane %v624_v23, 6  ;;  %v629_v33 = vrot.slane %v627_v24, 7  ;;  %v858_v39 = vld [vmem:[%s2728_s10 + $0x14] sm:$0xf] }
  0x17   : > { %v799_v35 = vsel %vm2746_vm5, %v2413_v15, %v798_v25  ;;  %v731_v36 = vor.u32 %v729_v22, %v2751_v26  ;;  %v635_v37 = vrot.slane %v633_v27, 6  ;;  %v638_v38 = vrot.slane %v636_v28, 7  ;;  %v2764_v44 = vld [vmem:[%s2728_s10 + $0x18] sm:$0xf]  ;;  %v857_v54 = vld [vmem:[%s2728_s10 + $0x10] sm:$0xf]  ;;  %s314_s23 = scalar_lea.vmem %s3537_s7, %s2558_s20 }
  0x18   : > { %836 = vrot.lane.b32.xlu0 %v799_v35, %s2652_s11  ;;  %v723_v40 = vsel %vm2746_vm5, %v2412_v17, %v722_v30  ;;  %v630_v41 = vor.u32 %v629_v33, %v626_v32  ;;  %v800_v42 = vrot.slane %v2741_v16, 4  ;;  %v802_v43 = vshrl.u32 %v783_v29, 16  ;;  %v942_v59 = vld [vmem:[%s2728_s10 + $0x14] sm:$0xf]  ;;  %v943_v1 = vld [vmem:[%s2728_s10 + $0x18] sm:$0xf] }
  0x19   : > { %760 = vrot.lane.b32.xlu1 %v723_v40, %s2653_s12  ;;  %v732_v45 = vsel %vm2746_vm5, %v724_v31, %v731_v36  ;;  %v639_v47 = vor.u32 %v638_v38, %v635_v37  ;;  %v805_v48 = vshll.u32 %v783_v29, 16  ;;  %v643_v49 = vshrl.u32 %v616_v34, 16  ;;  %v941_v9 = vld [vmem:[%s2728_s10 + $0x10] sm:$0xe]  ;;  %v1027_v15 = vld [vmem:[%s2728_s10 + $0x1c] sm:$0xf] }
  0x1a   : > { %v631_v50 = vrot.slane %v630_v41, 4  ;;  %v2775_v51 = vrot.slane %v802_v43, 7  ;;  %v646_v52 = vshll.u32 %v616_v34, 16  ;;  %v876_v53 = vshll.u32 %v858_v39, 16  ;;  %v1028_v30 = vld [vmem:[%s2728_s10 + $0x20] sm:$0xf] }
  0x1b   : > { %v641_v55 = vrot.slane %v639_v47, 4  ;;  %v645_v56 = vrot.slane %v643_v49, 6  ;;  %v880_v57 = vshrl.u32 %v858_v39, 16  ;;  %v886_v58 = vshll.u32 %v2764_v44, 16  ;;  %v1026_v36 = vld [vmem:[%s2728_s10 + $0x18] sm:$0xe] }
  0x1c   : > { %v640_v60 = vsel %vm2771_vm8, %v631_v50, %v639_v47  ;;  %v807_v61 = vor.u32 %v805_v48, %v2775_v51  ;;  %v648_v62 = vrot.slane %v646_v52, 7  ;;  %v878_v63 = vrot.slane %v876_v53, 5  ;;  %v1112_v48 = vld [vmem:[%s2728_s10 + $0x1c] sm:$0xf] }
  0x1d   : > { %762 = vrot.lane.b32.xlu1 %v732_v45, %s2653_s12  ;;  %681 = vrot.lane.b32.xlu0 %v640_v60, %s2654_s13  ;;  %v882_v2 = vrot.slane %v880_v57, 4  ;;  %v2786_v3 = vrot.slane %v886_v58, 5  ;;  %v867_v4 = vshrl.u32 %v857_v54, 16  ;;  %v870_v7 = vshll.u32 %v857_v54, 16  ;;  %v1113_v54 = vld [vmem:[%s2728_s10 + $0x20] sm:$0xf] }
  0x1e   : > { %v808_v5 = vsel %vm2746_vm5, %v800_v42, %v807_v61  ;;  %v2790_v6 = vor.u32 %v648_v62, %v645_v56  ;;  %v957_v8 = vshrl.u32 %v942_v59, 16  ;;  %v960_v13 = vshll.u32 %v942_v59, 16 }
  0x1f   : > { %v883_v11 = vor.u32 %v882_v2, %v878_v63  ;;  %v869_v12 = vrot.slane %v867_v4, 4  ;;  %v967_v14 = vshrl.u32 %v943_v1, 16  ;;  %v872_v18 = vrot.slane %v870_v7, 5  ;;  %v617_v7 = vld [vmem:[%s2728_s10 + $0x10] sm:$0xf] }
  0x20   : > { %v650_v16 = vsel %vm2771_vm8, %v641_v55, %v2790_v6  ;;  %v959_v19 = vrot.slane %v957_v8, 5  ;;  %v970_v21 = vshll.u32 %v943_v1, 16  ;;  %v962_v23 = vrot.slane %v960_v13, 6  ;;  %v618_v13 = vld [vmem:[%s2728_s10 + $0x14] sm:$0xf] }
  0x21   : > { %838 = vrot.lane.b32.xlu1 %v808_v5, %s2652_s11  ;;  %683 = vrot.lane.b32.xlu0 %v650_v16, %s2654_s13  ;;  %v884_v22 = vrot.slane %v883_v11, 4  ;;  %v969_v24 = vrot.slane %v967_v14, 5  ;;  %v948_v25 = vshrl.u32 %v941_v9, 16  ;;  %v873_v27 = vor.u32 %v872_v18, %v869_v12 }
  0x22   : > { %v972_v28 = vrot.slane %v970_v21, 6  ;;  %v951_v29 = vshll.u32 %v941_v9, 16  ;;  %v1042_v31 = vshrl.u32 %v1027_v15, 16  ;;  %v963_v33 = vor.u32 %v962_v23, %v959_v19 }
  0x23   : > { %v889_v32 = vsel %vm2799_vm11, %v884_v22, %v2786_v3  ;;  %v950_v34 = vrot.slane %v948_v25, 5  ;;  %v1045_v35 = vshll.u32 %v1027_v15, 16  ;;  %v874_v37 = vrot.slane %v873_v27, 4 }
  0x24   : > { %v2816_v39 = vor.u32 %v972_v28, %v969_v24  ;;  %v953_v40 = vrot.slane %v951_v29, 6  ;;  %v1044_v41 = vrot.slane %v1042_v31, 5  ;;  %v965_v42 = vrot.slane %v963_v33, 4  ;;  %v705_v24 = vld [vmem:[%s2728_s10 + $0x10] sm:$0xf] }
  0x25   : > { %922 = vrot.lane.b32.xlu1 %v889_v32, %s2655_s14  ;;  %v1047_v43 = vrot.slane %v1045_v35, 6  ;;  %v1052_v45 = vshrl.u32 %v1028_v30, 16  ;;  %v1055_v47 = vshll.u32 %v1028_v30, 16  ;;  %v879_v49 = vsel %vm2799_vm11, %v874_v37, %v878_v63  ;;  %v1111_v63 = vld [vmem:[%s2728_s10 + $0x18] sm:$0xc] }
  0x26   : > { %v954_v50 = vor.u32 %v953_v40, %v950_v34  ;;  %v1033_v52 = vshrl.u32 %v1026_v36, 16  ;;  %v1036_v53 = vshll.u32 %v1026_v36, 16  ;;  %920 = vrot.lane.b32.xlu0 %v879_v49, %s2655_s14  ;;  %v974_v55 = vsel %vm2812_vm12, %v965_v42, %v2816_v39  ;;  %v706_v30 = vld [vmem:[%s2728_s10 + $0x14] sm:$0xf] }
  0x27   : > { %v1048_v56 = vor.u32 %v1047_v43, %v1044_v41  ;;  %v1054_v57 = vrot.slane %v1052_v45, 5  ;;  %v1057_v58 = vrot.slane %v1055_v47, 6  ;;  %v1127_v62 = vshrl.u32 %v1112_v48, 16 }
  0x28   : > { %v955_v59 = vrot.slane %v954_v50, 4  ;;  %v1035_v60 = vrot.slane %v1033_v52, 5  ;;  %v1038_v61 = vrot.slane %v1036_v53, 6  ;;  %v1130_v4 = vshll.u32 %v1112_v48, 16  ;;  %v784_v52 = vld [vmem:[%s2728_s10 + $0x18] sm:$0xf] }
  0x29   : > { %1007 = vrot.lane.b32.xlu1 %v974_v55, %s2656_s15  ;;  %v1050_v1 = vrot.slane %v1048_v56, 4  ;;  %v2829_v2 = vor.u32 %v1057_v58, %v1054_v57  ;;  %v1137_v5 = vshrl.u32 %v1113_v54, 16  ;;  %v1129_v11 = vrot.slane %v1127_v62, 6  ;;  %v785_v53 = vld [vmem:[%s2728_s10 + $0x1c] sm:$0xf] }
  0x2a   : > { %v964_v8 = vsel %vm2812_vm12, %v955_v59, %v963_v33  ;;  %v1039_v9 = vor.u32 %v1038_v61, %v1035_v60  ;;  %v1140_v12 = vshll.u32 %v1113_v54, 16  ;;  %v1132_v15 = vrot.slane %v1130_v4, 7  ;;  %v860_v57 = vld [vmem:[%s2728_s10 + $0x1c] sm:$0xf]  ;;  %v2862_v62 = vld [vmem:[%s2728_s10 + $0x20] sm:$0xf] }
  0x2b   : > { %1005 = vrot.lane.b32.xlu0 %v964_v8, %s2656_s15  ;;  %v1059_v14 = vsel %vm2812_vm12, %v1050_v1, %v2829_v2  ;;  %v1139_v16 = vrot.slane %v1137_v5, 6  ;;  %v1118_v18 = vshrl.u32 %v1111_v63, 16  ;;  %v1121_v22 = vshll.u32 %v1111_v63, 16 }
  0x2c   : > { %v1040_v19 = vrot.slane %v1039_v9, 4  ;;  %v1142_v21 = vrot.slane %v1140_v12, 7  ;;  %v653_v23 = vshrl.u32 %v617_v7, 16  ;;  %v1133_v25 = vor.u32 %v1132_v15, %v1129_v11 }
  0x2d   : > { %1092 = vrot.lane.b32.xlu1 %v1059_v14, %s2657_s16  ;;  %v1120_v27 = vrot.slane %v1118_v18, 6  ;;  %v656_v28 = vshll.u32 %v617_v7, 16  ;;  %v663_v29 = vshrl.u32 %v618_v13, 16  ;;  %v1123_v33 = vrot.slane %v1121_v22, 7  ;;  %v945_v14 = vld [vmem:[%s2728_s10 + $0x20] sm:$0xf] }
  0x2e   : > { %v1049_v31 = vsel %vm2812_vm12, %v1040_v19, %v1048_v56  ;;  %v2844_v32 = vor.u32 %v1142_v21, %v1139_v16  ;;  %v655_v34 = vrot.slane %v653_v23, 6  ;;  %v1135_v35 = vrot.slane %v1133_v25, 4 }
  0x2f   : > { %1090 = vrot.lane.b32.xlu0 %v1049_v31, %s2657_s16  ;;  %v658_v36 = vrot.slane %v656_v28, 7  ;;  %v665_v37 = vrot.slane %v663_v29, 6  ;;  %v666_v40 = vshll.u32 %v618_v13, 16  ;;  %v890_v41 = vshrl.u32 %v2764_v44, 16 }
  0x30   : > { %v1124_v42 = vor.u32 %v1123_v33, %v1120_v27  ;;  %v735_v43 = vshrl.u32 %v705_v24, 16  ;;  %v744_v45 = vshrl.u32 %v706_v30, 16  ;;  %v1144_v47 = vsel %vm2771_vm8, %v1135_v35, %v2844_v32  ;;  %v1030_v35 = vld [vmem:[%s2728_s10 + $0x28] sm:$0xf] }
  0x31   : > { %v659_v48 = vor.u32 %v658_v36, %v655_v34  ;;  %v668_v49 = vrot.slane %v666_v40, 7  ;;  %v747_v50 = vshll.u32 %v706_v30, 16  ;;  %1177 = vrot.lane.b32.xlu1 %v1144_v47, %s2658_s17  ;;  %v651_v44 = vrot.slane %v2790_v6, 4 }
  0x32   : > { %v1125_v54 = vrot.slane %v1124_v42, 4  ;;  %v737_v55 = vrot.slane %v735_v43, 7  ;;  %v2855_v56 = vrot.slane %v744_v45, 7  ;;  %v733_v60 = vrot.slane %v2751_v26, 4  ;;  %v944_v26 = vld [vmem:[%s2728_s10 + $0x1c] sm:$0xf] }
  0x33   : > { %v661_v58 = vrot.slane %v659_v48, 4  ;;  %v2858_v59 = vor.u32 %v668_v49, %v665_v37  ;;  %v738_v61 = vshll.u32 %v705_v24, 16  ;;  %v811_v4 = vshrl.u32 %v784_v52, 16 }
  0x34   : > { %v1134_v63 = vsel %vm2771_vm8, %v1125_v54, %v1133_v25  ;;  %v742_v1 = vrot.slane %v737_v55, 4  ;;  %v749_v6 = vor.u32 %v747_v50, %v2855_v56  ;;  %v820_v7 = vshrl.u32 %v785_v53, 16  ;;  %v1029_v25 = vld [vmem:[%s2728_s10 + $0x24] sm:$0xf] }
  0x35   : > { %1175 = vrot.lane.b32.xlu0 %v1134_v63, %s2658_s17  ;;  %v670_v5 = vsel %vm2771_vm8, %v661_v58, %v2858_v59  ;;  %v823_v8 = vshll.u32 %v785_v53, 16  ;;  %v660_v9 = vsel %vm2771_vm8, %v651_v44, %v659_v48  ;;  %v740_v11 = vor.u32 %v738_v61, %v737_v55  ;;  %v1114_v55 = vld [vmem:[%s2728_s10 + $0x24] sm:$0xf]  ;;  %v1115_v61 = vld [vmem:[%s2728_s10 + $0x28] sm:$0xf] }
  0x36   : > { %687 = vrot.lane.b32.xlu1 %v670_v5, %s2654_s13  ;;  %v813_v12 = vrot.slane %v811_v4, 7  ;;  %v814_v13 = vshll.u32 %v784_v52, 16  ;;  %v750_v15 = vsel %vm2746_vm5, %v742_v1, %v749_v6  ;;  %v2878_v16 = vrot.slane %v820_v7, 7 }
  0x37   : > { %v896_v18 = vshll.u32 %v860_v57, 16  ;;  %v900_v19 = vshrl.u32 %v860_v57, 16  ;;  %v809_v22 = vrot.slane %v2775_v51, 4  ;;  %v906_v24 = vshll.u32 %v2862_v62, 16 }
  0x38   : > { %v818_v21 = vrot.slane %v813_v12, 4  ;;  %v816_v23 = vor.u32 %v814_v13, %v813_v12  ;;  %v825_v27 = vor.u32 %v823_v8, %v2878_v16  ;;  %v892_v30 = vrot.slane %v890_v41, 4  ;;  %v619_v13 = vld [vmem:[%s2728_s10 + $0x18] sm:$0x7] }
  0x39   : > { %685 = vrot.lane.b32.xlu0 %v660_v9, %s2654_s13  ;;  %v898_v28 = vrot.slane %v896_v18, 5  ;;  %v902_v29 = vrot.slane %v900_v19, 4  ;;  %v741_v31 = vsel %vm2746_vm5, %v733_v60, %v740_v11  ;;  %v2888_v33 = vrot.slane %v906_v24, 5  ;;  %v707_v19 = vld [vmem:[%s2728_s10 + $0x18] sm:$0xf] }
  0x3a   : > { %766 = vrot.lane.b32.xlu1 %v750_v15, %s2653_s12  ;;  %v977_v34 = vshrl.u32 %v944_v26, 16  ;;  %v980_v51 = vshll.u32 %v944_v26, 16  ;;  %v826_v36 = vsel %vm2746_vm5, %v818_v21, %v825_v27  ;;  %v893_v40 = vor.u32 %v892_v30, %v2786_v3 }
  0x3b   : > { %v903_v37 = vor.u32 %v902_v29, %v898_v28  ;;  %v987_v42 = vshrl.u32 %v945_v14, 16  ;;  %v817_v41 = vsel %vm2746_vm5, %v809_v22, %v816_v23  ;;  %v990_v47 = vshll.u32 %v945_v14, 16 }
  0x3c   : > { %v979_v43 = vrot.slane %v977_v34, 5  ;;  %v982_v45 = vrot.slane %v980_v51, 6  ;;  %v894_v49 = vrot.slane %v893_v40, 4  ;;  %v1062_v52 = vshrl.u32 %v1029_v25, 16  ;;  %v786_v51 = vld [vmem:[%s2728_s10 + $0x20] sm:$0xf] }
  0x3d   : > { %764 = vrot.lane.b32.xlu0 %v741_v31, %s2653_s12  ;;  %v904_v48 = vrot.slane %v903_v37, 4  ;;  %v989_v50 = vrot.slane %v987_v42, 5  ;;  %v992_v54 = vrot.slane %v990_v47, 6  ;;  %v1065_v3 = vshll.u32 %v1029_v25, 16 }
  0x3e   : > { %842 = vrot.lane.b32.xlu1 %v826_v36, %s2652_s11  ;;  %v983_v53 = vor.u32 %v982_v45, %v979_v43  ;;  %v1072_v44 = vshrl.u32 %v1030_v35, 16  ;;  %v1064_v58 = vrot.slane %v1062_v52, 5  ;;  %v1075_v60 = vshll.u32 %v1030_v35, 16  ;;  %v862_v35 = vld [vmem:[%s2728_s10 + $0x24] sm:$0x1] }
  0x3f   : > { %v909_v57 = vsel %vm2799_vm11, %v904_v48, %v2888_v33  ;;  %v2903_v1 = vor.u32 %v992_v54, %v989_v50  ;;  %v1067_v6 = vrot.slane %v1065_v3, 6  ;;  %v975_v4 = vrot.slane %v2816_v39, 4  ;;  %v1031_v48 = vld [vmem:[%s2728_s10 + $0x2c] sm:$0x3] }
  0x40   : > { %v985_v63 = vrot.slane %v983_v53, 4  ;;  %v1074_v5 = vrot.slane %v1072_v44, 5  ;;  %v1077_v7 = vrot.slane %v1075_v60, 6  ;;  %v1147_v8 = vshrl.u32 %v1114_v55, 16 }
  0x41   : > { %840 = vrot.lane.b32.xlu0 %v817_v41, %s2652_s11  ;;  %v899_v26 = vsel %vm2799_vm11, %v894_v49, %v898_v28  ;;  %v1068_v9 = vor.u32 %v1067_v6, %v1064_v58  ;;  %v1150_v11 = vshll.u32 %v1114_v55, 16  ;;  %v1157_v12 = vshrl.u32 %v1115_v61, 16  ;;  %v946_v41 = vld [vmem:[%s2728_s10 + $0x24] sm:$0x3]  ;;  %v2948_v6 = vld [vmem:[%s2728_s10 + $0x18] sm:$0xff]  }
  0x42   : > { %926 = vrot.lane.b32.xlu1 %v909_v57, %s2655_s14  ;;  %v994_v14 = vsel %vm2812_vm12, %v985_v63, %v2903_v1  ;;  %v2914_v15 = vor.u32 %v1077_v7, %v1074_v5  ;;  %v1149_v18 = vrot.slane %v1147_v8, 6  ;;  %v1160_v39 = vshll.u32 %v1115_v61, 16  ;;  %v2594_v63 = vld [vmem:[%s2728_s10 + $0x10] sm:$0xff]  }
  0x43   : > { %v910_v21 = vshrl.u32 %v2862_v62, 16  ;;  %v1070_v22 = vrot.slane %v1068_v9, 4  ;;  %v1152_v23 = vrot.slane %v1150_v11, 7  ;;  %v1159_v24 = vrot.slane %v1157_v12, 6  ;;  %v536_v12 = vld [vmem:[%s2728_s10 + $0x4] sm:$0xe] }
  0x44   : > { %v984_v25 = vsel %vm2812_vm12, %v975_v4, %v983_v53  ;;  %v1162_v27 = vrot.slane %v1160_v39, 7  ;;  %v673_v28 = vshrl.u32 %v619_v13, 16  ;;  %v676_v29 = vshll.u32 %v619_v13, 16  ;;  %v1116_v53 = vld [vmem:[%s2728_s10 + $0x2c] sm:$0x7] }
  0x45   : > { %924 = vrot.lane.b32.xlu0 %v899_v26, %s2655_s14  ;;  %v1079_v30 = vsel %vm2812_vm12, %v1070_v22, %v2914_v15  ;;  %v1060_v62 = vrot.slane %v2829_v2, 4  ;;  %v1153_v31 = vor.u32 %v1152_v23, %v1149_v18  ;;  %v753_v34 = vshrl.u32 %v707_v19, 16  ;;  %v537_v39 = vld [vmem:[%s2728_s10 + $0x8] sm:$0xf] }
  0x46   : > { %1011 = vrot.lane.b32.xlu1 %v994_v14, %s2656_s15  ;;  %v2928_v36 = vor.u32 %v1162_v27, %v1159_v24  ;;  %v675_v37 = vrot.slane %v673_v28, 6  ;;  %v678_v40 = vrot.slane %v676_v29, 7  ;;  %v756_v42 = vshll.u32 %v707_v19, 16  ;;  %v538_v29 = vld [vmem:[%s2728_s10 + $0xc] sm:$0xf] }
  0x47   : > { %v1155_v43 = vrot.slane %v1153_v31, 4  ;;  %v1145_v45 = vrot.slane %v2844_v32, 4  ;;  %v755_v47 = vrot.slane %v753_v34, 7  ;;  %v671_v2 = vrot.slane %v2858_v59, 4 }
  0x48   : > { %v751_v49 = vrot.slane %v2855_v56, 4  ;;  %v829_v50 = vshrl.u32 %v786_v51, 16  ;;  %v912_v52 = vrot.slane %v910_v21, 4  ;;  %v1069_v54 = vsel %vm2812_vm12, %v1060_v62, %v1068_v9 }
  0x49   : > { %1009 = vrot.lane.b32.xlu0 %v984_v25, %s2656_s15  ;;  %v679_v3 = vor.u32 %v678_v40, %v675_v37  ;;  %v832_v32 = vshll.u32 %v786_v51, 16  ;;  %v916_v44 = vshll.u32 %v862_v35, 16  ;;  %v1164_v55 = vsel %vm2771_vm8, %v1155_v43, %v2928_v36  ;;  %v2596_v43 = vld [vmem:[%s3532_s2 + $0x38] sm:$0xff]  }
  0x4a   : > { %1096 = vrot.lane.b32.xlu1 %v1079_v30, %s2657_s16  ;;  %v758_v59 = vor.u32 %v756_v42, %v755_v47  ;;  %v831_v57 = vrot.slane %v829_v50, 7  ;;  %v913_v56 = vor.u32 %v912_v52, %v2888_v33  ;;  %v1154_v58 = vsel %vm2771_vm8, %v1145_v45, %v1153_v31  ;;  %v2971_v42 = vld [vmem:[%s2728_s10 + $0x20] sm:$0x1f]   ;;  %v1197_v50 = vld [vmem:[%s2728_s10 + $0x1c] sm:$0xf] }
  0x4b   : > { %v997_v60 = vshrl.u32 %v946_v41, 16  ;;  %v1000_v61 = vshll.u32 %v946_v41, 16  ;;  %v827_v4 = vrot.slane %v2878_v16, 4  ;;  %v918_v5 = vrot.slane %v916_v44, 5 }
  0x4c   : > { %v995_v7 = vrot.slane %v2903_v1, 4  ;;  %v1082_v8 = vshrl.u32 %v1031_v48, 16  ;;  %vm377_vm14 = vcmask 130048   ;;  %v834_v33 = vor.u32 %v832_v32, %v831_v57  ;;  %v1198_v32 = vld [vmem:[%s2728_s10 + $0x20] sm:$0xf] }
  0x4d   : > { %1094 = vrot.lane.b32.xlu0 %v1069_v54, %s2657_s16  ;;  %v914_v26 = vrot.slane %v913_v56, 4  ;;  %v1085_v9 = vshll.u32 %v1031_v48, 16  ;;  %v1167_v11 = vshrl.u32 %v1116_v53, 16  ;;  %v680_v13 = vsel %vm2771_vm8, %v671_v2, %v679_v3  ;;  %v1196_v56 = vld [vmem:[%s2728_s10 + $0x18] sm:$0x8] }
  0x4e   : > { %1181 = vrot.lane.b32.xlu1 %v1164_v55, %s2658_s17  ;;  %v759_v14 = vsel %vm2746_vm5, %v751_v49, %v758_v59  ;;  %v1084_v16 = vrot.slane %v1082_v8, 5  ;;  %v1170_v18 = vshll.u32 %v1116_v53, 16  ;;  %v999_v19 = vrot.slane %v997_v60, 5  ;;  %v2597_v59 = vld [vmem:[%s3532_s2 + $0x30] sm:$0xff]  }
  0x4f   : > { %v1002_v21 = vrot.slane %v1000_v61, 6  ;;  %v1087_v22 = vrot.slane %v1085_v9, 6  ;;  %v1169_v23 = vrot.slane %v1167_v11, 6  ;;  %v349_v25 = vshrl.u32 %v2594_v63, 16 }
  0x50   : > { %v1172_v24 = vrot.slane %v1170_v18, 7  ;;  %v351_v27 = vshll.u32 %v2594_v63, 16  ;;  %v356_v28 = vshll.u32 %v2948_v6, 16  ;;  %v835_v30 = vsel %vm2746_vm5, %v827_v4, %v834_v33  ;;  %v539_v63 = vld [vmem:[%s2728_s10 + $0x10] sm:$0xf] }
  0x51   : > { %1179 = vrot.lane.b32.xlu0 %v1154_v58, %s2658_s17  ;;  %v919_v62 = vsel %vm2799_vm11, %v914_v26, %v918_v5  ;;  %v1080_v31 = vrot.slane %v2914_v15, 4  ;;  %v1165_v34 = vrot.slane %v2928_v36, 4  ;;  %v1088_v51 = vor.u32 %v1087_v22, %v1084_v16  ;;  %v540_v26 = vld [vmem:[%s2728_s10 + $0x14] sm:$0xf] }
  0x52   : > { %768 = vrot.lane.b32.xlu1 %v759_v14, %s2653_s12  ;;  %v353_v35 = vrot.slane %v351_v27, 1  ;;  %v358_v37 = vrot.slane %v356_v28, 1  ;;  %v546_v40 = vshrl.u32 %v536_v12, 16  ;;  %v1003_v41 = vor.u32 %v1002_v21, %v999_v19  ;;  %v2598_v19 = vld [vmem:[%s3532_s2 + $0x28] sm:$0xff]  }
  0x53   : > { %v549_v45 = vshll.u32 %v536_v12, 16  ;;  %v555_v47 = vshrl.u32 %v537_v39, 16  ;;  %v558_v48 = vshll.u32 %v537_v39, 16  ;;  %v1173_v15 = vor.u32 %v1172_v24, %v1169_v23 }
  0x54   : > { %v354_v36 = vor.u32 %v353_v35, %v349_v25  ;;  %v548_v2 = vrot.slane %v546_v40, 5  ;;  %v565_v49 = vshrl.u32 %v538_v29, 16  ;;  %v568_v3 = vshll.u32 %v538_v29, 16  ;;  %v1200_v35 = vld [vmem:[%s2728_s10 + $0x28] sm:$0xf] }
  0x55   : > { %689 = vrot.lane.b32.xlu0 %v680_v13, %s2654_s13  ;;  %v551_v52 = vrot.slane %v549_v45, 6  ;;  %v557_v53 = vrot.slane %v555_v47, 5  ;;  %v560_v54 = vrot.slane %v558_v48, 6  ;;  %v1089_v44 = vsel %vm2812_vm12, %v1080_v31, %v1088_v51  ;;  %v2599_v45 = vld [vmem:[%s3532_s2 + $0x20] sm:$0xff]  }
  0x56   : > { %928 = vrot.lane.b32.xlu1 %v919_v62, %s2655_s14  ;;  %v359_v55 = vsel %vm347_vm13, %v354_v36, %v358_v37  ;;  %v567_v57 = vrot.slane %v565_v49, 5  ;;  %vm608_vm15 = vcmask 125952   ;;  %v570_v61 = vrot.slane %v568_v3, 6 }
  0x57   : > { %2504 = vmatmul.mubr.msk.bf16.vlgmr.msra.gmra.mxu0 %vm377_vm14, %v359_v55  ;;  %v552_v58 = vor.u32 %v551_v52, %v548_v2  ;;  %v561_v60 = vor.u32 %v560_v54, %v557_v53  ;;  %v1004_v4 = vsel %vm2812_vm12, %v995_v7, %v1003_v41  ;;  %v1174_v5 = vsel %vm2771_vm8, %v1165_v34, %v1173_v15  ;;  %v541_v2 = vld [vmem:[%s2728_s10 + $0x18] sm:$0x3] }
  0x58   : > { %1380 = vmatpush1.bf16.msra.mxu0 %v2596_v43  ;;  %v360_v8 = vshrl.u32 %v2948_v6, 16  ;;  %v364_v33 = vshll.u32 %v2971_v42, 16  ;;  %v571_v12 = vor.u32 %v570_v61, %v567_v57  ;;  %v1208_v1 = vshrl.u32 %v1197_v50, 16  ;;  %2507 = vmatprep.mubr.msk.bf16.mxu0 %vm2650_vm4, %v2649_v0 }
  0x59   : > { %844 = vrot.lane.b32.xlu0 %v835_v30, %s2652_s11  ;;  %v553_v9 = vrot.slane %v552_v58, 4  ;;  %1381 = vmatprep.subr.bf16.mxu0 %v2651_v10  ;;  %v563_v11 = vrot.slane %v561_v60, 4  ;;  %v1217_v13 = vshrl.u32 %v1198_v32, 16  ;;  %v1220_v14 = vshll.u32 %v1198_v32, 16  ;;  %v1199_v30 = vld [vmem:[%s2728_s10 + $0x24] sm:$0xf] }
  0x5a   : > { %1098 = vrot.lane.b32.xlu1 %v1089_v44, %s2657_s16  ;;  %v362_v7 = vor.u32 %v360_v8, %v358_v37  ;;  %v366_v46 = vrot.slane %v364_v33, 1  ;;  %v1210_v18 = vrot.slane %v1208_v1, 7  ;;  %v1203_v39 = vshrl.u32 %v1196_v56, 16  ;;  %v1201_v44 = vld [vmem:[%s2728_s10 + $0x2c] sm:$0xf] }
  0x5b   : > { %v562_v6 = vsel %vm2812_vm12, %v553_v9, %v561_v60  ;;  %v572_v16 = vsel %vm2812_vm12, %v563_v11, %v571_v12  ;;  %v1219_v22 = vrot.slane %v1217_v13, 7  ;;  %v1211_v23 = vshll.u32 %v1197_v50, 16  ;;  %v1532_v58 = vld [vmem:[%s2728_s10] sm:$0xe]  ;;  %v2600_v60 = vld [vmem:[%s3532_s2 + $0x18] sm:$0xff]  }
  0x5c   : > { %609 = vst.msk [vmem:[#allocation2] sm:$0xf] %vm608_vm15, %v562_v6  ;;  %1382 = vmatpush1.bf16.msra.mxu0 %v2597_v59  ;;  %610 = vst.msk [vmem:[#allocation2 + $0x8] sm:$0xf] %vm608_vm15, %v572_v16  ;;  %v367_v21 = vsel %vm347_vm13, %v362_v7, %v366_v46  ;;  %v575_v24 = vshrl.u32 %v539_v63, 16  ;;  %v1215_v25 = vrot.slane %v1210_v18, 4 }
  0x5d   : > { %1013 = vrot.lane.b32.xlu0 %v1004_v4, %s2656_s15  ;;  %1383 = vmatprep.subr.bf16.mxu0 %v2651_v10  ;;  %v2414_v27 = vrot.slane %v1203_v39, 11  ;;  %v578_v28 = vshll.u32 %v539_v63, 16  ;;  %v585_v29 = vshrl.u32 %v540_v26, 16  ;;  %v1222_v62 = vor.u32 %v1220_v14, %v1219_v22  ;;  %v1533_v8 = vld [vmem:[%s2728_s10 + $0x4] sm:$0xf]  ;;  %v2602_v39 = vld [vmem:[%s3532_s2 + $0x10] sm:$0xff]  }
  0x5e   : > { %v1213_v31 = vor.u32 %v1211_v23, %v1210_v18  ;;  %v577_v34 = vrot.slane %v575_v24, 5  ;;  %v588_v51 = vshll.u32 %v540_v26, 16  ;;  %v573_v41 = vrot.slane %v571_v12, 4  ;;  %v1534_v12 = vld [vmem:[%s2728_s10 + $0x8] sm:$0xf] }
  0x5f   : > { %2508 = vmatmul.mubr.msk.bf16.gmra.mxu0 %vm377_vm14, %v367_v21  ;;  %v580_v37 = vrot.slane %v578_v28, 6  ;;  %v587_v40 = vrot.slane %v585_v29, 5  ;;  %v368_v43 = vshrl.u32 %v2971_v42, 16  ;;  %v1223_v47 = vsel %vm2746_vm5, %v1215_v25, %v1222_v62  ;;  %v1616_v24 = vld [vmem:[%s2728_s10] sm:$0x8] }
  0x60   : > { %1384 = vmatpush1.bf16.msra.mxu0 %v2598_v19  ;;  %v1214_v48 = vsel %vm2746_vm5, %v2414_v27, %v1213_v31  ;;  %v590_v15 = vrot.slane %v588_v51, 6  ;;  %v1226_v36 = vshrl.u32 %v1199_v30, 16  ;;  %1257 = vst.msk [vmem:[#allocation2 + $0xc] sm:$0xf] %vm608_vm15, %v1223_v47  ;;  %2511 = vmatprep.mubr.msk.bf16.mxu0 %vm2650_vm4, %v2649_v0  ;;  %v1235_v50 = vshrl.u32 %v1200_v35, 16 }
  0x61   : > { %1183 = vrot.lane.b32.xlu0 %v1174_v5, %s2658_s17  ;;  %1385 = vmatprep.subr.bf16.mxu0 %v2651_v10  ;;  %1256 = vst.msk [vmem:[#allocation2 + $0x4] sm:$0xf] %vm608_vm15, %v1214_v48  ;;  %v581_v42 = vor.u32 %v580_v37, %v577_v34  ;;  %v370_v49 = vor.u32 %v368_v43, %v366_v46  ;;  %v1238_v52 = vshll.u32 %v1200_v35, 16  ;;  %v1224_v3 = vrot.slane %v1219_v22, 4  ;;  %v3063_v35 = vld [vmem:[%s2728_s10 + $0x8] sm:$0xf] }
  0x62   : > { %v591_v53 = vor.u32 %v590_v15, %v587_v40  ;;  %v1228_v54 = vrot.slane %v1226_v36, 7  ;;  %v1229_v32 = vshll.u32 %v1199_v30, 16  ;;  %v1237_v57 = vrot.slane %v1235_v50, 7  ;;  %v1617_v30 = vld [vmem:[%s2728_s10 + $0x4] sm:$0xf]  ;;  %v2603_v43 = vld [vmem:[%s3532_s2 + $0x8] sm:$0xff]  }
  0x63   : > { %v583_v55 = vrot.slane %v581_v42, 4  ;;  %v582_v59 = vsel %vm2812_vm12, %v573_v41, %v581_v42  ;;  %v595_v56 = vshrl.u32 %v541_v2, 16  ;;  %v598_v5 = vshll.u32 %v541_v2, 16  ;;  %v1668_v41 = vld [vmem:[%s2728_s10 + $0x10] sm:$0xf] }
  0x64   : > { %1386 = vmatpush1.bf16.msra.mxu0 %v2599_v45  ;;  %611 = vst.msk [vmem:[#allocation2 + $0x10] sm:$0xf] %vm608_vm15, %v582_v59  ;;  %v1233_v61 = vrot.slane %v1228_v54, 4  ;;  %v1231_v63 = vor.u32 %v1229_v32, %v1228_v54  ;;  %v593_v4 = vrot.slane %v591_v53, 4  ;;  %v1240_v26 = vor.u32 %v1238_v52, %v1237_v57  ;;  %v1715_v36 = vld [vmem:[%s2728_s10 + $0x10] sm:$0xf] }
  0x65   : > { %1387 = vmatprep.subr.bf16.mxu0 %v2651_v10  ;;  %v592_v33 = vsel %vm2812_vm12, %v583_v55, %v591_v53  ;;  %v597_v9 = vrot.slane %v595_v56, 5  ;;  %v1242_v11 = vrot.slane %v1237_v57, 4  ;;  %v600_v7 = vrot.slane %v598_v5, 6  ;;  %v1667_v50 = vld [vmem:[%s2728_s10 + $0xc] sm:$0x8] }
  0x66   : > { %612 = vst.msk [vmem:[#allocation2 + $0x18] sm:$0xf] %vm608_vm15, %v592_v33  ;;  %v1232_v1 = vsel %vm2746_vm5, %v1224_v3, %v1231_v63  ;;  %v1244_v46 = vshrl.u32 %v1201_v44, 16  ;;  %v1247_v13 = vshll.u32 %v1201_v44, 16  ;;  %v1241_v14 = vsel %vm2746_vm5, %v1233_v61, %v1240_v26  ;;  %v1716_v32 = vld [vmem:[%s2728_s10 + $0x14] sm:$0xf] }
  0x67   : > { %2512 = vmatmul.mubr.msk.bf16.gmra.mxu0 %vm377_vm14, %v370_v49  ;;  %1258 = vst.msk [vmem:[#allocation2 + $0x14] sm:$0xf] %vm608_vm15, %v1232_v1  ;;  %v1539_v6 = vshrl.u32 %v1532_v58, 16  ;;  %v1542_v16 = vshll.u32 %v1532_v58, 16  ;;  %v1548_v18 = vshrl.u32 %v1533_v8, 16  ;;  %v601_v19 = vor.u32 %v600_v7, %v597_v9  ;;  %v2604_v58 = vld [vmem:[%s3532_s2] sm:$0xff]  }
  0x68   : > { %1388 = vmatpush1.bf16.msra.mxu0 %v2600_v60  ;;  %1259 = vst.msk [vmem:[#allocation2 + $0x1c] sm:$0xf] %vm608_vm15, %v1241_v14  ;;  %v1246_v21 = vrot.slane %v1244_v46, 7  ;;  %v1551_v22 = vshll.u32 %v1533_v8, 16  ;;  %v1558_v23 = vshrl.u32 %v1534_v12, 16  ;;  %v1561_v29 = vshll.u32 %v1534_v12, 16 }
  0x69   : > { %1389 = vmatprep.subr.bf16.mxu0 %v2651_v10  ;;  %v1541_v25 = vrot.slane %v1539_v6, 5  ;;  %v1544_v27 = vrot.slane %v1542_v16, 6  ;;  %v1550_v28 = vrot.slane %v1548_v18, 5  ;;  %v602_v62 = vsel %vm2812_vm12, %v593_v4, %v601_v19  ;;  %v3087_v55 = vld [vmem:[%s2728_s10 + $0x14] sm:$0xf]  ;;  %v2605_v14 = vld [vmem:[%s3532_s2 + $0x40] sm:$0xff]  }
  0x6a   : > { %v1249_v31 = vor.u32 %v1247_v13, %v1246_v21  ;;  %v1553_v34 = vrot.slane %v1551_v22, 6  ;;  %v1560_v51 = vrot.slane %v1558_v23, 5  ;;  %613 = vst.msk [vmem:[#allocation2 + $0x20] sm:$0xf] %vm608_vm15, %v602_v62  ;;  %v1563_v40 = vrot.slane %v1561_v29, 6 }
  0x6b   : > { %v1545_v37 = vor.u32 %v1544_v27, %v1541_v25  ;;  %vm1628_vm0 = vcmask 1040384   ;;  %vm1629_vm1 = vcmask 1044484   ;;  %v2441_v48 = vrot.slane %v1616_v24, 11  ;;  %v3090_v56 = vld [vmem:[%s2728_s10 + $0x18] sm:$0xf] }
  0x6c   : > { %1390 = vmatpush1.bf16.msra.mxu0 %v2602_v39  ;;  %v1250_v45 = vsel %vm2746_vm5, %v1242_v11, %v1249_v31  ;;  %v1554_v47 = vor.u32 %v1553_v34, %v1550_v28  ;;  %v1633_v15 = vrot.slane %v1617_v30, 7  ;;  %v3075_v42 = vor.u32 %v1563_v40, %v1560_v51  ;;  %vm3077_vm2 = vmor %vm1628_vm0, %vm1629_vm1  ;;  %v1796_v26 = vld [vmem:[%s2728_s10 + $0x14] sm:$0xf]  ;;  %v1795_v16 = vld [vmem:[%s2728_s10 + $0x10] sm:$0xc] }
  0x6d   : > { %1391 = vmatprep.subr.bf16.mxu0 %v2651_v10  ;;  %1260 = vst.msk [vmem:[#allocation2 + $0x24] sm:$0xf] %vm608_vm15, %v1250_v45  ;;  %v1546_v2 = vrot.slane %v1545_v37, 4  ;;  %v1636_v54 = vrot.slane %v3063_v35, 7  ;;  %v1681_v3 = vrot.slane %v1668_v41, 7  ;;  %v1722_v59 = vshrl.u32 %v1715_v36, 16 }
  0x6e   : > { %v1556_v52 = vrot.slane %v1554_v47, 4  ;;  %v1635_v53 = vrot.slane %v1633_v15, 4  ;;  %v1725_v57 = vshll.u32 %v1715_v36, 16  ;;  %v1634_v61 = vsel %vm3077_vm2, %v2441_v48, %v1633_v15  ;;  %v3118_v39 = vld [vmem:[%s2728_s10 + $0x18] sm:$0xf] }
  0x6f   : > { %v1555_v44 = vsel %vm2812_vm12, %v1546_v2, %v1554_v47  ;;  %v2442_v63 = vrot.slane %v1667_v50, 11  ;;  %v1724_v4 = vrot.slane %v1722_v59, 4  ;;  %v1731_v8 = vshll.u32 %v1716_v32, 16  ;;  %v1847_v22 = vld [vmem:[%s2728_s10 + $0x20] sm:$0xf] }
  0x70   : > { %1392 = vmatpush1.bf16.msra.mxu0 %v2603_v43  ;;  %1596 = vrot.lane.b32.xlu1 %v1555_v44, %s2654_s13  ;;  %v1565_v60 = vsel %vm2812_vm12, %v1556_v52, %v3075_v42  ;;  %v1727_v5 = vrot.slane %v1725_v57, 5  ;;  %v1735_v33 = vshrl.u32 %v1716_v32, 16  ;;  %v1637_v9 = vsel %vm3077_vm2, %v1635_v53, %v1636_v54  ;;  %v1895_v25 = vld [vmem:[%s2728_s10 + $0x20] sm:$0xf]  ;;  %v1896_v27 = vld [vmem:[%s2728_s10 + $0x24] sm:$0xf] }
  0x71   : > { %1393 = vmatprep.subr.bf16.mxu0 %v2651_v10  ;;  %1598 = vrot.lane.b32.xlu0 %v1565_v60, %s2654_s13  ;;  %v1683_v11 = vrot.slane %v1681_v3, 4  ;;  %v1684_v12 = vrot.slane %v3087_v55, 7  ;;  %v1741_v1 = vshll.u32 %v3090_v56, 16  ;;  %v1733_v46 = vrot.slane %v1731_v8, 5  ;;  %v1535_v30 = vld [vmem:[%s2728_s10 + $0xc] sm:$0xf] }
  0x72   : > { %v1728_v7 = vor.u32 %v1727_v5, %v1724_v4  ;;  %v1737_v13 = vrot.slane %v1735_v33, 4  ;;  %v1682_v6 = vsel %vm3077_vm2, %v2442_v63, %v1681_v3  ;;  %v1812_v18 = vrot.slane %v1796_v26, 6  ;;  %v1846_v51 = vld [vmem:[%s2728_s10 + $0x1c] sm:$0xc]  ;;  %v3143_v41 = vld [vmem:[%s2728_s10 + $0x24] sm:$0xf] }
  0x73   : > { %vm1807_vm3 = vcmask 1041408   ;;  %vm1808_vm6 = vcmask 1045508   ;;  %v1685_v23 = vsel %vm3077_vm2, %v1683_v11, %v1684_v12  ;;  %v3127_v24 = vrot.slane %v1741_v1, 5  ;;  %v1894_v43 = vld [vmem:[%s2728_s10 + $0x1c] sm:$0x8] }
  0x74   : > { %1394 = vmatpush1.bf16.msra.mxu0 %v2604_v58  ;;  %1647 = vrot.lane.b32.xlu1 %v1634_v61, %s2653_s12  ;;  %v1729_v19 = vrot.slane %v1728_v7, 4  ;;  %v1738_v21 = vor.u32 %v1737_v13, %v1733_v46  ;;  %v2443_v29 = vrot.slane %v1795_v16, 10  ;;  %vm3133_vm7 = vmor %vm1807_vm3, %vm1808_vm6  ;;  %v1814_v31 = vrot.slane %v1812_v18, 4  ;;  %v1536_v52 = vld [vmem:[%s2728_s10 + $0x10] sm:$0xf] }
  0x75   : > { %1409 = vmatprep.subr.bf16.mxu0 %v2651_v10  ;;  %1649 = vrot.lane.b32.xlu0 %v1637_v9, %s2653_s12  ;;  %v1815_v34 = vrot.slane %v3118_v39, 6  ;;  %v1860_v37 = vrot.slane %v1847_v22, 6  ;;  %v1906_v45 = vshrl.u32 %v1895_v25, 16  ;;  %v1915_v47 = vshrl.u32 %v1896_v27, 16  ;;  %v1798_v55 = vld [vmem:[%s2728_s10 + $0x1c] sm:$0xf] }
  0x76   : > { %v1739_v28 = vrot.slane %v1738_v21, 4  ;;  %v1734_v40 = vsel %vm2799_vm11, %v1729_v19, %v1733_v46  ;;  %v1568_v15 = vshrl.u32 %v1535_v30, 16  ;;  %v1571_v36 = vshll.u32 %v1535_v30, 16 }
  0x77   : > { %v1813_v2 = vsel %vm3133_vm7, %v2443_v29, %v1812_v18  ;;  %v2444_v50 = vrot.slane %v1846_v51, 10  ;;  %v1816_v53 = vsel %vm3133_vm7, %v1814_v31, %v1815_v34  ;;  %v1862_v3 = vrot.slane %v1860_v37, 4  ;;  %v1670_v29 = vld [vmem:[%s2728_s10 + $0x18] sm:$0xf] }
  0x78   : > { %1410 = vmatpush2.bf16.msra.mxu0 %v2605_v14  ;;  %1695 = vrot.lane.b32.xlu1 %v1682_v6, %s2652_s11  ;;  %v1744_v48 = vsel %vm2799_vm11, %v1739_v28, %v3127_v24  ;;  %v1863_v32 = vrot.slane %v3143_v41, 6  ;;  %v1901_v44 = vshrl.u32 %v1894_v43, 16  ;;  %v1908_v59 = vrot.slane %v1906_v45, 7  ;;  %v1619_v14 = vld [vmem:[%s2728_s10 + $0xc] sm:$0xf] }
  0x79   : > { %1697 = vrot.lane.b32.xlu0 %v1685_v23, %s2652_s11  ;;  %2543 = vmatprep.subr.bf16.mxu0 %v2649_v0  ;;  %v1909_v57 = vshll.u32 %v1895_v25, 16  ;;  %v3160_v58 = vrot.slane %v1915_v47, 7  ;;  %v1918_v60 = vshll.u32 %v1896_v27, 16  ;;  %v1570_v61 = vrot.slane %v1568_v15, 5  ;;  %v1718_v6 = vld [vmem:[%s2728_s10 + $0x1c] sm:$0xf] }
  0x7a   : > { %v1573_v63 = vrot.slane %v1571_v36, 6  ;;  %v1578_v4 = vshrl.u32 %v1536_v52, 16  ;;  %v1581_v5 = vshll.u32 %v1536_v52, 16  ;;  %v1861_v8 = vsel %vm3133_vm7, %v2444_v50, %v1860_v37  ;;  %v3184_v27 = vld [vmem:[%s2728_s10 + $0x10] sm:$0xf] }
  0x7b   : > { %v2445_v33 = vrot.slane %v1901_v44, 11  ;;  %v1911_v26 = vor.u32 %v1909_v57, %v1908_v59  ;;  %v1913_v9 = vrot.slane %v1908_v59, 4  ;;  %v1920_v11 = vor.u32 %v1918_v60, %v3160_v58  ;;  %v3201_v15 = vld [vmem:[%s2728_s10 + $0x20] sm:$0xf] }
  0x7c   : > { %1775 = vrot.lane.b32.xlu1 %v1734_v40, %s2655_s14  ;;  %v1864_v1 = vsel %vm3133_vm7, %v1862_v3, %v1863_v32  ;;  %v1574_v7 = vor.u32 %v1573_v63, %v1570_v61  ;;  %v1580_v46 = vrot.slane %v1578_v4, 5  ;;  %v1583_v13 = vrot.slane %v1581_v5, 6  ;;  %v3225_v61 = vld [vmem:[%s2728_s10 + $0x20] sm:$0xf] }
  0x7d   : > { %1777 = vrot.lane.b32.xlu0 %v1744_v48, %s2655_s14  ;;  %v1745_v16 = vshrl.u32 %v3090_v56, 16  ;;  %v1912_v18 = vsel %vm2746_vm5, %v2445_v33, %v1911_v26  ;;  %v1921_v19 = vsel %vm2746_vm5, %v1913_v9, %v1920_v11  ;;  %v1566_v21 = vrot.slane %v3075_v42, 4  ;;  %v3198_v48 = vld [vmem:[%s2728_s10 + $0x1c] sm:$0xf]  ;;  %v1897_v9 = vld [vmem:[%s2728_s10 + $0x28] sm:$0xf] }
  0x7e   : > { %v1639_v22 = vrot.slane %v1619_v14, 7  ;;  %v1576_v23 = vrot.slane %v1574_v7, 4  ;;  %v3181_v25 = vor.u32 %v1583_v13, %v1580_v46  ;;  %v1751_v56 = vshll.u32 %v1718_v6, 16  ;;  %v1849_v11 = vld [vmem:[%s2728_s10 + $0x28] sm:$0xf] }
  0x7f   : > { %v1755_v28 = vshrl.u32 %v1718_v6, 16  ;;  %v1638_v30 = vrot.slane %v1636_v54, 4  ;;  %v1575_v42 = vsel %vm2812_vm12, %v1566_v21, %v1574_v7  ;;  %v1642_v37 = vrot.slane %v3184_v27, 7  ;;  %v3247_v14 = vld [vmem:[%s2728_s10 + $0x2c] sm:$0xf] }
  0x80   : > { %1826 = vrot.lane.b32.xlu1 %v1813_v2, %s2656_s15  ;;  %v1641_v51 = vrot.slane %v1639_v22, 4  ;;  %v1747_v40 = vrot.slane %v1745_v16, 4  ;;  %v1585_v45 = vsel %vm2812_vm12, %v1576_v23, %v3181_v25  ;;  %v1687_v47 = vrot.slane %v1670_v29, 7  ;;  %v1537_v21 = vld [vmem:[%s2728_s10 + $0x14] sm:$0x3] }
  0x81   : > { %1828 = vrot.lane.b32.xlu0 %v1816_v53, %s2656_s15  ;;  %v1753_v35 = vrot.slane %v1751_v56, 5  ;;  %v1757_v54 = vrot.slane %v1755_v28, 4  ;;  %vm696_vm8 = vcmask 257152   ;;  %vm775_vm9 = vcmask 388352  }
  0x82   : > { %vm851_vm10 = vcmask 519552   ;;  %v1640_v36 = vsel %vm3077_vm2, %v1638_v30, %v1639_v22  ;;  %v1686_v2 = vrot.slane %v1684_v12, 4  ;;  %v1690_v50 = vrot.slane %v3198_v48, 7  ;;  %v1523_v48 = vld [vmem:[%s2728_s10 + $0x4] sm:$0xf] }
  0x83   : > { %v1748_v52 = vor.u32 %v1747_v40, %v3127_v24  ;;  %v1643_v44 = vsel %vm3077_vm2, %v1641_v51, %v1642_v37  ;;  %v1689_v59 = vrot.slane %v1687_v47, 4  ;;  %v1758_v57 = vor.u32 %v1757_v54, %v1753_v35 }
  0x84   : > { %1874 = vrot.lane.b32.xlu1 %v1861_v8, %s2657_s16  ;;  %v1761_v60 = vshll.u32 %v3201_v15, 16  ;;  %v1688_v12 = vsel %vm3077_vm2, %v1686_v2, %v1687_v47  ;;  %v1818_v26 = vrot.slane %v1798_v55, 6  ;;  %v1817_v7 = vrot.slane %v1815_v34, 4  ;;  %v2606_v55 = vld [vmem:[%s3535_s5] sm:$0xff]  }
  0x85   : > { %1876 = vrot.lane.b32.xlu0 %v1864_v1, %s2657_s16  ;;  %v1749_v24 = vrot.slane %v1748_v52, 4  ;;  %v1691_v5 = vsel %vm3077_vm2, %v1689_v59, %v1690_v50  ;;  %v1759_v8 = vrot.slane %v1758_v57, 4  ;;  %v1898_v1 = vld [vmem:[%s2728_s10 + $0x2c] sm:$0xf]  ;;  %vm935_vm13 = vcmask 650752   ;;  %2516 = vmatpush3.bf16.msra.mxu1 %v2606_v55 }
  0x86   : > { %v3231_v33 = vrot.slane %v1761_v60, 5  ;;  %v1821_v13 = vrot.slane %v3225_v61, 6  ;;  %v1924_v6 = vshrl.u32 %v1897_v9, 16  ;;  %v1820_v39 = vrot.slane %v1818_v26, 4  ;;  %v1621_v59 = vld [vmem:[%s2728_s10 + $0x14] sm:$0x7]  ;;  %2529 = vmatprep.subr.bf16.mxu1 %v2649_v0 }
  0x87   : > { %v1754_v46 = vsel %vm2799_vm11, %v1749_v24, %v1753_v35  ;;  %v1866_v34 = vrot.slane %v1849_v11, 6  ;;  %vm1020_vm0 = vcmask 781952   ;;  %v1765_v23 = vshrl.u32 %v3201_v15, 16  ;;  %v1720_v57 = vld [vmem:[%s2728_s10 + $0x24] sm:$0x1] }
  0x88   : > { %1949 = vrot.lane.b32.xlu1 %v1912_v18, %s2658_s17  ;;  %v1764_v18 = vsel %vm2799_vm11, %v1759_v8, %v3231_v33  ;;  %v1819_v56 = vsel %vm3133_vm7, %v1817_v7, %v1818_v26  ;;  %v1865_v28 = vrot.slane %v1863_v32, 4  ;;  %v1869_v29 = vrot.slane %v3247_v14, 6  ;;  %v1672_v26 = vld [vmem:[%s2728_s10 + $0x20] sm:$0x7] }
  0x89   : > { %1951 = vrot.lane.b32.xlu0 %v1921_v19, %s2658_s17  ;;  %v1933_v19 = vshrl.u32 %v1898_v1, 16  ;;  %v1926_v30 = vrot.slane %v1924_v6, 7  ;;  %v1591_v51 = vshll.u32 %v1537_v21, 16  ;;  %v1936_v41 = vshll.u32 %v1898_v1, 16  ;;  %v1899_v1 = vld [vmem:[%s2728_s10 + $0x30] sm:$0xf] }
  0x8a   : > { %v837_v31 = vpop.permute.xlu0 %836  ;;  %vm1105_vm1 = vcmask 913152   ;;  %v1922_v35 = vrot.slane %v3160_v58, 4  ;;  %v1867_v54 = vsel %vm3133_vm7, %v1865_v28, %v1866_v34  ;;  %v1767_v58 = vrot.slane %v1765_v23, 4 }
  0x8b   : > { %v761_v43 = vpop.permute.xlu1 %760  ;;  %v3267_v47 = vrot.slane %v1933_v19, 7  ;;  %v1593_v2 = vrot.slane %v1591_v51, 6  ;;  %vm1190_vm3 = vcmask 1044352   ;;  %v1586_v24 = vrot.slane %v3181_v25, 4  ;;  %v1851_v19 = vld [vmem:[%s2728_s10 + $0x30] sm:$0x3] }
  0x8c   : > { %1600 = vrot.lane.b32.xlu1 %v1575_v42, %s2654_s13  ;;  %v1588_v42 = vshrl.u32 %v1537_v21, 16  ;;  %v1645_v8 = vrot.slane %v1621_v59, 7  ;;  %v1771_v11 = vshll.u32 %v1720_v57, 16  ;;  %v1692_v27 = vrot.slane %v1690_v50, 4  ;;  %v1524_v57 = vld [vmem:[%s2728_s10 + $0x8] sm:$0xf] }
  0x8d   : > { %1602 = vrot.lane.b32.xlu0 %v1585_v45, %s2654_s13  ;;  %v1868_v45 = vrot.slane %v1866_v34, 4  ;;  %v1823_v38 = vrot.slane %v1821_v13, 4  ;;  %v1945_v23 = vshll.u32 %v1899_v1, 16  ;;  %v1940_v49 = vrot.slane %v3267_v47, 4 }
  0x8f   : > { %v763_v53 = vpop.permute.xlu1 %762  ;;  %v682_v3 = vpop.permute.xlu0 %681 }
  0x90   : > { %697 = vst.msk [vmem:[#allocation2] sm:$0xf] %vm696_vm8, %v682_v3  ;;  %1651 = vrot.lane.b32.xlu1 %v1640_v36, %s2653_s12  ;;  %v1590_v36 = vrot.slane %v1588_v42, 5  ;;  %v1931_v3 = vrot.slane %v1926_v30, 4  ;;  %v1522_v42 = vld [vmem:[%s2728_s10] sm:$0xf] }
  0x91   : > { %776 = vst.msk [vmem:[#allocation2] sm:$0xf] %vm775_vm9, %v761_v43  ;;  %1653 = vrot.lane.b32.xlu0 %v1643_v44, %s2653_s12  ;;  %v1822_v43 = vsel %vm3133_vm7, %v1820_v39, %v1821_v13  ;;  %v1938_v44 = vor.u32 %v1936_v41, %v3267_v47  ;;  %v1800_v39 = vld [vmem:[%s2728_s10 + $0x24] sm:$0x3] }
  0x92   : > { %852 = vst.msk [vmem:[#allocation2] sm:$0xf] %vm851_vm10, %v837_v31  ;;  %v1927_v31 = vshll.u32 %v1897_v9, 16  ;;  %v1768_v9 = vor.u32 %v1767_v58, %v3231_v33  ;;  %v1942_v33 = vshrl.u32 %v1899_v1, 16  ;;  %v1824_v21 = vrot.slane %v1800_v39, 6 }
  0x93   : > { %v839_v63 = vpop.permute.xlu1 %838  ;;  %v684_v4 = vpop.permute.xlu0 %683 }
  0x94   : > { %698 = vst.msk [vmem:[#allocation2 + $0x8] sm:$0xf] %vm696_vm8, %v684_v4  ;;  %1699 = vrot.lane.b32.xlu1 %v1688_v12, %s2652_s11  ;;  %v1929_v15 = vor.u32 %v1927_v31, %v1926_v30  ;;  %v1644_v4 = vrot.slane %v1642_v37, 4  ;;  %v1693_v37 = vrot.slane %v1672_v26, 7  ;;  %v1871_v30 = vrot.slane %v1869_v29, 4 }
  0x95   : > { %777 = vst.msk [vmem:[#allocation2 + $0x8] sm:$0xf] %vm775_vm9, %v763_v53  ;;  %1701 = vrot.lane.b32.xlu0 %v1691_v5, %s2652_s11  ;;  %v1870_v53 = vsel %vm3133_vm7, %v1868_v45, %v1869_v29  ;;  %v1939_v5 = vsel %vm2746_vm5, %v1931_v3, %v1938_v44  ;;  %v1872_v31 = vrot.slane %v1851_v19, 6  ;;  %v1825_v17 = vsel %vm3133_vm7, %v1823_v38, %v1824_v21  ;;  %v1525_v3 = vld [vmem:[%s2728_s10 + $0xc] sm:$0xf] }
  0x96   : > { %853 = vst.msk [vmem:[#allocation2 + $0x8] sm:$0xf] %vm851_vm10, %v839_v63  ;;  %v1930_v12 = vsel %vm2746_vm5, %v1922_v35, %v1929_v15  ;;  %v1594_v63 = vor.u32 %v1593_v2, %v1590_v36  ;;  %v1646_v6 = vsel %vm3077_vm2, %v1644_v4, %v1645_v8  ;;  %v1694_v50 = vsel %vm3077_vm2, %v1692_v27, %v1693_v37  ;;  %v1526_v8 = vld [vmem:[%s2728_s10 + $0x10] sm:$0xf]  ;;  %v1970_v19 = vld [vmem:[%s2728_s10 + $0x24] sm:$0xf] }
  0x97   : > { %v923_v16 = vpop.permute.xlu1 %922  ;;  %v1971_v21 = vld [vmem:[%s2728_s10 + $0x28] sm:$0xf] }
  0x98   : > { %937 = vst.msk [vmem:[#allocation2 + $0x8] sm:$0xf] %vm935_vm13, %v923_v16  ;;  %v921_v22 = vpop.permute.xlu0 %920  ;;  %1779 = vrot.lane.b32.xlu1 %v1754_v46, %s2655_s14  ;;  %v1595_v25 = vsel %vm2812_vm12, %v1586_v24, %v1594_v63  ;;  %v1769_v16 = vrot.slane %v1768_v9, 4 }
  0x99   : > { %936 = vst.msk [vmem:[#allocation2] sm:$0xf] %vm935_vm13, %v921_v22  ;;  %1781 = vrot.lane.b32.xlu0 %v1764_v18, %s2655_s14  ;;  %v1773_v18 = vrot.slane %v1771_v11, 5  ;;  %v1944_v22 = vrot.slane %v1942_v33, 7 }
  0x9b   : > { %v1008_v40 = vpop.permute.xlu1 %1007  ;;  %v1774_v28 = vsel %vm2799_vm11, %v1769_v16, %v1773_v18  ;;  %v1947_v14 = vor.u32 %v1945_v23, %v1944_v22  ;;  %vm1982_vm11 = vcmask 1046532  }
  0x9c   : > { %1022 = vst.msk [vmem:[#allocation2 + $0x8] sm:$0xf] %vm1020_vm0, %v1008_v40  ;;  %1830 = vrot.lane.b32.xlu1 %v1819_v56, %s2656_s15  ;;  %v1873_v40 = vsel %vm3133_vm7, %v1871_v30, %v1872_v31  ;;  %v1989_v30 = vrot.slane %v1971_v21, 5  ;;  %v1974_v21 = vld [vmem:[%s2728_s10 + $0x34] sm:$0x1] }
  0x9d   : > { %v1006_v32 = vpop.permute.xlu0 %1005  ;;  %1832 = vrot.lane.b32.xlu0 %v1822_v43, %s2656_s15  ;;  %v1948_v47 = vsel %vm2746_vm5, %v1940_v49, %v1947_v14  ;;  %vm1981_vm5 = vcmask 1042432  }
  0x9e   : > { %1021 = vst.msk [vmem:[#allocation2] sm:$0xf] %vm1020_vm0, %v1006_v32  ;;  %vm3387_vm12 = vmor %vm1981_vm5, %vm1982_vm11 }
  0x9f   : > { %v1093_v52 = vpop.permute.xlu1 %1092 }
  0xa0   : > { %1107 = vst.msk [vmem:[#allocation2 + $0x8] sm:$0xf] %vm1105_vm1, %v1093_v52  ;;  %1878 = vrot.lane.b32.xlu1 %v1867_v54, %s2657_s16 }
  0xa1   : > { %v1091_v60 = vpop.permute.xlu0 %1090  ;;  %1880 = vrot.lane.b32.xlu0 %v1870_v53, %s2657_s16 }
  0xa2   : > { %1106 = vst.msk [vmem:[#allocation2] sm:$0xf] %vm1105_vm1, %v1091_v60 }
  0xa3   : > { %v1178_v7 = vpop.permute.xlu1 %1177 }
  0xa4   : > { %1192 = vst.msk [vmem:[#allocation2 + $0x8] sm:$0xf] %vm1190_vm3, %v1178_v7  ;;  %1953 = vrot.lane.b32.xlu1 %v1930_v12, %s2658_s17 }
  0xa5   : > { %1955 = vrot.lane.b32.xlu0 %v1939_v5, %s2658_s17 }
  0xa7   : > { %v1176_v46 = vpop.permute.xlu0 %1175 }
  0xa8   : > { %1191 = vst.msk [vmem:[#allocation2] sm:$0xf] %vm1190_vm3, %v1176_v46  ;;  %v688_v34 = vpop.permute.xlu1 %687  ;;  %1604 = vrot.lane.b32.xlu1 %v1595_v25, %s2654_s13 }
  0xa9   : > { %700 = vst.msk [vmem:[#allocation2 + $0x18] sm:$0xf] %vm696_vm8, %v688_v34  ;;  %1655 = vrot.lane.b32.xlu0 %v1646_v6, %s2653_s12 }
  0xab   : > { %v686_v56 = vpop.permute.xlu0 %685  ;;  %v1262_v61 = vld [vmem:[#allocation2 + $0x8] sm:$0xff] }
  0xac   : > { %699 = vst.msk [vmem:[#allocation2 + $0x10] sm:$0xf] %vm696_vm8, %v686_v56  ;;  %v767_v13 = vpop.permute.xlu1 %766  ;;  %1703 = vrot.lane.b32.xlu1 %v1694_v50, %s2652_s11  ;;  %v1969_v50 = vld [vmem:[%s2728_s10 + $0x20] sm:$0xe] }
  0xad   : > { %1528 = vst.msk [vmem:[#allocation2 + $0x8] sm:$0xf] %vm608_vm15, %v1523_v48  ;;  %1783 = vrot.lane.b32.xlu0 %v1774_v28, %s2655_s14  ;;  %v1986_v48 = vrot.slane %v1970_v19, 5  ;;  %v2446_v22 = vrot.slane %v1969_v50, 9 }
  0xae   : > { %779 = vst.msk [vmem:[#allocation2 + $0x18] sm:$0xf] %vm775_vm9, %v767_v13 }
  0xaf   : > { %v1261_v29 = vld [vmem:[#allocation2] sm:$0xff]  ;;  %v765_v51 = vpop.permute.xlu0 %764  ;;  %v1988_v23 = vrot.slane %v1986_v48, 4 }
  0xb0   : > { %1527 = vst.msk [vmem:[#allocation2] sm:$0xf] %vm608_vm15, %v1522_v42  ;;  %v2418_v43 = vcombine.high %v1261_v29, %v1262_v61  ;;  %v843_v45 = vpop.permute.xlu1 %842  ;;  %v2417_v41 = vcombine.low %v1261_v29, %v1262_v61  ;;  %1834 = vrot.lane.b32.xlu1 %v1825_v17, %s2656_s15  ;;  %v1987_v61 = vsel %vm3387_vm12, %v2446_v22, %v1986_v48 }
  0xb1   : > { %778 = vst.msk [vmem:[#allocation2 + $0x10] sm:$0xf] %vm775_vm9, %v765_v51  ;;  %1882 = vrot.lane.b32.xlu0 %v1873_v40, %s2657_s16  ;;  %v1990_v13 = vsel %vm3387_vm12, %v1988_v23, %v1989_v30  ;;  %v2399_v51 = vld [vmem:[%s3534_s4] ss:$0 sm:$0xff]  ;;  %v1998_v23 = vrot.slane %v1974_v21, 5 }
  0xb2   : > { %855 = vst.msk [vmem:[#allocation2 + $0x18] sm:$0xf] %vm851_vm10, %v843_v45  ;;  %2432 = vmatprep.mubr.msk.bf16.mxu0 %vm377_vm14, %v2418_v43  ;;  %v2411_v21 = vld [vmem:[%s305_s9] ss:$0 sm:$0xff] }
  0xb3   : > { %v841_v62 = vpop.permute.xlu0 %840  ;;  %1412 = vmatmul.mubr.bf16.vlgmr.msra.gmra.mxu0 %v2417_v41  ;;  %2005 = vst.msk [vmem:[#allocation2 + $0x4] sm:$0xf] %vm608_vm15, %v1987_v61  ;;  %2006 = vst.msk [vmem:[#allocation2 + $0xc] sm:$0xf] %vm608_vm15, %v1990_v13  ;;  %v2416_v61 = vld [vmem:[%s3534_s4 + $0x1] ss:$0 sm:$0xff] }
  0xb4   : > { %854 = vst.msk [vmem:[#allocation2 + $0x10] sm:$0xf] %vm851_vm10, %v841_v62  ;;  %v927_v32 = vpop.permute.xlu1 %926  ;;  %1957 = vrot.lane.b32.xlu1 %v1948_v47, %s2658_s17 }
  0xb5   : > { %939 = vst.msk [vmem:[#allocation2 + $0x18] sm:$0xf] %vm935_vm13, %v927_v32 }
  0xb7   : > { %v925_v35 = vpop.permute.xlu0 %924 }
  0xb8   : > { %938 = vst.msk [vmem:[#allocation2 + $0x10] sm:$0xf] %vm935_vm13, %v925_v35  ;;  %v1012_v54 = vpop.permute.xlu1 %1011 }
  0xb9   : > { %1024 = vst.msk [vmem:[#allocation2 + $0x18] sm:$0xf] %vm1020_vm0, %v1012_v54 }
  0xbb   : > { %v1010_v15 = vpop.permute.xlu0 %1009 }
  0xbc   : > { %1023 = vst.msk [vmem:[#allocation2 + $0x10] sm:$0xf] %vm1020_vm0, %v1010_v15  ;;  %v1097_v20 = vpop.permute.xlu1 %1096 }
  0xbd   : > { %1109 = vst.msk [vmem:[#allocation2 + $0x18] sm:$0xf] %vm1105_vm1, %v1097_v20 }
  0xbf   : > { %v1095_v36 = vpop.permute.xlu0 %1094 }
  0xc0   : > { %1108 = vst.msk [vmem:[#allocation2 + $0x10] sm:$0xf] %vm1105_vm1, %v1095_v36  ;;  %v1182_v2 = vpop.permute.xlu1 %1181 }
  0xc1   : > { %1194 = vst.msk [vmem:[#allocation2 + $0x18] sm:$0xf] %vm1190_vm3, %v1182_v2 }
  0xc3   : > { %v1180_v52 = vpop.permute.xlu0 %1179 }
  0xc4   : > { %1193 = vst.msk [vmem:[#allocation2 + $0x10] sm:$0xf] %vm1190_vm3, %v1180_v52  ;;  %v769_v53 = vpop.permute.xlu1 %768 }
  0xc7   : > { %v690_v44 = vpop.permute.xlu0 %689 }
  0xc8   : > { %v1264_v58 = vld [vmem:[#allocation2 + $0x18] sm:$0xff]  ;;  %701 = vst.msk [vmem:[#allocation2 + $0x20] sm:$0xf] %vm696_vm8, %v690_v44  ;;  %v929_v59 = vpop.permute.xlu1 %928 }
  0xc9   : > { %1530 = vst.msk [vmem:[#allocation2 + $0x18] sm:$0xf] %vm608_vm15, %v1525_v3 }
  0xca   : > { %780 = vst.msk [vmem:[#allocation2 + $0x20] sm:$0xf] %vm775_vm9, %v769_v53  ;;  %v2607_v53 = vld [vmem:[%s3535_s5 + $0x8] sm:$0xff]  }
  0xcb   : > { %v1263_v60 = vld [vmem:[#allocation2 + $0x10] sm:$0xff]  ;;  %v845_v55 = vpop.permute.xlu0 %844 }
  0xcc   : > { %1529 = vst.msk [vmem:[#allocation2 + $0x10] sm:$0xf] %vm608_vm15, %v1524_v57  ;;  %v2420_v12 = vcombine.high %v1263_v60, %v1264_v58  ;;  %v2419_v24 = vcombine.low %v1263_v60, %v1264_v58  ;;  %v1099_v63 = vpop.permute.xlu1 %1098 }
  0xcd   : > { %856 = vst.msk [vmem:[#allocation2 + $0x20] sm:$0xf] %vm851_vm10, %v845_v55 }
  0xce   : > { %940 = vst.msk [vmem:[#allocation2 + $0x20] sm:$0xf] %vm935_vm13, %v929_v59  ;;  %2433 = vmatprep.mubr.msk.bf16.mxu0 %vm377_vm14, %v2420_v12  ;;  %v1972_v59 = vld [vmem:[%s2728_s10 + $0x2c] sm:$0xf]  ;;  %v1973_v12 = vld [vmem:[%s2728_s10 + $0x30] sm:$0xf] }
  0xcf   : > { %v1014_v4 = vpop.permute.xlu0 %1013  ;;  %1420 = vmatmul.mubr.bf16.gmra.mxu0 %v2419_v24  ;;  %v1992_v55 = vrot.slane %v1972_v59, 5  ;;  %v2619_v59 = vld [vmem:[%s3533_s3 + $0x40] sm:$0xff]  }
  0xd0   : > { %1025 = vst.msk [vmem:[#allocation2 + $0x20] sm:$0xf] %vm1020_vm0, %v1014_v4 }
  0xd1   : > { %1110 = vst.msk [vmem:[#allocation2 + $0x20] sm:$0xf] %vm1105_vm1, %v1099_v63  ;;  %v1991_v63 = vrot.slane %v1989_v30, 4  ;;  %v1994_v4 = vrot.slane %v1992_v55, 4 }
  0xd3   : > { %v1184_v5 = vpop.permute.xlu0 %1183 }
  0xd4   : > { %1195 = vst.msk [vmem:[#allocation2 + $0x20] sm:$0xf] %vm1190_vm3, %v1184_v5  ;;  %v1995_v5 = vrot.slane %v1973_v12, 5 }
  0xd6   : > { %v1997_v22 = vrot.slane %v1995_v5, 4 }
  0xdb   : > { %v1265_v26 = vld [vmem:[#allocation2 + $0x20] sm:$0xff] }
  0xdc   : > { %1531 = vst.msk [vmem:[#allocation2 + $0x20] sm:$0xf] %vm608_vm15, %v1526_v8  ;;  %v2422_v9 = vcombine.high %v1265_v26, %v1265_v26  ;;  %v2421_v11 = vcombine.low %v1265_v26, %v1265_v26 }
  0xde   : > { %2434 = vmatprep.mubr.msk.bf16.mxu0 %vm377_vm14, %v2422_v9 }
  0xdf   : > { %1428 = vmatmul.mubr.bf16.gmra.mxu0 %v2421_v11 }
  0xe0   : > { %2545 = vmatprep.mubr.msk.bf16.mxu0 %vm2650_vm4, %v2649_v0 }
  0xe2   : > { %v1597_v1 = vpop.permute.xlu1 %1596 }
  0xe3   : > { %1611 = vst.msk [vmem:[#allocation2] sm:$0xf] %vm696_vm8, %v1597_v1  ;;  %v1599_v7 = vpop.permute.xlu0 %1598 }
  0xe4   : > { %1612 = vst.msk [vmem:[#allocation2 + $0x8] sm:$0xf] %vm696_vm8, %v1599_v7  ;;  %v1993_v7 = vsel %vm3387_vm12, %v1991_v63, %v1992_v55 }
  0xe5   : > { %2007 = vst.msk [vmem:[#allocation2 + $0x14] sm:$0xf] %vm608_vm15, %v1993_v7 }
  0xe6   : > { %v1648_v25 = vpop.permute.xlu1 %1647 }
  0xe7   : > { %1662 = vst.msk [vmem:[#allocation2] sm:$0xf] %vm775_vm9, %v1648_v25  ;;  %v1650_v27 = vpop.permute.xlu0 %1649  ;;  %v1996_v25 = vsel %vm3387_vm12, %v1994_v4, %v1995_v5  ;;  %v2618_v5 = vld [vmem:[#allocation2 + $0x4] ss:$8 sps:$4 sm:$0xff]  }
  0xe8   : > { %1663 = vst.msk [vmem:[#allocation2 + $0x8] sm:$0xf] %vm775_vm9, %v1650_v27 }
  0xe9   : > { %2008 = vst.msk [vmem:[#allocation2 + $0x1c] sm:$0xf] %vm608_vm15, %v1996_v25 }
  0xea   : > { %v1696_v37 = vpop.permute.xlu1 %1695 }
  0xeb   : > { %1710 = vst.msk [vmem:[#allocation2] sm:$0xf] %vm851_vm10, %v1696_v37  ;;  %v1698_v33 = vpop.permute.xlu0 %1697 }
  0xec   : > { %1711 = vst.msk [vmem:[#allocation2 + $0x8] sm:$0xf] %vm851_vm10, %v1698_v33 }
  0xee   : > { %v1776_v46 = vpop.permute.xlu1 %1775 }
  0xef   : > { %1790 = vst.msk [vmem:[#allocation2] sm:$0xf] %vm935_vm13, %v1776_v46  ;;  %v1778_v6 = vpop.permute.xlu0 %1777 }
  0xf0   : > { %1791 = vst.msk [vmem:[#allocation2 + $0x8] sm:$0xf] %vm935_vm13, %v1778_v6 }
  0xf2   : > { %v1827_v16 = vpop.permute.xlu1 %1826 }
  0xf3   : > { %1841 = vst.msk [vmem:[#allocation2] sm:$0xf] %vm1020_vm0, %v1827_v16  ;;  %v1829_v18 = vpop.permute.xlu0 %1828 }
  0xf4   : > { %1842 = vst.msk [vmem:[#allocation2 + $0x8] sm:$0xf] %vm1020_vm0, %v1829_v18 }
  0xf6   : > { %v1875_v39 = vpop.permute.xlu1 %1874 }
  0xf7   : > { %1889 = vst.msk [vmem:[#allocation2] sm:$0xf] %vm1105_vm1, %v1875_v39  ;;  %v1877_v34 = vpop.permute.xlu0 %1876 }
  0xf8   : > { %1890 = vst.msk [vmem:[#allocation2 + $0x8] sm:$0xf] %vm1105_vm1, %v1877_v34 }
  0xfa   : > { %v1950_v38 = vpop.permute.xlu1 %1949 }
  0xfb   : > { %1964 = vst.msk [vmem:[#allocation2] sm:$0xf] %vm1190_vm3, %v1950_v38  ;;  %v1952_v56 = vpop.permute.xlu0 %1951 }
  0xfc   : > { %1965 = vst.msk [vmem:[#allocation2 + $0x8] sm:$0xf] %vm1190_vm3, %v1952_v56 }
  0xfe   : > { %v1601_v31 = vpop.permute.xlu1 %1600 }
  0xff   : > { %1613 = vst.msk [vmem:[#allocation2 + $0x10] sm:$0xf] %vm696_vm8, %v1601_v31  ;;  %v1603_v42 = vpop.permute.xlu0 %1602  ;;  %v1999_v31 = vsel %vm3387_vm12, %v1997_v22, %v1998_v23 }
 0x100   : > { %1614 = vst.msk [vmem:[#allocation2 + $0x18] sm:$0xf] %vm696_vm8, %v1603_v42 }
 0x101   : > { %2009 = vst.msk [vmem:[#allocation2 + $0x24] sm:$0xf] %vm608_vm15, %v1999_v31 }
 0x102   : > { %v1652_v17 = vpop.permute.xlu1 %1651 }
 0x103   : > { %1664 = vst.msk [vmem:[#allocation2 + $0x10] sm:$0xf] %vm775_vm9, %v1652_v17  ;;  %v1654_v49 = vpop.permute.xlu0 %1653 }
 0x104   : > { %1665 = vst.msk [vmem:[#allocation2 + $0x18] sm:$0xf] %vm775_vm9, %v1654_v49 }
 0x106   : > { %v1700_v14 = vpop.permute.xlu1 %1699 }
 0x107   : > { %1712 = vst.msk [vmem:[#allocation2 + $0x10] sm:$0xf] %vm851_vm10, %v1700_v14  ;;  %v1702_v29 = vpop.permute.xlu0 %1701 }
 0x108   : > { %1713 = vst.msk [vmem:[#allocation2 + $0x18] sm:$0xf] %vm851_vm10, %v1702_v29 }
 0x10a   : > { %v1780_v40 = vpop.permute.xlu1 %1779 }
 0x10b   : > { %1792 = vst.msk [vmem:[#allocation2 + $0x10] sm:$0xf] %vm935_vm13, %v1780_v40  ;;  %v1782_v41 = vpop.permute.xlu0 %1781  ;;  %v2608_v40 = vld [vmem:[%s3533_s3 + $0x38] sm:$0xff]  }
 0x10c   : > { %1793 = vst.msk [vmem:[#allocation2 + $0x18] sm:$0xf] %vm935_vm13, %v1782_v41  ;;  %v2610_v41 = vld [vmem:[%s3533_s3 + $0x28] sm:$0xff]  }
 0x10e   : > { %v1831_v62 = vpop.permute.xlu1 %1830 }
 0x10f   : > { %1843 = vst.msk [vmem:[#allocation2 + $0x10] sm:$0xf] %vm1020_vm0, %v1831_v62  ;;  %v1833_v15 = vpop.permute.xlu0 %1832  ;;  %v2612_v62 = vld [vmem:[%s3533_s3 + $0x18] sm:$0xff]  }
 0x110   : > { %1844 = vst.msk [vmem:[#allocation2 + $0x18] sm:$0xf] %vm1020_vm0, %v1833_v15 }
 0x112   : > { %v1879_v36 = vpop.permute.xlu1 %1878 }
 0x113   : > { %1891 = vst.msk [vmem:[#allocation2 + $0x10] sm:$0xf] %vm1105_vm1, %v1879_v36  ;;  %v1881_v58 = vpop.permute.xlu0 %1880  ;;  %v2614_v36 = vld [vmem:[%s3533_s3 + $0x8] sm:$0xff]  }
 0x114   : > { %1892 = vst.msk [vmem:[#allocation2 + $0x18] sm:$0xf] %vm1105_vm1, %v1881_v58 }
 0x116   : > { %v1954_v60 = vpop.permute.xlu1 %1953 }
 0x117   : > { %v421_v43 = vpop.f32.mrf.mxu0  ;;  %1966 = vst.msk [vmem:[#allocation2 + $0x10] sm:$0xf] %vm1190_vm3, %v1954_v60  ;;  %v1956_v9 = vpop.permute.xlu0 %1955 }
 0x118   : > { %v422_v45 = vadd.f32 %v2399_v51, %v421_v43  ;;  %1967 = vst.msk [vmem:[#allocation2 + $0x18] sm:$0xf] %vm1190_vm3, %v1956_v9 }
 0x119   : > { %v2505_v47 = vpop.f32.mrf.mxu0 }
 0x11a   : > { %v443_v35 = vmax.f32 %v422_v45, 0.0  ;;  %v1605_v1 = vpop.permute.xlu1 %1604  ;;  %v2609_v45 = vld [vmem:[%s3533_s3 + $0x30] sm:$0xff]   ;;  %v2611_v47 = vld [vmem:[%s3533_s3 + $0x20] sm:$0xff]  }
 0x11b   : > { %v424_v32 = vpop.f32.mrf.mxu0  ;;  %1615 = vst.msk [vmem:[#allocation2 + $0x20] sm:$0xf] %vm696_vm8, %v1605_v1  ;;  %v1656_v6 = vpop.permute.xlu0 %1655 }
 0x11c   : > { %v425_v54 = vadd.f32 %v2399_v51, %v424_v32  ;;  %1666 = vst.msk [vmem:[#allocation2 + $0x20] sm:$0xf] %vm775_vm9, %v1656_v6 }
 0x11d   : > { %v2506_v20 = vpop.f32.mrf.mxu0 }
 0x11e   : > { %v444_v2 = vmax.f32 %v425_v54, 0.0  ;;  %v1704_v18 = vpop.permute.xlu1 %1703 }
 0x11f   : > { %v429_v52 = vpop.f32.mrf.mxu0  ;;  %1714 = vst.msk [vmem:[#allocation2 + $0x20] sm:$0xf] %vm851_vm10, %v1704_v18  ;;  %v1784_v19 = vpop.permute.xlu0 %1783 }
 0x120   : > { %v448_v3 = vpack.c.bf16 %v444_v2, %v443_v35  ;;  %v430_v44 = vadd.f32 %v2399_v51, %v429_v52  ;;  %1794 = vst.msk [vmem:[#allocation2 + $0x20] sm:$0xf] %vm935_vm13, %v1784_v19  ;;  %v2613_v35 = vld [vmem:[%s3533_s3 + $0x10] sm:$0xff]  }
 0x121   : > { %v2509_v57 = vpop.f32.mrf.mxu0 }
 0x122   : > { %2518 = vmatmul.mubr.msk.bf16.vlgmr.msra.gmra.mxu1 %vm377_vm14, %v448_v3  ;;  %v445_v8 = vmax.f32 %v430_v44, 0.0  ;;  %v1835_v48 = vpop.permute.xlu1 %1834  ;;  %v2615_v44 = vld [vmem:[%s3533_s3] sm:$0xff]  }
 0x123   : > { %v432_v24 = vpop.f32.mrf.mxu0  ;;  %2521 = vmatprep.mubr.msk.bf16.mxu1 %vm2650_vm4, %v2649_v0  ;;  %2530 = vmatpush3.bf16.msra.mxu1 %v2607_v53  ;;  %1845 = vst.msk [vmem:[#allocation2 + $0x20] sm:$0xf] %vm1020_vm0, %v1835_v48  ;;  %v1883_v56 = vpop.permute.xlu0 %1882 }
 0x124   : > { %v433_v26 = vadd.f32 %v2399_v51, %v432_v24  ;;  %2128 = vmatprep.subr.bf16.mxu1 %v2651_v10  ;;  %1893 = vst.msk [vmem:[#allocation2 + $0x20] sm:$0xf] %vm1105_vm1, %v1883_v56 }
 0x125   : > { %v2510_v11 = vpop.f32.mrf.mxu0 }
 0x126   : > { %v446_v27 = vmax.f32 %v433_v26, 0.0  ;;  %v1958_v30 = vpop.permute.xlu1 %1957  ;;  %v2616_v26 = vld [vmem:[#allocation2] ss:$8 sps:$4 sm:$0xff]   ;;  %v2013_v11 = vld [vmem:[#allocation2 + $0x18] sm:$0xff] }
 0x127   : > { %v437_v37 = vpop.f32.mrf.mxu0  ;;  %1968 = vst.msk [vmem:[#allocation2 + $0x20] sm:$0xf] %vm1190_vm3, %v1958_v30 }
 0x128   : > { %v449_v33 = vpack.c.bf16 %v446_v27, %v445_v8  ;;  %v438_v46 = vadd.f32 %v2399_v51, %v437_v37  ;;  %v2620_v8 = vld [vmem:[#allocation2 + $0x14] ss:$8 sps:$4 sm:$0xff]  }
 0x129   : > { %v2513_v16 = vpop.f32.mrf.mxu0  ;;  %v2624_v27 = vld [vmem:[%s3535_s5 + $0x10] sm:$0xff]  }
 0x12a   : > { %v447_v39 = vmax.f32 %v438_v46, 0.0  ;;  %2522 = vmatmul.mubr.msk.bf16.gmra.mxu1 %vm377_vm14, %v449_v33  ;;  %2544 = vmatpush3.bf16.msra.mxu0 %v2624_v27 }
 0x12b   : > { %v440_v34 = vpop.f32.mrf.mxu0  ;;  %2525 = vmatprep.mubr.msk.bf16.mxu1 %vm2650_vm4, %v2649_v0 }
 0x12c   : > { %v450_v50 = vpack.c.bf16 %v447_v39, %v447_v39 }
 0x12d   : > { %v2514_v38 = vpop.f32.mrf.mxu0 }
 0x12e   : > { %v2014_v9 = vld [vmem:[#allocation2 + $0x20] sm:$0xff] }
 0x12f   : > { %v2454_v1 = vcombine.high %v2014_v9, %v2014_v9  ;;  %v2453_v25 = vcombine.low %v2014_v9, %v2014_v9 }
 0x132   : > { %2526 = vmatmul.mubr.msk.bf16.gmra.mxu1 %vm377_vm14, %v450_v50 }
 0x133   : > { %2531 = vmatprep.mubr.msk.bf16.mxu1 %vm2650_vm4, %v2649_v0 }
 0x173   : > { %v1413_v13 = vpop.f32.mrf.mxu0 }
 0x174   : > { %v1414_v17 = vadd.f32 %v2416_v61, %v1413_v13 }
 0x175   : > { %v1415_v42 = vpop.f32.mrf.mxu0 }
 0x176   : > { %v1435_v29 = vmax.f32 %v1414_v17, 0.0 }
 0x177   : > { %v1416_v49 = vpop.f32.mrf.mxu0 }
 0x178   : > { %v1417_v14 = vadd.f32 %v2416_v61, %v1416_v49 }
 0x179   : > { %v1418_v28 = vpop.f32.mrf.mxu0 }
 0x17a   : > { %v1436_v51 = vmax.f32 %v1417_v14, 0.0 }
 0x17c   : > { %v1440_v43 = vpack.c.bf16 %v1436_v51, %v1435_v29 }
 0x17e   : > { %2532 = vmatmul.mubr.msk.bf16.vlgmr.msra.gmra.mxu1 %vm377_vm14, %v1440_v43 }
 0x17f   : > { %2129 = vmatpush1.bf16.msra.mxu1 %v2608_v40  ;;  %2535 = vmatprep.mubr.msk.bf16.mxu1 %vm2650_vm4, %v2649_v0 }
 0x180   : > { %2130 = vmatprep.subr.bf16.mxu1 %v2651_v10 }
 0x183   : > { %2131 = vmatpush1.bf16.msra.mxu1 %v2609_v45 }
 0x184   : > { %2132 = vmatprep.subr.bf16.mxu1 %v2651_v10 }
 0x187   : > { %2133 = vmatpush1.bf16.msra.mxu1 %v2610_v41 }
 0x188   : > { %2134 = vmatprep.subr.bf16.mxu1 %v2651_v10 }
 0x18b   : > { %2135 = vmatpush1.bf16.msra.mxu1 %v2611_v47 }
 0x18c   : > { %2136 = vmatprep.subr.bf16.mxu1 %v2651_v10 }
 0x18f   : > { %v1421_v32 = vpop.f32.mrf.mxu0  ;;  %2137 = vmatpush1.bf16.msra.mxu1 %v2612_v62 }
 0x190   : > { %2138 = vmatprep.subr.bf16.mxu1 %v2651_v10  ;;  %v1422_v15 = vadd.f32 %v2416_v61, %v1421_v32 }
 0x191   : > { %v1423_v54 = vpop.f32.mrf.mxu0 }
 0x192   : > { %v1437_v53 = vmax.f32 %v1422_v15, 0.0  ;;  %v2448_v54 = vld [vmem:[%s3534_s4 + $0x2] ss:$0 sm:$0xff] }
 0x193   : > { %v1424_v20 = vpop.f32.mrf.mxu0  ;;  %2139 = vmatpush1.bf16.msra.mxu1 %v2613_v35 }
 0x194   : > { %v1425_v2 = vadd.f32 %v2416_v61, %v1424_v20  ;;  %2140 = vmatprep.subr.bf16.mxu1 %v2651_v10 }
 0x195   : > { %v1426_v52 = vpop.f32.mrf.mxu0 }
 0x196   : > { %v1438_v3 = vmax.f32 %v1425_v2, 0.0 }
 0x197   : > { %2141 = vmatpush1.bf16.msra.mxu1 %v2614_v36 }
 0x198   : > { %v1441_v58 = vpack.c.bf16 %v1438_v3, %v1437_v53  ;;  %2142 = vmatprep.subr.bf16.mxu1 %v2651_v10 }
 0x19a   : > { %2536 = vmatmul.mubr.msk.bf16.gmra.mxu1 %vm377_vm14, %v1441_v58 }
 0x19b   : > { %2539 = vmatprep.mubr.msk.bf16.mxu1 %vm2650_vm4, %v2649_v0  ;;  %2143 = vmatpush1.bf16.msra.mxu1 %v2615_v44 }
 0x19c   : > { %2158 = vmatprep.subr.bf16.mxu1 %v2651_v10  ;;  %v2012_v10 = vld [vmem:[#allocation2 + $0x10] sm:$0xff] }
 0x19d   : > { %v2451_v7 = vcombine.low %v2012_v10, %v2013_v11 }
 0x19f   : > { %v1429_v57 = vpop.f32.mrf.mxu0  ;;  %2159 = vmatpush2.bf16.msra.mxu1 %v2619_v59 }
 0x1a0   : > { %v1430_v60 = vadd.f32 %v2416_v61, %v1429_v57 }
 0x1a1   : > { %v1431_v55 = vpop.f32.mrf.mxu0 }
 0x1a2   : > { %v1439_v12 = vmax.f32 %v1430_v60, 0.0 }
 0x1a3   : > { %v1432_v24 = vpop.f32.mrf.mxu0 }
 0x1a4   : > { %v1442_v63 = vpack.c.bf16 %v1439_v12, %v1439_v12 }
 0x1a5   : > { %v1433_v4 = vpop.f32.mrf.mxu0 }
 0x1a6   : > { %2540 = vmatmul.mubr.msk.bf16.gmra.mxu1 %vm377_vm14, %v1442_v63 }
 0x1a7   : > { %2464 = vmatprep.mubr.msk.bf16.mxu1 %vm377_vm14, %v2618_v5 }
 0x1ae   : > { %2161 = vmatmul.mubr.bf16.vlgmr.msra.gmra.mxu1 %v2616_v26 }
 0x1af   : > { %2465 = vmatprep.mubr.msk.bf16.mxu1 %vm377_vm14, %v2620_v8 }
 0x1b6   : > { %2169 = vmatmul.mubr.bf16.gmra.mxu1 %v2451_v7 }
 0x1b7   : > { %2466 = vmatprep.mubr.msk.bf16.mxu1 %vm377_vm14, %v2454_v1 }
 0x1be   : > { %2177 = vmatmul.mubr.bf16.gmra.mxu1 %v2453_v25 }
 0x1e2   : > { %v503_v37 = vpop.f32.mrf.mxu1 }
 0x1e3   : > { %v531_v22 = vadd.f32 %v2411_v21, %v503_v37 }
 0x1e4   : > { %v2519_v33 = vpop.f32.mrf.mxu1 }
 0x1e6   : > { %v506_v46 = vpop.f32.mrf.mxu1 }
 0x1e7   : > { %v532_v31 = vadd.f32 %v2411_v21, %v506_v46 }
 0x1e8   : > { %v2520_v6 = vpop.f32.mrf.mxu1 }
 0x1ea   : > { %v511_v16 = vpop.f32.mrf.mxu1 }
 0x1eb   : > { %v533_v17 = vadd.f32 %v2411_v21, %v511_v16 }
 0x1ec   : > { %v2523_v18 = vpop.f32.mrf.mxu1 }
 0x1ee   : > { %v514_v39 = vpop.f32.mrf.mxu1 }
 0x1ef   : > { %v534_v29 = vadd.f32 %v2411_v21, %v514_v39 }
 0x1f0   : > { %v2524_v34 = vpop.f32.mrf.mxu1 }
 0x1f2   : > { %v519_v19 = vpop.f32.mrf.mxu1 }
 0x1f3   : > { %v535_v45 = vadd.f32 %v2411_v21, %v519_v19 }
 0x1f4   : > { %v2527_v38 = vpop.f32.mrf.mxu1 }
 0x1f6   : > { %v522_v48 = vpop.f32.mrf.mxu1 }
 0x1f8   : > { %v2528_v50 = vpop.f32.mrf.mxu1 }
 0x23e   : > { %v1495_v23 = vpop.f32.mrf.mxu1 }
 0x23f   : > { %v1517_v56 = vadd.f32 %v1495_v23, %v531_v22 }
 0x240   : > { %v2533_v30 = vpop.f32.mrf.mxu1 }
 0x242   : > { %v1498_v61 = vpop.f32.mrf.mxu1 }
 0x243   : > { %v1518_v13 = vadd.f32 %v1498_v61, %v532_v31 }
 0x244   : > { %v2534_v42 = vpop.f32.mrf.mxu1 }
 0x25a   : > { %v1503_v49 = vpop.f32.mrf.mxu1 }
 0x25b   : > { %v1519_v14 = vadd.f32 %v1503_v49, %v533_v17 }
 0x25c   : > { %v2537_v28 = vpop.f32.mrf.mxu1 }
 0x25e   : > { %v1506_v51 = vpop.f32.mrf.mxu1 }
 0x25f   : > { %v1520_v40 = vadd.f32 %v1506_v51, %v534_v29 }
 0x260   : > { %v2538_v43 = vpop.f32.mrf.mxu1 }
 0x266   : > { %v1511_v41 = vpop.f32.mrf.mxu1 }
 0x267   : > { %v1521_v47 = vadd.f32 %v1511_v41, %v535_v45 }
 0x268   : > { %v2541_v62 = vpop.f32.mrf.mxu1 }
 0x26a   : > { %v1514_v32 = vpop.f32.mrf.mxu1 }
 0x26c   : > { %v2542_v35 = vpop.f32.mrf.mxu1 }
 0x26e   : > { %v2162_v15 = vpop.f32.mrf.mxu1 }
 0x26f   : > { %v2163_v36 = vadd.f32 %v2448_v54, %v2162_v15 }
 0x270   : > { %v2164_v20 = vpop.f32.mrf.mxu1 }
 0x271   : > { %v2184_v3 = vmax.f32 %v2163_v36, 0.0 }
 0x272   : > { %v2165_v2 = vpop.f32.mrf.mxu1 }
 0x273   : > { %v2166_v52 = vadd.f32 %v2448_v54, %v2165_v2 }
 0x274   : > { %v2167_v53 = vpop.f32.mrf.mxu1 }
 0x275   : > { %v2185_v44 = vmax.f32 %v2166_v52, 0.0 }
 0x276   : > { %v2170_v58 = vpop.f32.mrf.mxu1 }
 0x277   : > { %v2189_v59 = vpack.c.bf16 %v2185_v44, %v2184_v3  ;;  %v2171_v60 = vadd.f32 %v2448_v54, %v2170_v58 }
 0x278   : > { %v2172_v57 = vpop.f32.mrf.mxu1 }
 0x279   : > { %2546 = vmatmul.mubr.msk.bf16.vlgmr.msra.gmra.mxu0 %vm377_vm14, %v2189_v59  ;;  %v2186_v63 = vmax.f32 %v2171_v60, 0.0 }
 0x27a   : > { %v2173_v55 = vpop.f32.mrf.mxu1  ;;  %2549 = vmatprep.mubr.msk.bf16.mxu0 %vm2650_vm4, %v2649_v0 }
 0x27b   : > { %v2174_v12 = vadd.f32 %v2448_v54, %v2173_v55 }
 0x27c   : > { %v2175_v24 = vpop.f32.mrf.mxu1 }
 0x27d   : > { %v2187_v4 = vmax.f32 %v2174_v12, 0.0 }
 0x27e   : > { %v2178_v5 = vpop.f32.mrf.mxu1 }
 0x27f   : > { %v2190_v8 = vpack.c.bf16 %v2187_v4, %v2186_v63  ;;  %v2179_v26 = vadd.f32 %v2448_v54, %v2178_v5 }
 0x280   : > { %v2180_v9 = vpop.f32.mrf.mxu1 }
 0x281   : > { %v2188_v10 = vmax.f32 %v2179_v26, 0.0  ;;  %2550 = vmatmul.mubr.msk.bf16.gmra.mxu0 %vm377_vm14, %v2190_v8 }
 0x282   : > { %v2181_v11 = vpop.f32.mrf.mxu1  ;;  %2553 = vmatprep.mubr.msk.bf16.mxu0 %vm2650_vm4, %v2649_v0 }
 0x283   : > { %v2191_v7 = vpack.c.bf16 %v2188_v10, %v2188_v10 }
 0x284   : > { %v2182_v1 = vpop.f32.mrf.mxu1 }
 0x289   : > { %2554 = vmatmul.mubr.msk.bf16.gmra.mxu0 %vm377_vm14, %v2191_v7 }
 0x339   : > { %v2244_v25 = vpop.f32.mrf.mxu0 }
 0x33a   : > { %v2266_v27 = vadd.f32 %v2244_v25, %v1517_v56 }
 0x33b   : > { %v2547_v37 = vpop.f32.mrf.mxu0 }
 0x33c   : > { %v2271_v33 = vmax.f32 %v2266_v27, 0.0 }
 0x33d   : > { %v2247_v46 = vpop.f32.mrf.mxu0 }
 0x33e   : > { %v2480_v6 = vpack.c.bf16 %v2271_v33, %v2271_v33  ;;  %v2267_v16 = vadd.f32 %v2247_v46, %v1518_v13 }
 0x33f   : > { %v2548_v18 = vpop.f32.mrf.mxu0 }
 0x340   : > { %2297 = vst.msk [vmem:[%s314_s23] sm:$0xf] %vm608_vm15, %v2480_v6  ;;  %v2272_v0 = vmax.f32 %v2267_v16, 0.0 }
 0x341   : > { %v2252_v39 = vpop.f32.mrf.mxu0 }
 0x342   : > { %v2481_v34 = vpack.c.bf16 %v2272_v0, %v2272_v0  ;;  %v2268_v19 = vadd.f32 %v2252_v39, %v1519_v14 }
 0x343   : > { %v2551_v38 = vpop.f32.mrf.mxu0 }
 0x344   : > { %2298 = vst.msk [vmem:[%s314_s23 + $0x4] sm:$0xf] %vm608_vm15, %v2481_v34  ;;  %v2273_v48 = vmax.f32 %v2268_v19, 0.0 }
 0x345   : > { %v2255_v50 = vpop.f32.mrf.mxu0 }
 0x346   : > { %v2482_v21 = vpack.c.bf16 %v2273_v48, %v2273_v48  ;;  %v2269_v22 = vadd.f32 %v2255_v50, %v1520_v40 }
 0x347   : > { %v2552_v23 = vpop.f32.mrf.mxu0 }
 0x348   : > { %2299 = vst.msk [vmem:[%s314_s23 + $0x8] sm:$0xf] %vm608_vm15, %v2482_v21  ;;  %v2274_v56 = vmax.f32 %v2269_v22, 0.0 }
 0x349   : > { %v2260_v30 = vpop.f32.mrf.mxu0 }
 0x34a   : > { %v2483_v31 = vpack.c.bf16 %v2274_v56, %v2274_v56  ;;  %v2270_v61 = vadd.f32 %v2260_v30, %v1521_v47 }
 0x34b   : > { %v2555_v13 = vpop.f32.mrf.mxu0 }
 0x34c   : > { %2300 = vst.msk [vmem:[%s314_s23 + $0xc] sm:$0xf] %vm608_vm15, %v2483_v31  ;;  %v2275_v42 = vmax.f32 %v2270_v61, 0.0 }
 0x34d   : > { %v2263_v17 = vpop.f32.mrf.mxu0 }
 0x34e   : > { %v2484_v49 = vpack.c.bf16 %v2275_v42, %v2275_v42 }
 0x34f   : > { %v2556_v14 = vpop.f32.mrf.mxu0 }
 0x350   : > { %2301 = vst.msk [vmem:[%s314_s23 + $0x10] sm:$0xf] %vm608_vm15, %v2484_v49 }
 0x351 PF: > { %s17_s26 = sadd.s32 1, %s2647_s26   ;;  %s3552_s24 = smov %s2643_s25 }
 0x352   : > { %p14_p5 = scmp.ge.s32.totalorder %s17_s26, 4   ;;  %s3553_s25 = smov %s3555_s27 }
 0x354   :  { %16 = sbr.rel (!%p14_p5) target bundleno = 2 (0x2), region = 85 }

// kernel: deeplabv3plus_baseline_forward.11
= control target key start
LH: loop header
LB: loop body
LE: loop exit
PB: predicated region body
PF: predicated region fallthrough
CT: control target
= control target key end

     0   :  { %s1756_s12 = smov 0   ;;  %s1758_s13 = smov 0   ;;  %s2631_s0 = inlined_call_operand.vmem [shape: bf16[2,110,24], index: 0, kind: input, shape index: {}]   ;;  %s2632_s1 = inlined_call_operand.vmem [shape: bf16[216,16], index: 1, kind: input, shape index: {}]   ;;  %s2633_s2 = inlined_call_operand.vmem [shape: f32[1,16], index: 2, kind: input, shape index: {}]   ;;  %s2634_s3 = inlined_call_operand.vmem [shape: f32[2,80,16], index: 3, kind: output, shape index: {}]  }
   0x1   :  { %s1760_s14 = smov 0  }
   0x2 LB: > { %s25_s15 = sadd.s32 1, %s1721_s13  ;;  %p1572_p0 = scmp.ge.s32.totalorder %s1725_s14, 1  ;;  %s1725_s14 = sphi %s1760_s14, %s13_s14   ;;  %s1721_s13 = sphi %s1758_s13, %s2666_s13   ;;  %s1717_s12 = sphi %s1756_s12, %s2665_s12  }
   0x3   : > { %p27_p1 = scmp.ge.s32.totalorder %s25_s15, 2  ;;  %p151_p2 = scmp.lt.s32.totalorder %s1725_s14, 3 }
   0x5   : > { %s2668_s15 = smov (%p27_p1, %s25_s15), 0  ;;  %p152_p3 = pnand %p1572_p0, %p151_p2 }
   0x6   : > { %p179_p4 = scmp.lt.s32.totalorder (!%p152_p3), %s1717_s12, 1  ;;  %s1728_s24 = smov (!%p152_p3), 120  }
   0x7   : > { %155 = sbr.rel (%p152_p3) target bundleno = 504 (0x1f8), region = 32  ;;  %s1729_s27 = smov (!%p152_p3), 48  }
   0x8   : > { %s1730_s30 = smov (!%p152_p3), 72   ;;  %s1731_s6 = smov (!%p152_p3), 24  }
   0x9   : > { %s1732_s11 = smov (!%p152_p3), 96   ;;  %s1733_s18 = smov (!%p152_p3), 16  }
   0xa   : > { %s1734_s19 = smov (!%p152_p3), 40   ;;  %s1735_s20 = smov (!%p152_p3), 64  }
   0xc   : > { %s2670_s12 = smov (!%p179_p4, %s1717_s12), 1  ;;  %vm751_vm0 = vcmask 1041408   ;;  %vm752_vm1 = vcmask 1045508   ;;  %vm397_vm2 = vcmask 1042432   ;;  %vm398_vm3 = vcmask 1046532   ;;  %v1675_v1 = vld [vmem:[%s2632_s1 + $0x38] sm:$0xff]  }
   0xd   : > { %s1640_s16 = smul.u32 56, %s2670_s12  ;;  %v1727_v0 = vmov 0   ;;  %vm1787_vm4 = vmor %vm751_vm0, %vm752_vm1  ;;  %vm227_vm5 = vsmask.f32 3328  ;;  %vm228_vm6 = vsmask.f32 7440 }
   0xe   : > { %1393 = vmatprep.subr.bf16.mxu0 %v1727_v0  ;;  %1612 = vmatprep.subr.bf16.mxu1 %v1727_v0  ;;  %vm1797_vm7 = vmor %vm397_vm2, %vm398_vm3  ;;  %v1676_v11 = vld [vmem:[%s2632_s1 + $0x30] sm:$0xff]   ;;  %vm577_vm8 = vsmask.f32 2304  ;;  %v1677_v25 = vld [vmem:[%s2632_s1 + $0x28] sm:$0xff]   ;;  %vm578_vm9 = vsmask.f32 6416 }
   0xf   : > { %s1785_s21 = scalar_lea.vmem %s2631_s0, %s1640_s16  ;;  %1394 = vmatpush1.bf16.msra.mxu0 %v1675_v1  ;;  %1626 = vmatpush1.bf16.msra.mxu1 %v1675_v1  ;;  %v1678_v39 = vld [vmem:[%s2632_s1 + $0x20] sm:$0xff]   ;;  %vm1858_vm10 = vmor %vm227_vm5, %vm228_vm6  ;;  %vm954_vm12 = vsmask.f32 1280  ;;  %vm1128_vm13 = vcmask 1040384   ;;  %vm955_vm14 = vsmask.f32 5392 }
  0x10   : > { %v729_v3 = vld [vmem:[%s1785_s21 + $0x4] sm:$0xc]  ;;  %v730_v4 = vld [vmem:[%s1785_s21 + $0x8] sm:$0xf]  ;;  %v375_v5 = vld [vmem:[%s1785_s21] sm:$0xe]  ;;  %1395 = vmatprep.subr.bf16.mxu0 %v1727_v0  ;;  %1613 = vmatprep.subr.bf16.mxu1 %v1727_v0 }
  0x11   : > { %v1577_v6 = vrot.slane %v729_v3, 10  ;;  %v756_v7 = vrot.slane %v730_v4, 6  ;;  %v376_v8 = vld [vmem:[%s1785_s21 + $0x4] sm:$0xf]  ;;  %v1575_v10 = vrot.slane %v375_v5, 9  ;;  %v1679_v3 = vld [vmem:[%s2632_s1 + $0x18] sm:$0xff]   ;;  %vm1885_vm11 = vmor %vm577_vm8, %vm578_vm9 }
  0x12   : > { %v402_v12 = vrot.slane %v376_v8, 5  ;;  %v472_v13 = vld [vmem:[%s1785_s21 + $0x4] sm:$0xe]  ;;  %v473_v14 = vld [vmem:[%s1785_s21 + $0x8] sm:$0xf]  ;;  %vm1946_vm15 = vmor %vm954_vm12, %vm955_vm14  ;;  %vm1129_vm0 = vcmask 1044484  }
  0x13   : > { %v757_v15 = vsel %vm1787_vm4, %v1577_v6, %v756_v7  ;;  %v1576_v16 = vrot.slane %v472_v13, 9  ;;  %v496_v17 = vrot.slane %v473_v14, 5  ;;  %v1811_v18 = vld [vmem:[%s1785_s21 + $0x8] sm:$0xf]  ;;  %v1814_v19 = vld [vmem:[%s1785_s21 + $0xc] sm:$0xf]  ;;  %1396 = vmatpush1.bf16.msra.mxu0 %v1676_v11  ;;  %1627 = vmatpush1.bf16.msra.mxu1 %v1676_v11  ;;  %vm1968_vm1 = vmor %vm1128_vm13, %vm1129_vm0 }
  0x14   : > { %785 = vrot.lane.b32.xlu0 %v757_v15, %s1728_s24  ;;  %v403_v20 = vsel %vm1797_vm7, %v1575_v10, %v402_v12  ;;  %v404_v21 = vrot.slane %v402_v12, 4  ;;  %v405_v22 = vrot.slane %v1811_v18, 5  ;;  %v758_v23 = vrot.slane %v756_v7, 4  ;;  %v216_v24 = vld [vmem:[%s1785_s21] sm:$0xf]  ;;  %1397 = vmatprep.subr.bf16.mxu0 %v1727_v0 }
  0x15   : > { %431 = vrot.lane.b32.xlu1 %v403_v20, %s1729_s27  ;;  %v497_v26 = vsel %vm1797_vm7, %v1576_v16, %v496_v17  ;;  %v759_v27 = vrot.slane %v1814_v19, 6  ;;  %v217_v28 = vld [vmem:[%s1785_s21 + $0x4] sm:$0xf]  ;;  %v231_v29 = vshrl.u32 %v216_v24, 16  ;;  %v234_v30 = vshll.u32 %v216_v24, 16  ;;  %1614 = vmatprep.subr.bf16.mxu1 %v1727_v0 }
  0x16   : > { %v406_v31 = vsel %vm1797_vm7, %v404_v21, %v405_v22  ;;  %v240_v32 = vshll.u32 %v217_v28, 16  ;;  %v244_v33 = vshrl.u32 %v217_v28, 16  ;;  %v1835_v34 = vld [vmem:[%s1785_s21 + $0xc] sm:$0xf]  ;;  %v498_v37 = vrot.slane %v496_v17, 4 }
  0x17   : > { %v233_v35 = vrot.slane %v231_v29, 4  ;;  %v236_v36 = vrot.slane %v234_v30, 5  ;;  %v1838_v38 = vld [vmem:[%s1785_s21 + $0x8] sm:$0xf]  ;;  %v499_v41 = vrot.slane %v1835_v34, 5  ;;  %1398 = vmatpush1.bf16.msra.mxu0 %v1677_v25  ;;  %v760_v45 = vsel %vm1787_vm4, %v758_v23, %v759_v27  ;;  %1628 = vmatpush1.bf16.msra.mxu1 %v1677_v25  ;;  %v1680_v29 = vld [vmem:[%s2632_s1 + $0x10] sm:$0xff]  }
  0x18   : > { %525 = vrot.lane.b32.xlu0 %v497_v26, %s1730_s30  ;;  %v242_v40 = vrot.slane %v240_v32, 5  ;;  %v246_v42 = vrot.slane %v244_v33, 4  ;;  %v250_v43 = vshll.u32 %v1838_v38, 16  ;;  %v567_v44 = vld [vmem:[%s1785_s21 + $0x8] sm:$0xf]  ;;  %1399 = vmatprep.subr.bf16.mxu0 %v1727_v0  ;;  %vm205_vm2 = vcmask 191488  }
  0x19   : > { %433 = vrot.lane.b32.xlu1 %v406_v31, %s1729_s27  ;;  %v237_v46 = vor.u32 %v236_v36, %v233_v35  ;;  %v568_v47 = vld [vmem:[%s1785_s21 + $0xc] sm:$0xf]  ;;  %v590_v48 = vshrl.u32 %v567_v44, 16  ;;  %v593_v49 = vshll.u32 %v567_v44, 16  ;;  %v566_v50 = vld [vmem:[%s1785_s21 + $0x4] sm:$0xe]  ;;  %1615 = vmatprep.subr.bf16.mxu1 %v1727_v0  ;;  %v500_v11 = vsel %vm1797_vm7, %v498_v37, %v499_v41 }
  0x1a   : > { %v247_v52 = vor.u32 %v246_v42, %v242_v40  ;;  %v1862_v53 = vrot.slane %v250_v43, 5  ;;  %v600_v54 = vshrl.u32 %v568_v47, 16  ;;  %v603_v55 = vshll.u32 %v568_v47, 16  ;;  %v1865_v56 = vld [vmem:[%s1785_s21 + $0xc] sm:$0xf] }
  0x1b   : > { %v238_v57 = vrot.slane %v237_v46, 4  ;;  %v592_v58 = vrot.slane %v590_v48, 5  ;;  %v595_v59 = vrot.slane %v593_v49, 6  ;;  %v581_v60 = vshrl.u32 %v566_v50, 16  ;;  %1400 = vmatpush1.bf16.msra.mxu0 %v1678_v39  ;;  %v944_v8 = vld [vmem:[%s1785_s21 + $0xc] sm:$0xf]  ;;  %1629 = vmatpush1.bf16.msra.mxu1 %v1678_v39 }
  0x1c   : > { %v248_v61 = vrot.slane %v247_v52, 4  ;;  %v602_v62 = vrot.slane %v600_v54, 5  ;;  %v605_v63 = vrot.slane %v603_v55, 6  ;;  %v584_v1 = vshll.u32 %v566_v50, 16  ;;  %v945_v10 = vld [vmem:[%s1785_s21 + $0x10] sm:$0xf]  ;;  %1401 = vmatprep.subr.bf16.mxu0 %v1727_v0  ;;  %1616 = vmatprep.subr.bf16.mxu1 %v1727_v0 }
  0x1d   : > { %787 = vrot.lane.b32.xlu1 %v760_v45, %s1728_s24  ;;  %v243_v4 = vsel %vm1858_vm10, %v238_v57, %v242_v40  ;;  %v596_v5 = vor.u32 %v595_v59, %v592_v58  ;;  %v583_v6 = vrot.slane %v581_v60, 5  ;;  %v873_v7 = vrot.slane %v1865_v56, 6  ;;  %v1892_v15 = vld [vmem:[%s1785_s21 + $0x10] sm:$0xf]  ;;  %v849_v20 = vld [vmem:[%s1785_s21 + $0x8] sm:$0xc] }
  0x1e   : > { %334 = vrot.lane.b32.xlu0 %v243_v4, %s1731_s6  ;;  %v1889_v13 = vor.u32 %v605_v63, %v602_v62  ;;  %v586_v14 = vrot.slane %v584_v1, 6  ;;  %v253_v16 = vsel %vm1858_vm10, %v248_v61, %v1862_v53  ;;  %v967_v21 = vshrl.u32 %v944_v8, 16  ;;  %v943_v28 = vld [vmem:[%s1785_s21 + $0x8] sm:$0xc]  ;;  %v1911_v35 = vld [vmem:[%s1785_s21 + $0xc] sm:$0xf] }
  0x1f   : > { %v598_v17 = vrot.slane %v596_v5, 4  ;;  %v970_v24 = vshll.u32 %v944_v8, 16  ;;  %v977_v25 = vshrl.u32 %v945_v10, 16  ;;  %v980_v26 = vshll.u32 %v945_v10, 16  ;;  %1402 = vmatpush1.bf16.msra.mxu0 %v1679_v3  ;;  %v219_v42 = vld [vmem:[%s1785_s21 + $0xc] sm:$0xf]  ;;  %1630 = vmatpush1.bf16.msra.mxu1 %v1679_v3 }
  0x20   : > { %v587_v23 = vor.u32 %v586_v14, %v583_v6  ;;  %v875_v31 = vrot.slane %v873_v7, 4  ;;  %v876_v32 = vrot.slane %v1892_v15, 6  ;;  %v969_v33 = vrot.slane %v967_v21, 6  ;;  %1403 = vmatprep.subr.bf16.mxu0 %v1727_v0  ;;  %1617 = vmatprep.subr.bf16.mxu1 %v1727_v0  ;;  %v1681_v50 = vld [vmem:[%s2632_s1 + $0x8] sm:$0xff]   ;;  %v1937_v60 = vld [vmem:[%s1785_s21 + $0x10] sm:$0xf] }
  0x21   : > { %527 = vrot.lane.b32.xlu1 %v500_v11, %s1730_s30  ;;  %v607_v30 = vsel %vm1885_vm11, %v598_v17, %v1889_v13  ;;  %v972_v37 = vrot.slane %v970_v24, 7  ;;  %v979_v39 = vrot.slane %v977_v25, 6  ;;  %v982_v40 = vrot.slane %v980_v26, 7  ;;  %v223_v62 = vld [vmem:[%s1785_s21 + $0x1c] sm:$0xf]  ;;  %v1682_v11 = vld [vmem:[%s2632_s1] sm:$0xff]  }
  0x22   : > { %336 = vrot.lane.b32.xlu0 %v253_v16, %s1731_s6  ;;  %v588_v36 = vrot.slane %v587_v23, 4  ;;  %v1578_v43 = vrot.slane %v849_v20, 10  ;;  %v958_v44 = vshrl.u32 %v943_v28, 16  ;;  %v961_v45 = vshll.u32 %v943_v28, 16  ;;  %v1106_v4 = vld [vmem:[%s1785_s21 + $0x8] sm:$0x8] }
  0x23   : > { %v254_v46 = vshrl.u32 %v1838_v38, 16  ;;  %v973_v48 = vor.u32 %v972_v37, %v969_v33  ;;  %v1133_v49 = vrot.slane %v1911_v35, 7  ;;  %1404 = vmatpush1.bf16.msra.mxu0 %v1680_v29  ;;  %v1926_v38 = vld [vmem:[%s1785_s21 + $0x10] sm:$0xf]  ;;  %v260_v55 = vshll.u32 %v219_v42, 16  ;;  %1631 = vmatpush1.bf16.msra.mxu1 %v1680_v29 }
  0x24   : > { %v597_v47 = vsel %vm1885_vm11, %v588_v36, %v596_v5  ;;  %v960_v52 = vrot.slane %v958_v44, 6  ;;  %v963_v54 = vrot.slane %v961_v45, 7  ;;  %1405 = vmatprep.subr.bf16.mxu0 %v1727_v0  ;;  %v877_v57 = vsel %vm1787_vm4, %v875_v31, %v876_v32  ;;  %v222_v6 = vld [vmem:[%s1785_s21 + $0x18] sm:$0xf]  ;;  %1618 = vmatprep.subr.bf16.mxu1 %v1727_v0 }
  0x25   : > { %690 = vrot.lane.b32.xlu1 %v607_v30, %s1732_s11  ;;  %v975_v58 = vrot.slane %v973_v48, 4  ;;  %v1934_v59 = vor.u32 %v982_v40, %v979_v39  ;;  %v264_v61 = vshrl.u32 %v219_v42, 16  ;;  %v874_v63 = vsel %vm1787_vm4, %v1578_v43, %v873_v7  ;;  %v1976_v30 = vld [vmem:[%s1785_s21 + $0x20] sm:$0xf] }
  0x26   : > { %688 = vrot.lane.b32.xlu0 %v597_v47, %s1732_s11  ;;  %v964_v3 = vor.u32 %v963_v54, %v960_v52  ;;  %v262_v5 = vrot.slane %v260_v55, 5  ;;  %v1135_v8 = vrot.slane %v1133_v49, 4  ;;  %v1136_v56 = vrot.slane %v1926_v38, 7  ;;  %v378_v47 = vld [vmem:[%s1785_s21 + $0xc] sm:$0xf] }
  0x27   : > { %v266_v10 = vrot.slane %v264_v61, 4  ;;  %v256_v7 = vrot.slane %v254_v46, 4  ;;  %1406 = vmatpush1.bf16.msra.mxu0 %v1681_v50  ;;  %v270_v16 = vshll.u32 %v1937_v60, 16  ;;  %v300_v17 = vshll.u32 %v223_v62, 16  ;;  %1632 = vmatpush1.bf16.msra.mxu1 %v1681_v50  ;;  %v2012_v61 = vld [vmem:[%s1785_s21 + $0x18] sm:$0xf] }
  0x28   : > { %v965_v14 = vrot.slane %v964_v3, 4  ;;  %v304_v20 = vshrl.u32 %v223_v62, 16  ;;  %1407 = vmatprep.subr.bf16.mxu0 %v1727_v0  ;;  %v984_v21 = vsel %vm1946_vm15, %v975_v58, %v1934_v59  ;;  %v1579_v24 = vrot.slane %v1106_v4, 11  ;;  %1619 = vmatprep.subr.bf16.mxu1 %v1727_v0  ;;  %v382_v58 = vld [vmem:[%s1785_s21 + $0x1c] sm:$0xf] }
  0x29   : > { %904 = vrot.lane.b32.xlu1 %v877_v57, %s1733_s18  ;;  %v267_v25 = vor.u32 %v266_v10, %v262_v5  ;;  %v290_v26 = vshll.u32 %v222_v6, 16  ;;  %v257_v29 = vor.u32 %v256_v7, %v1862_v53  ;;  %v302_v31 = vrot.slane %v300_v17, 5  ;;  %v2008_v57 = vld [vmem:[%s1785_s21 + $0x10] sm:$0xf] }
  0x2a   : > { %902 = vrot.lane.b32.xlu0 %v874_v63, %s1733_s18  ;;  %v974_v28 = vsel %vm1946_vm15, %v965_v14, %v973_v48  ;;  %v306_v33 = vrot.slane %v304_v20, 4  ;;  %v294_v37 = vshrl.u32 %v222_v6, 16  ;;  %v1137_v39 = vsel %vm1968_vm1, %v1135_v8, %v1136_v56  ;;  %v2025_v8 = vld [vmem:[%s1785_s21 + $0x20] sm:$0xf]  ;;  %v732_v7 = vld [vmem:[%s1785_s21 + $0x10] sm:$0xf] }
  0x2b   : > { %v1979_v36 = vrot.slane %v290_v26, 5  ;;  %1408 = vmatpush1.bf16.msra.mxu0 %v1682_v11  ;;  %v1986_v53 = vrot.slane %v270_v16, 5  ;;  %v268_v40 = vrot.slane %v267_v25, 4  ;;  %v310_v43 = vshll.u32 %v1976_v30, 16  ;;  %1633 = vmatpush1.bf16.msra.mxu1 %v1682_v11  ;;  %v736_v16 = vld [vmem:[%s1785_s21 + $0x20] sm:$0xf] }
  0x2c   : > { %1413 = vmatprep.subr.bf16.mxu0 %v1727_v0  ;;  %v307_v42 = vor.u32 %v306_v33, %v302_v31  ;;  %v296_v44 = vrot.slane %v294_v37, 4  ;;  %v1134_v45 = vsel %vm1968_vm1, %v1579_v24, %v1133_v49  ;;  %v258_v46 = vrot.slane %v257_v29, 4  ;;  %1620 = vmatprep.subr.bf16.mxu1 %v1727_v0  ;;  %v2045_v24 = vld [vmem:[%s1785_s21 + $0x1c] sm:$0xf]  ;;  %v475_v33 = vld [vmem:[%s1785_s21 + $0x10] sm:$0xf] }
  0x2d   : > { %1067 = vrot.lane.b32.xlu1 %v984_v21, %s1734_s19  ;;  %v273_v35 = vsel %vm1858_vm10, %v268_v40, %v1986_v53  ;;  %v2003_v52 = vrot.slane %v310_v43, 5  ;;  %v408_v49 = vrot.slane %v378_v47, 5  ;;  %v411_v3 = vrot.slane %v2008_v57, 5  ;;  %v2042_v21 = vld [vmem:[%s1785_s21 + $0x14] sm:$0xf] }
  0x2e   : > { %1065 = vrot.lane.b32.xlu0 %v974_v28, %s1734_s19  ;;  %v297_v48 = vor.u32 %v296_v44, %v1979_v36  ;;  %v308_v50 = vrot.slane %v307_v42, 4  ;;  %v263_v54 = vsel %vm1858_vm10, %v258_v46, %v262_v5  ;;  %v420_v4 = vrot.slane %v382_v58, 5  ;;  %v569_v42 = vld [vmem:[%s1785_s21 + $0x10] sm:$0xf]  ;;  %v2065_v43 = vld [vmem:[%s1785_s21 + $0x14] sm:$0xf] }
  0x2f   : > { %v410_v63 = vrot.slane %v408_v49, 4  ;;  %v407_v6 = vrot.slane %v405_v22, 4  ;;  %v2642_v10 = vrot.slane %v2012_v61, 5  ;;  %v2641_v18 = vrot.slane %v2025_v8, 5  ;;  %v2068_v44 = vld [vmem:[%s1785_s21 + $0x20] sm:$0xf] }
  0x30   : > { %v298_v55 = vrot.slane %v297_v48, 4  ;;  %v313_v62 = vsel %vm1858_vm10, %v308_v50, %v2003_v52  ;;  %v422_v14 = vrot.slane %v420_v4, 4  ;;  %v762_v22 = vrot.slane %v732_v7, 6  ;;  %v570_v48 = vld [vmem:[%s1785_s21 + $0x14] sm:$0xf] }
  0x31   : > { %1164 = vrot.lane.b32.xlu1 %v1137_v39, %s1735_s20  ;;  %v412_v11 = vsel %vm1797_vm7, %v410_v63, %v411_v3  ;;  %v409_v17 = vsel %vm1797_vm7, %v407_v6, %v408_v49  ;;  %v419_v20 = vrot.slane %v2642_v10, 4  ;;  %v774_v25 = vrot.slane %v736_v16, 6  ;;  %v573_v49 = vld [vmem:[%s1785_s21 + $0x20] sm:$0xf]  ;;  %v2087_v58 = vld [vmem:[%s1785_s21 + $0x24] sm:$0xf] }
  0x32   : > { %1162 = vrot.lane.b32.xlu0 %v1134_v45, %s1735_s20  ;;  %v303_v5 = vsel %vm1858_vm10, %v298_v55, %v302_v31  ;;  %v424_v26 = vsel %vm1797_vm7, %v422_v14, %v2641_v18  ;;  %v764_v28 = vrot.slane %v762_v22, 4  ;;  %v2640_v29 = vrot.slane %v2042_v21, 6  ;;  %v2055_v31 = vld [vmem:[%s1785_s21 + $0x24] sm:$0xf]  ;;  %v738_v57 = vld [vmem:[%s1785_s21 + $0x28] sm:$0xf] }
  0x33   : > { %v421_v37 = vsel %vm1797_vm7, %v419_v20, %v420_v4  ;;  %v761_v39 = vrot.slane %v759_v27, 4  ;;  %v2639_v40 = vrot.slane %v2045_v24, 6  ;;  %v776_v45 = vrot.slane %v774_v25, 4  ;;  %v2079_v27 = vld [vmem:[%s1785_s21 + $0x1c] sm:$0xf] }
  0x34   : > { %v2638_v46 = vrot.slane %v2055_v31, 6  ;;  %v502_v47 = vrot.slane %v475_v33, 5  ;;  %v766_v19 = vsel %vm1787_vm4, %v764_v28, %v2640_v29  ;;  %v613_v50 = vshll.u32 %v569_v42, 16 }
  0x35   : > { %340 = vrot.lane.b32.xlu1 %v273_v35, %s1731_s6  ;;  %v610_v35 = vshrl.u32 %v569_v42, 16  ;;  %v773_v55 = vrot.slane %v2639_v40, 4  ;;  %v514_v63 = vrot.slane %v2068_v44, 5  ;;  %v620_v4 = vshrl.u32 %v570_v48, 16 }
  0x36   : > { %338 = vrot.lane.b32.xlu0 %v263_v54, %s1731_s6  ;;  %v763_v54 = vsel %vm1787_vm4, %v761_v39, %v762_v22  ;;  %v778_v6 = vsel %vm1787_vm4, %v776_v45, %v2638_v46  ;;  %v504_v7 = vrot.slane %v502_v47, 4  ;;  %v623_v14 = vshll.u32 %v570_v48, 16  ;;  %v574_v22 = vld [vmem:[%s1785_s21 + $0x24] sm:$0xf] }
  0x37   : > { %v612_v16 = vrot.slane %v610_v35, 5  ;;  %v650_v20 = vshrl.u32 %v573_v49, 16  ;;  %v775_v28 = vsel %vm1787_vm4, %v773_v55, %v774_v25  ;;  %v2636_v33 = vrot.slane %v2079_v27, 5 }
  0x38   : > { %v516_v42 = vrot.slane %v514_v63, 4  ;;  %v2635_v34 = vrot.slane %v2087_v58, 5  ;;  %v625_v45 = vrot.slane %v623_v14, 6  ;;  %v660_v48 = vshrl.u32 %v574_v22, 16  ;;  %v946_v14 = vld [vmem:[%s1785_s21 + $0x14] sm:$0xf] }
  0x39   : > { %348 = vrot.lane.b32.xlu1 %v313_v62, %s1731_s6  ;;  %v2637_v62 = vrot.slane %v2065_v43, 5  ;;  %vm1389_vm3 = vcmask 1043456   ;;  %vm364_vm5 = vcmask 388288   ;;  %vm461_vm6 = vcmask 585088  }
  0x3a   : > { %346 = vrot.lane.b32.xlu0 %v303_v5, %s1731_s6  ;;  %v572_v5 = vld [vmem:[%s1785_s21 + $0x1c] sm:$0xf]  ;;  %vm555_vm8 = vcmask 781888   ;;  %vm837_vm9 = vcmask 130052   ;;  %vm718_vm12 = vcmask 978688   ;;  %vm932_vm14 = vcmask 322688  }
  0x3b   : > { %v643_v39 = vshll.u32 %v572_v5, 16  ;;  %v506_v44 = vsel %vm1797_vm7, %v504_v7, %v2637_v62  ;;  %vm1192_vm0 = vcmask 716288  }
  0x3d   : > { %437 = vrot.lane.b32.xlu1 %v412_v11, %s1729_s27  ;;  %v501_v11 = vrot.slane %v499_v41, 4  ;;  %v622_v41 = vrot.slane %v620_v4, 5  ;;  %v645_v4 = vrot.slane %v643_v39, 6  ;;  %v608_v39 = vrot.slane %v1889_v13, 4 }
  0x3e   : > { %435 = vrot.lane.b32.xlu0 %v409_v17, %s1729_s27  ;;  %v615_v17 = vrot.slane %v613_v50, 6  ;;  %v663_v50 = vshll.u32 %v574_v22, 16  ;;  %v990_v13 = vshll.u32 %v946_v14, 16 }
  0x3f   : > { %v2121_v7 = vor.u32 %v625_v45, %v622_v41  ;;  %v2138_v41 = vld [vmem:[%s1785_s21 + $0x24] sm:$0xf] }
  0x40   : > { %v616_v25 = vor.u32 %v615_v17, %v612_v16  ;;  %v665_v17 = vrot.slane %v663_v50, 6  ;;  %v196_v50 = vld [vmem:[%s1785_s21 + $0x4] sm:$0xf] }
  0x41   : > { %445 = vrot.lane.b32.xlu1 %v424_v26, %s1729_s27  ;;  %v653_v26 = vshll.u32 %v573_v49, 16  ;;  %v503_v49 = vsel %vm1797_vm7, %v501_v11, %v502_v47  ;;  %v662_v47 = vrot.slane %v660_v48, 5  ;;  %v2124_v11 = vld [vmem:[%s1785_s21 + $0x14] sm:$0xf]  ;;  %v987_v48 = vshrl.u32 %v946_v14, 16 }
  0x42   : > { %443 = vrot.lane.b32.xlu0 %v421_v37, %s1729_s27  ;;  %v640_v37 = vshrl.u32 %v572_v5, 16  ;;  %v221_v5 = vld [vmem:[%s1785_s21 + $0x14] sm:$0xf]  ;;  %v618_v22 = vrot.slane %v616_v25, 4  ;;  %v879_v45 = vrot.slane %v2124_v11, 6 }
  0x43   : > { %v655_v35 = vrot.slane %v653_v26, 6  ;;  %v280_v26 = vshll.u32 %v221_v5, 16  ;;  %207 = vst.msk [vmem:[#allocation2 + $0x8] sm:$0xf] %vm205_vm2, %v196_v50  ;;  %v2162_v14 = vld [vmem:[%s1785_s21 + $0x28] sm:$0xf] }
  0x44   : > { %v642_v55 = vrot.slane %v640_v37, 5 }
  0x45   : > { %791 = vrot.lane.b32.xlu1 %v766_v19, %s1728_s24  ;;  %v652_v19 = vrot.slane %v650_v20, 5  ;;  %v2129_v20 = vld [vmem:[%s1785_s21 + $0x18] sm:$0xf] }
  0x46   : > { %789 = vrot.lane.b32.xlu0 %v763_v54, %s1728_s24  ;;  %v513_v54 = vrot.slane %v2636_v33, 4  ;;  %v882_v11 = vrot.slane %v2129_v20, 6 }
  0x47   : > { %v656_v16 = vor.u32 %v655_v35, %v652_v19  ;;  %v2142_v19 = vrot.slane %v280_v26, 5  ;;  %v950_v26 = vld [vmem:[%s1785_s21 + $0x24] sm:$0xf] }
  0x48   : > { %v515_v37 = vsel %vm1797_vm7, %v513_v54, %v514_v63  ;;  %v2146_v63 = vld [vmem:[%s1785_s21 + $0x20] sm:$0xf]  ;;  %v1030_v33 = vshll.u32 %v950_v26, 16 }
  0x49   : > { %799 = vrot.lane.b32.xlu1 %v778_v6, %s1728_s24  ;;  %v518_v6 = vsel %vm1797_vm7, %v516_v42, %v2635_v34  ;;  %v2135_v42 = vor.u32 %v645_v4, %v642_v55  ;;  %v658_v54 = vrot.slane %v656_v16, 4  ;;  %v2153_v55 = vor.u32 %v665_v17, %v662_v47  ;;  %v947_v4 = vld [vmem:[%s1785_s21 + $0x18] sm:$0xf] }
  0x4a   : > { %797 = vrot.lane.b32.xlu0 %v775_v28, %s1728_s24  ;;  %v195_v28 = vld [vmem:[%s1785_s21] sm:$0xf]  ;;  %v878_v47 = vrot.slane %v876_v32, 4  ;;  %v989_v17 = vrot.slane %v987_v48, 6  ;;  %v1000_v50 = vshll.u32 %v947_v4, 16  ;;  %v888_v15 = vrot.slane %v2146_v63, 6 }
  0x4b   : > { %206 = vst.msk [vmem:[#allocation2] sm:$0xf] %vm205_vm2, %v195_v28  ;;  %v1027_v32 = vshrl.u32 %v950_v26, 16  ;;  %v951_v48 = vld [vmem:[%s1785_s21 + $0x28] sm:$0xf]  ;;  %v1032_v62 = vrot.slane %v1030_v33, 7 }
  0x4c   : > { %v1037_v46 = vshrl.u32 %v951_v48, 16  ;;  %v1040_v40 = vshll.u32 %v951_v48, 16  ;;  %v880_v29 = vsel %vm1787_vm4, %v878_v47, %v879_v45  ;;  %v1109_v48 = vld [vmem:[%s1785_s21 + $0x14] sm:$0xf] }
  0x4d   : > { %531 = vrot.lane.b32.xlu1 %v506_v44, %s1730_s30  ;;  %v284_v44 = vshrl.u32 %v221_v5, 16  ;;  %v617_v5 = vsel %vm1885_vm11, %v608_v39, %v616_v25  ;;  %v992_v25 = vrot.slane %v990_v13, 7  ;;  %v997_v39 = vshrl.u32 %v947_v4, 16 }
  0x4e   : > { %529 = vrot.lane.b32.xlu0 %v503_v49, %s1730_s30  ;;  %v627_v49 = vsel %vm1885_vm11, %v618_v22, %v2121_v7  ;;  %v891_v22 = vrot.slane %v2138_v41, 6 }
  0x4f   : > { %v286_v35 = vrot.slane %v284_v44, 4  ;;  %v949_v44 = vld [vmem:[%s1785_s21 + $0x20] sm:$0xf]  ;;  %v993_v26 = vor.u32 %v992_v25, %v989_v17  ;;  %v1039_v25 = vrot.slane %v1037_v46, 6 }
  0x50   : > { %v1020_v13 = vshll.u32 %v949_v44, 16  ;;  %v1684_v46 = vld [vmem:[%s2632_s1 + $0x60] sm:$0xff]  }
  0x51   : > { %539 = vrot.lane.b32.xlu1 %v518_v6, %s1730_s30  ;;  %v648_v6 = vrot.slane %v2135_v42, 4  ;;  %v287_v28 = vor.u32 %v286_v35, %v2142_v19  ;;  %v667_v35 = vsel %vm1885_vm11, %v658_v54, %v2153_v55 }
  0x52   : > { %537 = vrot.lane.b32.xlu0 %v515_v37, %s1730_s30  ;;  %v881_v37 = vrot.slane %v879_v45, 4  ;;  %v1022_v10 = vrot.slane %v1020_v13, 7  ;;  %v1683_v45 = vld [vmem:[%s2632_s1 + $0x68] ss:$0 sps:$4 sm:$0xff]  }
  0x53   : > { %v2171_v34 = vrot.slane %v287_v28, 4  ;;  %v657_v41 = vsel %vm1885_vm11, %v648_v6, %v656_v16  ;;  %v894_v28 = vrot.slane %v2162_v14, 6  ;;  %v999_v16 = vrot.slane %v997_v39, 6  ;;  %v197_v13 = vld [vmem:[%s1785_s21 + $0x8] sm:$0xf] }
  0x54   : > { %v883_v54 = vsel %vm1787_vm4, %v881_v37, %v882_v11  ;;  %v1002_v6 = vrot.slane %v1000_v50, 7  ;;  %v995_v37 = vrot.slane %v993_v26, 4  ;;  %v1042_v39 = vrot.slane %v1040_v40, 7  ;;  %208 = vst.msk [vmem:[#allocation2 + $0x10] sm:$0xf] %vm205_vm2, %v197_v13 }
  0x55   : > { %694 = vrot.lane.b32.xlu1 %v627_v49, %s1732_s11  ;;  %v1017_v49 = vshrl.u32 %v949_v44, 16  ;;  %v293_v4 = vsel %vm1858_vm10, %v2171_v34, %v1979_v36  ;;  %v1029_v44 = vrot.slane %v1027_v32, 6  ;;  %v985_v32 = vrot.slane %v1934_v59, 4 }
  0x56   : > { %692 = vrot.lane.b32.xlu0 %v617_v5, %s1732_s11  ;;  %v893_v5 = vrot.slane %v891_v22, 4  ;;  %v2205_v47 = vor.u32 %v1002_v6, %v999_v16  ;;  %v1391_v40 = vsel %vm1389_vm3, %v1683_v45, 0  ;;  %v225_v6 = vld [vmem:[%s1785_s21 + $0x24] sm:$0xf]  ;;  %v201_v45 = vld [vmem:[%s1785_s21 + $0x18] sm:$0xf] }
  0x57   : > { %v1019_v18 = vrot.slane %v1017_v49, 6  ;;  %v1033_v17 = vor.u32 %v1032_v62, %v1029_v44  ;;  %v198_v49 = vld [vmem:[%s1785_s21 + $0xc] sm:$0xf]  ;;  %v1139_v62 = vrot.slane %v1109_v48, 7  ;;  %1414 = vmatpush2.bf16.msra.mxu0 %v1391_v40  ;;  %1634 = vmatpush2.bf16.msra.mxu1 %v1391_v40  ;;  %v314_v44 = vshrl.u32 %v1976_v30, 16 }
  0x58   : > { %v895_v33 = vsel %vm1787_vm4, %v893_v5, %v894_v28  ;;  %209 = vst.msk [vmem:[#allocation2 + $0x18] sm:$0xf] %vm205_vm2, %v198_v49  ;;  %v1004_v59 = vsel %vm1946_vm15, %v995_v37, %v2205_v47  ;;  %v274_v5 = vshrl.u32 %v1937_v60, 16  ;;  %1415 = vmatprep.subr.bf16.mxu0 %v1727_v0  ;;  %1621 = vmatprep.subr.bf16.mxu1 %v1727_v0  ;;  %v202_v37 = vld [vmem:[%s1785_s21 + $0x1c] sm:$0xf]  ;;  %v1138_v49 = vrot.slane %v1136_v56, 4 }
  0x59   : > { %702 = vrot.lane.b32.xlu1 %v667_v35, %s1732_s11  ;;  %v890_v35 = vrot.slane %v888_v15, 4  ;;  %213 = vst.msk [vmem:[#allocation2 + $0x38] sm:$0xf] %vm205_vm2, %v202_v37  ;;  %212 = vst.msk [vmem:[#allocation2 + $0x30] sm:$0xf] %vm205_vm2, %v201_v45  ;;  %v316_v45 = vrot.slane %v314_v44, 4 }
  0x5a   : > { %700 = vrot.lane.b32.xlu0 %v657_v41, %s1732_s11  ;;  %v2210_v41 = vor.u32 %v1022_v10, %v1019_v18  ;;  %v1035_v10 = vrot.slane %v1033_v17, 4  ;;  %v2228_v18 = vor.u32 %v1042_v39, %v1039_v25  ;;  %v1141_v25 = vrot.slane %v1139_v62, 4  ;;  %v226_v37 = vld [vmem:[%s1785_s21 + $0x28] sm:$0x1] }
  0x5b   : > { %v892_v50 = vsel %vm1787_vm4, %v890_v35, %v891_v22  ;;  %v2231_v22 = vld [vmem:[%s1785_s21 + $0x24] sm:$0xf]  ;;  %v2241_v35 = vld [vmem:[%s1785_s21 + $0x28] sm:$0xf]  ;;  %v320_v39 = vshll.u32 %v225_v6, 16  ;;  %1416 = vmatpush2.bf16.msra.mxu0 %v1684_v46  ;;  %v276_v40 = vrot.slane %v274_v5, 4  ;;  %1635 = vmatpush2.bf16.msra.mxu1 %v1684_v46 }
  0x5c   : > { %v1025_v16 = vrot.slane %v2210_v41, 4  ;;  %v1044_v30 = vsel %vm1946_vm15, %v1035_v10, %v2228_v18  ;;  %1417 = vmatprep.subr.bf16.mxu0 %v1727_v0  ;;  %1622 = vmatprep.subr.bf16.mxu1 %v1727_v0  ;;  %v200_v10 = vld [vmem:[%s1785_s21 + $0x14] sm:$0xf]  ;;  %v199_v5 = vld [vmem:[%s1785_s21 + $0x10] sm:$0xf]  ;;  %v330_v44 = vshll.u32 %v226_v37, 16 }
  0x5d   : > { %908 = vrot.lane.b32.xlu1 %v883_v54, %s1733_s18  ;;  %v994_v54 = vsel %vm1946_vm15, %v985_v32, %v993_v26  ;;  %v1151_v26 = vrot.slane %v2231_v22, 7  ;;  %v1685_v32 = vld [vmem:[%s2632_s1 + $0x58] sm:$0xff]   ;;  %v1686_v46 = vld [vmem:[%s2632_s1 + $0x50] sm:$0xff]   ;;  %211 = vst.msk [vmem:[#allocation2 + $0x28] sm:$0xf] %vm205_vm2, %v200_v10  ;;  %v2655_v36 = vrot.slane %v2012_v61, 5 }
  0x5e   : > { %906 = vrot.lane.b32.xlu0 %v880_v29, %s1733_s18  ;;  %v2218_v29 = vld [vmem:[%s1785_s21 + $0x18] sm:$0xf]  ;;  %v1034_v48 = vsel %vm1946_vm15, %v1025_v16, %v1033_v17  ;;  %v322_v17 = vrot.slane %v320_v39, 5  ;;  %210 = vst.msk [vmem:[#allocation2 + $0x20] sm:$0xf] %vm205_vm2, %v199_v5  ;;  %v1687_v39 = vld [vmem:[%s2632_s1 + $0x48] sm:$0xff]  }
  0x5f   : > { %v1142_v60 = vrot.slane %v2218_v29, 7  ;;  %v1153_v56 = vrot.slane %v1151_v26, 4  ;;  %1418 = vmatpush2.bf16.msra.mxu0 %v1685_v32  ;;  %1636 = vmatpush2.bf16.msra.mxu1 %v1685_v32  ;;  %v332_v10 = vrot.slane %v330_v44, 5  ;;  %v2656_v37 = vrot.slane %v2025_v8, 5  ;;  %v477_v8 = vld [vmem:[%s1785_s21 + $0x18] sm:$0xf] }
  0x60   : > { %1419 = vmatprep.subr.bf16.mxu0 %v1727_v0  ;;  %1623 = vmatprep.subr.bf16.mxu1 %v1727_v0  ;;  %v2657_v44 = vrot.slane %v2042_v21, 6  ;;  %v896_v63 = vrot.slane %v894_v28, 4 }
  0x61   : > { %916 = vrot.lane.b32.xlu1 %v895_v33, %s1733_s18  ;;  %v2244_v33 = vld [vmem:[%s1785_s21 + $0x20] sm:$0xf]  ;;  %v1143_v38 = vsel %vm1968_vm1, %v1141_v25, %v1142_v60 }
  0x62   : > { %914 = vrot.lane.b32.xlu0 %v892_v50, %s1733_s18  ;;  %v324_v50 = vshrl.u32 %v225_v6, 16  ;;  %v1148_v13 = vrot.slane %v2244_v33, 7  ;;  %v277_v6 = vor.u32 %v276_v40, %v1986_v53  ;;  %v203_v25 = vld [vmem:[%s1785_s21 + $0x20] sm:$0xf] }
  0x63   : > { %214 = vst.msk [vmem:[#allocation2 + $0x40] sm:$0xf] %vm205_vm2, %v203_v25  ;;  %1420 = vmatpush2.bf16.msra.mxu0 %v1686_v46  ;;  %1637 = vmatpush2.bf16.msra.mxu1 %v1686_v46 }
  0x64   : > { %v326_v22 = vrot.slane %v324_v50, 4  ;;  %v1150_v16 = vrot.slane %v1148_v13, 4  ;;  %v278_v32 = vrot.slane %v277_v6, 4  ;;  %1421 = vmatprep.subr.bf16.mxu0 %v1727_v0  ;;  %1624 = vmatprep.subr.bf16.mxu1 %v1727_v0  ;;  %v734_v6 = vld [vmem:[%s1785_s21 + $0x18] sm:$0xf] }
  0x65   : > { %1071 = vrot.lane.b32.xlu1 %v1004_v59, %s1734_s19  ;;  %v1154_v59 = vrot.slane %v2241_v35, 7 }
  0x66   : > { %1069 = vrot.lane.b32.xlu0 %v994_v54, %s1734_s19  ;;  %v1140_v54 = vsel %vm1968_vm1, %v1138_v49, %v1139_v62  ;;  %v327_v62 = vor.u32 %v326_v22, %v322_v17  ;;  %v1152_v50 = vsel %vm1968_vm1, %v1150_v16, %v1151_v26  ;;  %v380_v49 = vld [vmem:[%s1785_s21 + $0x14] sm:$0xf]  ;;  %v1688_v26 = vld [vmem:[%s2632_s1 + $0x40] sm:$0xff]   ;;  %v385_v16 = vld [vmem:[%s1785_s21 + $0x28] sm:$0x1] }
  0x67   : > { %v1155_v53 = vsel %vm1968_vm1, %v1153_v56, %v1154_v59  ;;  %1422 = vmatpush2.bf16.msra.mxu0 %v1687_v39  ;;  %v384_v22 = vld [vmem:[%s1785_s21 + $0x24] sm:$0xf]  ;;  %1638 = vmatpush2.bf16.msra.mxu1 %v1687_v39  ;;  %v767_v39 = vrot.slane %v2657_v44, 4 }
  0x68   : > { %v328_v40 = vrot.slane %v327_v62, 4  ;;  %1423 = vmatprep.subr.bf16.mxu0 %v1727_v0  ;;  %1625 = vmatprep.subr.bf16.mxu1 %v1727_v0  ;;  %v426_v5 = vrot.slane %v384_v22, 5  ;;  %v413_v0 = vrot.slane %v411_v3, 4 }
  0x69   : > { %1079 = vrot.lane.b32.xlu1 %v1044_v30, %s1734_s19  ;;  %v204_v30 = vld [vmem:[%s1785_s21 + $0x24] sm:$0xf] }
  0x6a   : > { %1077 = vrot.lane.b32.xlu0 %v1034_v48, %s1734_s19  ;;  %215 = vst.msk [vmem:[#allocation2 + $0x48] sm:$0xf] %vm205_vm2, %v204_v30  ;;  %v317_v48 = vor.u32 %v316_v45, %v2003_v52  ;;  %v283_v52 = vsel %vm1858_vm10, %v278_v32, %v2142_v19  ;;  %v333_v19 = vsel %vm1858_vm10, %v328_v40, %v332_v10  ;;  %v428_v51 = vrot.slane %v426_v5, 4 }
  0x6b   : > { %1424 = vmatpush2.bf16.msra.mxu0 %v1688_v26  ;;  %1639 = vmatpush2.bf16.msra.mxu1 %v1688_v26  ;;  %v425_v45 = vrot.slane %v2656_v37, 4  ;;  %v780_v30 = vrot.slane %v738_v57, 6  ;;  %v508_v10 = vrot.slane %v477_v8, 5  ;;  %v482_v57 = vld [vmem:[%s1785_s21 + $0x2c] sm:$0x1] }
  0x6c   : > { %v318_v56 = vrot.slane %v317_v48, 4  ;;  %v523_v44 = vrot.slane %v482_v57, 5 }
  0x6d   : > { %1168 = vrot.lane.b32.xlu1 %v1143_v38, %s1735_s20  ;;  %v414_v38 = vrot.slane %v380_v49, 5  ;;  %v427_v62 = vsel %vm1797_vm7, %v425_v45, %v426_v5  ;;  %v782_v32 = vrot.slane %v780_v30, 4  ;;  %v2658_v49 = vrot.slane %v2045_v24, 6 }
  0x6e   : > { %1166 = vrot.lane.b32.xlu0 %v1140_v54, %s1735_s20  ;;  %v323_v54 = vsel %vm1858_vm10, %v318_v56, %v322_v17  ;;  %v768_v17 = vrot.slane %v734_v6, 6  ;;  %v2659_v56 = vrot.slane %v2055_v31, 6  ;;  %vm815_vm10 = vcmask 982016  }
  0x6f   : > { %v416_v46 = vrot.slane %v414_v38, 4  ;;  %v415_v3 = vsel %vm1797_vm7, %v413_v0, %v414_v38  ;;  %v510_v0 = vrot.slane %v508_v10, 4 }
  0x70   : > { %v770_v25 = vrot.slane %v768_v17, 4  ;;  %v769_v21 = vsel %vm1787_vm4, %v767_v39, %v768_v17  ;;  %v779_v22 = vrot.slane %v2659_v56, 4 }
  0x71   : > { %1176 = vrot.lane.b32.xlu1 %v1155_v53, %s1735_s20  ;;  %v418_v34 = vsel %vm1797_vm7, %v416_v46, %v2655_v36  ;;  %v739_v53 = vld [vmem:[%s1785_s21 + $0x2c] sm:$0x3] }
  0x72   : > { %1174 = vrot.lane.b32.xlu0 %v1152_v50, %s1735_s20  ;;  %v571_v50 = vld [vmem:[%s1785_s21 + $0x18] sm:$0xf]  ;;  %v783_v48 = vrot.slane %v739_v53, 6  ;;  %v772_v40 = vsel %vm1787_vm4, %v770_v25, %v2658_v49  ;;  %v2661_v53 = vrot.slane %v2079_v27, 5 }
  0x73   : > { %v630_v38 = vshrl.u32 %v571_v50, 16  ;;  %v633_v26 = vshll.u32 %v571_v50, 16  ;;  %v2662_v50 = vrot.slane %v2087_v58, 5 }
  0x74   : > { %v784_v24 = vsel %vm1787_vm4, %v782_v32, %v783_v48 }
  0x75   : > { %344 = vrot.lane.b32.xlu1 %v293_v4, %s1731_s6  ;;  %v429_v4 = vrot.slane %v385_v16, 5  ;;  %v632_v6 = vrot.slane %v630_v38, 5  ;;  %v635_v36 = vrot.slane %v633_v26, 6  ;;  %v519_v32 = vrot.slane %v2662_v50, 4  ;;  %v2396_v26 = vld [vmem:[%s1785_s21 + $0x1c] sm:$0xf] }
  0x76   : > { %342 = vrot.lane.b32.xlu0 %v283_v52, %s1731_s6  ;;  %v575_v52 = vld [vmem:[%s1785_s21 + $0x28] sm:$0xf] }
  0x77   : > { %v430_v61 = vsel %vm1797_vm7, %v428_v51, %v429_v4  ;;  %v670_v46 = vshrl.u32 %v575_v52, 16  ;;  %v673_v5 = vshll.u32 %v575_v52, 16  ;;  %v781_v51 = vsel %vm1787_vm4, %v779_v22, %v780_v30 }
  0x78   : > { %v2660_v4 = vrot.slane %v2065_v43, 5  ;;  %v636_v43 = vor.u32 %v635_v36, %v632_v6  ;;  %v668_v6 = vrot.slane %v2153_v55, 4  ;;  %v952_v36 = vld [vmem:[%s1785_s21 + $0x2c] sm:$0xf] }
  0x79   : > { %352 = vrot.lane.b32.xlu1 %v333_v19, %s1731_s6  ;;  %v481_v19 = vld [vmem:[%s1785_s21 + $0x28] sm:$0xf]  ;;  %v675_v37 = vrot.slane %v673_v5, 6 }
  0x7a   : > { %350 = vrot.lane.b32.xlu0 %v323_v54, %s1731_s6  ;;  %v520_v16 = vrot.slane %v481_v19, 5  ;;  %v507_v17 = vrot.slane %v2660_v4, 4  ;;  %v638_v38 = vrot.slane %v636_v43, 4 }
  0x7c   : > { %v522_v30 = vrot.slane %v520_v16, 4  ;;  %v509_v8 = vsel %vm1797_vm7, %v507_v17, %v508_v10  ;;  %v521_v58 = vsel %vm1797_vm7, %v519_v32, %v520_v16  ;;  %v628_v10 = vrot.slane %v2121_v7, 4  ;;  %v2411_v7 = vld [vmem:[%s1785_s21 + $0x2c] sm:$0xf]  ;;  %v859_v17 = vld [vmem:[%s1785_s21 + $0x30] sm:$0x3] }
  0x7d   : > { %441 = vrot.lane.b32.xlu1 %v418_v34, %s1729_s27  ;;  %v576_v34 = vld [vmem:[%s1785_s21 + $0x2c] sm:$0x3]  ;;  %v647_v9 = vsel %vm1885_vm11, %v638_v38, %v2135_v42  ;;  %v897_v55 = vrot.slane %v2411_v7, 6  ;;  %v1045_v7 = vrot.slane %v2228_v18, 4  ;;  %v1144_v18 = vrot.slane %v1142_v60, 4 }
  0x7e   : > { %439 = vrot.lane.b32.xlu0 %v415_v3, %s1729_s27  ;;  %v672_v3 = vrot.slane %v670_v46, 5  ;;  %v680_v45 = vshrl.u32 %v576_v34, 16  ;;  %v637_v16 = vsel %vm1885_vm11, %v628_v10, %v636_v43  ;;  %v1005_v10 = vrot.slane %v2205_v47, 4 }
  0x7f   : > { %v899_v20 = vrot.slane %v897_v55, 4  ;;  %v898_v28 = vsel %vm1787_vm4, %v896_v63, %v897_v55  ;;  %v1156_v60 = vrot.slane %v1154_v59, 4 }
  0x80   : > { %v676_v48 = vor.u32 %v675_v37, %v672_v3  ;;  %v682_v49 = vrot.slane %v680_v45, 5  ;;  %v953_v45 = vld [vmem:[%s1785_s21 + $0x30] sm:$0x7] }
  0x81   : > { %449 = vrot.lane.b32.xlu1 %v430_v61, %s1729_s27  ;;  %v683_v61 = vshll.u32 %v576_v34, 16 }
  0x82   : > { %447 = vrot.lane.b32.xlu0 %v427_v62, %s1729_s27  ;;  %v512_v62 = vsel %vm1797_vm7, %v510_v0, %v2661_v53  ;;  %v678_v22 = vrot.slane %v676_v48, 4 }
  0x83   : > { %v685_v27 = vrot.slane %v683_v61, 6  ;;  %v1047_v61 = vshrl.u32 %v952_v36, 16 }
  0x85   : > { %795 = vrot.lane.b32.xlu1 %v772_v40, %s1728_s24  ;;  %v524_v40 = vsel %vm1797_vm7, %v522_v30, %v523_v44  ;;  %v686_v19 = vor.u32 %v685_v27, %v682_v49  ;;  %vm836_vm7 = vcmask 1044416   ;;  %v884_v30 = vrot.slane %v882_v11, 4 }
  0x86   : > { %793 = vrot.lane.b32.xlu0 %v769_v21, %s1728_s24  ;;  %v2373_v54 = vpop.permute.xlu0 %785  ;;  %v948_v21 = vld [vmem:[%s1785_s21 + $0x1c] sm:$0xf]  ;;  %vm2429_vm13 = vmor %vm837_vm9, %vm836_vm7  ;;  %v1057_v11 = vshrl.u32 %v953_v45, 16  ;;  %v1049_v50 = vrot.slane %v1047_v61, 6 }
  0x87   : > { %v432_v31 = vpop.permute.xlu1 %431  ;;  %v1007_v46 = vshrl.u32 %v948_v21, 16  ;;  %v1010_v5 = vshll.u32 %v948_v21, 16  ;;  %v1111_v21 = vld [vmem:[%s1785_s21 + $0x1c] sm:$0xf] }
  0x89   : > { %803 = vrot.lane.b32.xlu1 %v784_v24, %s1728_s24  ;;  %v885_v24 = vrot.slane %v2396_v26, 6  ;;  %v1009_v3 = vrot.slane %v1007_v46, 6  ;;  %v1012_v37 = vrot.slane %v1010_v5, 7  ;;  %v1115_v46 = vld [vmem:[%s1785_s21 + $0x2c] sm:$0xf] }
  0x8a   : > { %801 = vrot.lane.b32.xlu0 %v781_v51, %s1728_s24  ;;  %v526_v25 = vpop.permute.xlu0 %525  ;;  %v687_v51 = vsel %vm1885_vm11, %v678_v22, %v686_v19 }
  0x8b   : > { %v434_v39 = vpop.permute.xlu1 %433  ;;  %v887_v4 = vrot.slane %v885_v24, 4  ;;  %v886_v27 = vsel %vm1787_vm4, %v884_v30, %v885_v24  ;;  %v1145_v24 = vrot.slane %v1111_v21, 7 }
  0x8d   : > { %535 = vrot.lane.b32.xlu1 %v512_v62, %s1730_s30  ;;  %v677_v62 = vsel %vm1885_vm11, %v668_v6, %v676_v48  ;;  %v889_v12 = vsel %vm1787_vm4, %v887_v4, %v888_v15  ;;  %v1060_v48 = vshll.u32 %v953_v45, 16  ;;  %vm1095_vm11 = vcmask 519488  }
  0x8e   : > { %533 = vrot.lane.b32.xlu0 %v509_v8, %s1730_s30  ;;  %v1146_v29 = vsel %vm1968_vm1, %v1144_v18, %v1145_v24 }
  0x8f   : > { %v788_v52 = vpop.permute.xlu1 %787 }
  0x90   : > { %v335_v56 = vpop.permute.xlu0 %334  ;;  %v806_v34 = vrot.slane %v788_v52, 4 }
  0x91   : > { %365 = vst.msk [vmem:[#allocation2] sm:$0xf] %vm364_vm5, %v335_v56  ;;  %543 = vrot.lane.b32.xlu1 %v524_v40, %s1730_s30 }
  0x92   : > { %462 = vst.msk [vmem:[#allocation2] sm:$0xf] %vm461_vm6, %v432_v31  ;;  %541 = vrot.lane.b32.xlu0 %v521_v58, %s1730_s30  ;;  %v805_v31 = vrot.slane %v2373_v54, 4  ;;  %v817_v44 = vsel %vm815_vm10, %v806_v34, %v788_v52  ;;  %v1059_v52 = vrot.slane %v1057_v11, 6  ;;  %v1062_v58 = vrot.slane %v1060_v48, 7 }
  0x93   : > { %v528_v0 = vpop.permute.xlu1 %527  ;;  %556 = vst.msk [vmem:[#allocation2] sm:$0xf] %vm555_vm8, %v526_v25  ;;  %v1050_v25 = vshll.u32 %v952_v36, 16  ;;  %v1116_v34 = vld [vmem:[%s1785_s21 + $0x30] sm:$0x7]  ;;  %s1641_s21 = smul.u32 80, %s2670_s12 }
  0x94   : > { %v337_v42 = vpop.permute.xlu0 %336  ;;  %v816_v8 = vsel %vm815_vm10, %v805_v31, %v2373_v54  ;;  %v1013_v54 = vor.u32 %v1012_v37, %v1009_v3  ;;  %v1063_v19 = vor.u32 %v1062_v58, %v1059_v52 }
  0x95   : > { %366 = vst.msk [vmem:[#allocation2 + $0x8] sm:$0xf] %vm364_vm5, %v337_v42  ;;  %698 = vrot.lane.b32.xlu1 %v647_v9, %s1732_s11  ;;  %v1052_v32 = vrot.slane %v1050_v25, 7 }
  0x96   : > { %463 = vst.msk [vmem:[#allocation2 + $0x8] sm:$0xf] %vm461_vm6, %v434_v39  ;;  %696 = vrot.lane.b32.xlu0 %v637_v16, %s1732_s11  ;;  %v900_v39 = vrot.slane %v859_v17, 6  ;;  %v1015_v38 = vrot.slane %v1013_v54, 4  ;;  %v1014_v9 = vsel %vm1946_vm15, %v1005_v10, %v1013_v54  ;;  %v1157_v16 = vrot.slane %v1115_v46, 7 }
  0x97   : > { %v691_v53 = vpop.permute.xlu1 %690  ;;  %557 = vst.msk [vmem:[#allocation2 + $0x8] sm:$0xf] %vm555_vm8, %v528_v0  ;;  %v1053_v26 = vor.u32 %v1052_v32, %v1049_v50  ;;  %v1147_v0 = vrot.slane %v1145_v24, 4 }
  0x98   : > { %720 = vst.msk [vmem:[#allocation2 + $0x8] sm:$0xf] %vm718_vm12, %v691_v53  ;;  %v689_v43 = vpop.permute.xlu0 %688  ;;  %v901_v40 = vsel %vm1787_vm4, %v899_v20, %v900_v39  ;;  %v1024_v22 = vsel %vm1946_vm15, %v1015_v38, %v2210_v41  ;;  %v1159_v1 = vrot.slane %v1157_v16, 4  ;;  %vm1373_vm4 = vcmask 719872  }
  0x99   : > { %719 = vst.msk [vmem:[#allocation2] sm:$0xf] %vm718_vm12, %v689_v43  ;;  %706 = vrot.lane.b32.xlu1 %v687_v51, %s1732_s11  ;;  %v1055_v2 = vrot.slane %v1053_v26, 4  ;;  %v1054_v36 = vsel %vm1946_vm15, %v1045_v7, %v1053_v26  ;;  %v1149_v31 = vsel %vm1968_vm1, %v1147_v0, %v1148_v13  ;;  %v1160_v51 = vrot.slane %v1116_v34, 7 }
  0x9a   : > { %840 = vst.msk [vmem:[#allocation2 + $0x8] sm:$0xff] %vm2429_vm13, %v817_v44  ;;  %704 = vrot.lane.b32.xlu0 %v677_v62, %s1732_s11  ;;  %839 = vst.msk [vmem:[#allocation2] sm:$0xff] %vm2429_vm13, %v816_v8  ;;  %v1158_v35 = vsel %vm1968_vm1, %v1156_v60, %v1157_v16  ;;  %s2600_s11 = scalar_lea.vmem %s2634_s3, %s1641_s21 }
  0x9b   : > { %v905_v49 = vpop.permute.xlu1 %904  ;;  %v1064_v41 = vsel %vm1946_vm15, %v1055_v2, %v1063_v19  ;;  %v1161_v33 = vsel %vm1968_vm1, %v1159_v1, %v1160_v51  ;;  %vm1476_vm15 = vcmask 130048  }
  0x9c   : > { %934 = vst.msk [vmem:[#allocation2 + $0xc] sm:$0xf] %vm932_vm14, %v905_v49  ;;  %v903_v15 = vpop.permute.xlu0 %902 }
  0x9d   : > { %933 = vst.msk [vmem:[#allocation2 + $0x4] sm:$0xf] %vm932_vm14, %v903_v15  ;;  %912 = vrot.lane.b32.xlu1 %v889_v12, %s1733_s18 }
  0x9e   : > { %910 = vrot.lane.b32.xlu0 %v886_v27, %s1733_s18 }
  0x9f   : > { %v1068_v14 = vpop.permute.xlu1 %1067 }
  0xa0   : > { %1097 = vst.msk [vmem:[#allocation2 + $0xc] sm:$0xf] %vm1095_vm11, %v1068_v14  ;;  %v1066_v56 = vpop.permute.xlu0 %1065 }
  0xa1   : > { %1096 = vst.msk [vmem:[#allocation2 + $0x4] sm:$0xf] %vm1095_vm11, %v1066_v56  ;;  %920 = vrot.lane.b32.xlu1 %v901_v40, %s1733_s18  ;;  %v1689_v55 = vld [vmem:[#allocation2] ss:$8 sps:$4 sm:$0xff]  }
  0xa2   : > { %918 = vrot.lane.b32.xlu0 %v898_v28, %s1733_s18 }
  0xa3   : > { %v1165_v47 = vpop.permute.xlu1 %1164 }
  0xa4   : > { %1194 = vst.msk [vmem:[#allocation2 + $0xc] sm:$0xf] %vm1192_vm0, %v1165_v47  ;;  %v1163_v5 = vpop.permute.xlu0 %1162 }
  0xa5   : > { %1193 = vst.msk [vmem:[#allocation2 + $0x4] sm:$0xf] %vm1192_vm0, %v1163_v5  ;;  %1075 = vrot.lane.b32.xlu1 %v1024_v22, %s1734_s19 }
  0xa6   : > { %1073 = vrot.lane.b32.xlu0 %v1014_v9, %s1734_s19 }
  0xa7   : > { %v341_v6 = vpop.permute.xlu1 %340 }
  0xa8   : > { %368 = vst.msk [vmem:[#allocation2 + $0x18] sm:$0xf] %vm364_vm5, %v341_v6  ;;  %v339_v42 = vpop.permute.xlu0 %338 }
  0xa9   : > { %367 = vst.msk [vmem:[#allocation2 + $0x10] sm:$0xf] %vm364_vm5, %v339_v42  ;;  %1083 = vrot.lane.b32.xlu1 %v1064_v41, %s1734_s19 }
  0xaa   : > { %1081 = vrot.lane.b32.xlu0 %v1054_v36, %s1734_s19 }
  0xab   : > { %v349_v4 = vpop.permute.xlu1 %348 }
  0xac   : > { %372 = vst.msk [vmem:[#allocation2 + $0x38] sm:$0xf] %vm364_vm5, %v349_v4  ;;  %v347_v17 = vpop.permute.xlu0 %346  ;;  %v1691_v3 = vld [vmem:[#allocation2 + $0x4] ss:$8 sps:$4 sm:$0xff]  }
  0xad   : > { %371 = vst.msk [vmem:[#allocation2 + $0x30] sm:$0xf] %vm364_vm5, %v347_v17  ;;  %1172 = vrot.lane.b32.xlu1 %v1149_v31, %s1735_s20  ;;  %1605 = vmatprep.mubr.msk.bf16.mxu0 %vm1373_vm4, %v1691_v3 }
  0xae   : > { %1170 = vrot.lane.b32.xlu0 %v1146_v29, %s1735_s20  ;;  %1426 = vmatmul.mubr.bf16.vlgmr.msra.gmra.mxu0 %v1689_v55 }
  0xaf   : > { %v438_v13 = vpop.permute.xlu1 %437 }
  0xb0   : > { %465 = vst.msk [vmem:[#allocation2 + $0x18] sm:$0xf] %vm461_vm6, %v438_v13  ;;  %v436_v59 = vpop.permute.xlu0 %435 }
  0xb1   : > { %464 = vst.msk [vmem:[#allocation2 + $0x10] sm:$0xf] %vm461_vm6, %v436_v59  ;;  %1180 = vrot.lane.b32.xlu1 %v1161_v33, %s1735_s20 }
  0xb2   : > { %1178 = vrot.lane.b32.xlu0 %v1158_v35, %s1735_s20 }
  0xb3   : > { %v446_v37 = vpop.permute.xlu1 %445 }
  0xb4   : > { %469 = vst.msk [vmem:[#allocation2 + $0x38] sm:$0xf] %vm461_vm6, %v446_v37  ;;  %v444_v45 = vpop.permute.xlu0 %443 }
  0xb5   : > { %468 = vst.msk [vmem:[#allocation2 + $0x30] sm:$0xf] %vm461_vm6, %v444_v45 }
  0xb7   : > { %v792_v61 = vpop.permute.xlu1 %791 }
  0xb8   : > { %v790_v25 = vpop.permute.xlu0 %789  ;;  %v808_v43 = vrot.slane %v792_v61, 4 }
  0xb9   : > { %v807_v8 = vrot.slane %v790_v25, 4 }
  0xba   : > { %v819_v20 = vsel %vm815_vm10, %v808_v43, %v792_v61 }
  0xbb   : > { %v800_v53 = vpop.permute.xlu1 %799  ;;  %v818_v50 = vsel %vm815_vm10, %v807_v8, %v790_v25 }
  0xbc   : > { %v798_v23 = vpop.permute.xlu0 %797  ;;  %v812_v11 = vrot.slane %v800_v53, 4 }
  0xbd   : > { %v811_v32 = vrot.slane %v798_v23, 4 }
  0xbe   : > { %v823_v49 = vsel %vm815_vm10, %v812_v11, %v800_v53 }
  0xbf   : > { %v532_v62 = vpop.permute.xlu1 %531  ;;  %v822_v63 = vsel %vm815_vm10, %v811_v32, %v798_v23 }
  0xc0   : > { %559 = vst.msk [vmem:[#allocation2 + $0x18] sm:$0xf] %vm555_vm8, %v532_v62  ;;  %v530_v30 = vpop.permute.xlu0 %529 }
  0xc1   : > { %558 = vst.msk [vmem:[#allocation2 + $0x10] sm:$0xf] %vm555_vm8, %v530_v30 }
  0xc3   : > { %v540_v44 = vpop.permute.xlu1 %539 }
  0xc4   : > { %563 = vst.msk [vmem:[#allocation2 + $0x38] sm:$0xf] %vm555_vm8, %v540_v44  ;;  %v538_v39 = vpop.permute.xlu0 %537 }
  0xc5   : > { %562 = vst.msk [vmem:[#allocation2 + $0x30] sm:$0xf] %vm555_vm8, %v538_v39 }
  0xc7   : > { %v695_v12 = vpop.permute.xlu1 %694 }
  0xc8   : > { %722 = vst.msk [vmem:[#allocation2 + $0x18] sm:$0xf] %vm718_vm12, %v695_v12  ;;  %v693_v54 = vpop.permute.xlu0 %692 }
  0xc9   : > { %842 = vst.msk [vmem:[#allocation2 + $0x18] sm:$0xff] %vm2429_vm13, %v819_v20 }
  0xca   : > { %721 = vst.msk [vmem:[#allocation2 + $0x10] sm:$0xf] %vm718_vm12, %v693_v54 }
  0xcb   : > { %841 = vst.msk [vmem:[#allocation2 + $0x10] sm:$0xff] %vm2429_vm13, %v818_v50  ;;  %v703_v48 = vpop.permute.xlu1 %702 }
  0xcc   : > { %726 = vst.msk [vmem:[#allocation2 + $0x38] sm:$0xf] %vm718_vm12, %v703_v48  ;;  %v701_v27 = vpop.permute.xlu0 %700 }
  0xcd   : > { %846 = vst.msk [vmem:[#allocation2 + $0x38] sm:$0xff] %vm2429_vm13, %v823_v49 }
  0xce   : > { %725 = vst.msk [vmem:[#allocation2 + $0x30] sm:$0xf] %vm718_vm12, %v701_v27  ;;  %v1580_v27 = vld [vmem:[%s2633_s2] ss:$0 sm:$0xff] }
  0xcf   : > { %845 = vst.msk [vmem:[#allocation2 + $0x30] sm:$0xff] %vm2429_vm13, %v822_v63  ;;  %v909_v15 = vpop.permute.xlu1 %908 }
  0xd0   : > { %936 = vst.msk [vmem:[#allocation2 + $0x1c] sm:$0xf] %vm932_vm14, %v909_v15  ;;  %v907_v40 = vpop.permute.xlu0 %906 }
  0xd1   : > { %935 = vst.msk [vmem:[#allocation2 + $0x14] sm:$0xf] %vm932_vm14, %v907_v40 }
  0xd3   : > { %v917_v38 = vpop.permute.xlu1 %916 }
  0xd4   : > { %940 = vst.msk [vmem:[#allocation2 + $0x3c] sm:$0xf] %vm932_vm14, %v917_v38  ;;  %v915_v26 = vpop.permute.xlu0 %914 }
  0xd5   : > { %939 = vst.msk [vmem:[#allocation2 + $0x34] sm:$0xf] %vm932_vm14, %v915_v26 }
  0xd6   : > { %v1694_v41 = vld [vmem:[#allocation2 + $0x30] ss:$8 sps:$4 sm:$0xff]  }
  0xd7   : > { %v1072_v52 = vpop.permute.xlu1 %1071 }
  0xd8   : > { %1099 = vst.msk [vmem:[#allocation2 + $0x1c] sm:$0xf] %vm1095_vm11, %v1072_v52  ;;  %v1070_v58 = vpop.permute.xlu0 %1069 }
  0xd9   : > { %1098 = vst.msk [vmem:[#allocation2 + $0x14] sm:$0xf] %vm1095_vm11, %v1070_v58 }
  0xdb   : > { %v1080_v14 = vpop.permute.xlu1 %1079 }
  0xdc   : > { %1103 = vst.msk [vmem:[#allocation2 + $0x3c] sm:$0xf] %vm1095_vm11, %v1080_v14  ;;  %v1078_v28 = vpop.permute.xlu0 %1077 }
  0xdd   : > { %1102 = vst.msk [vmem:[#allocation2 + $0x34] sm:$0xf] %vm1095_vm11, %v1078_v28 }
  0xdf   : > { %v1169_v10 = vpop.permute.xlu1 %1168 }
  0xe0   : > { %1196 = vst.msk [vmem:[#allocation2 + $0x1c] sm:$0xf] %vm1192_vm0, %v1169_v10  ;;  %v1167_v21 = vpop.permute.xlu0 %1166 }
  0xe1   : > { %1195 = vst.msk [vmem:[#allocation2 + $0x14] sm:$0xf] %vm1192_vm0, %v1167_v21 }
  0xe3   : > { %v1177_v56 = vpop.permute.xlu1 %1176 }
  0xe4   : > { %1200 = vst.msk [vmem:[#allocation2 + $0x3c] sm:$0xf] %vm1192_vm0, %v1177_v56  ;;  %v1175_v22 = vpop.permute.xlu0 %1174 }
  0xe5   : > { %1199 = vst.msk [vmem:[#allocation2 + $0x34] sm:$0xf] %vm1192_vm0, %v1175_v22 }
  0xe7   : > { %v345_v2 = vpop.permute.xlu1 %344  ;;  %v1206_v19 = vld [vmem:[#allocation2 + $0x18] sm:$0xff] }
  0xe8   : > { %370 = vst.msk [vmem:[#allocation2 + $0x28] sm:$0xf] %vm364_vm5, %v345_v2  ;;  %v343_v24 = vpop.permute.xlu0 %342  ;;  %v1205_v47 = vld [vmem:[#allocation2 + $0x10] sm:$0xff] }
  0xe9   : > { %v1692_v9 = vld [vmem:[#allocation2 + $0x14] ss:$8 sps:$4 sm:$0xff]   ;;  %369 = vst.msk [vmem:[#allocation2 + $0x20] sm:$0xf] %vm364_vm5, %v343_v24  ;;  %v1583_v7 = vcombine.low %v1205_v47, %v1206_v19 }
  0xea   : > { %1606 = vmatprep.mubr.msk.bf16.mxu0 %vm1373_vm4, %v1692_v9 }
  0xeb   : > { %v353_v46 = vpop.permute.xlu1 %352  ;;  %1434 = vmatmul.mubr.bf16.gmra.mxu0 %v1583_v7 }
  0xec   : > { %374 = vst.msk [vmem:[#allocation2 + $0x48] sm:$0xf] %vm364_vm5, %v353_v46  ;;  %v351_v5 = vpop.permute.xlu0 %350  ;;  %v1696_v0 = vld [vmem:[#allocation2 + $0x34] ss:$8 sps:$4 sm:$0xff]  }
  0xed   : > { %373 = vst.msk [vmem:[#allocation2 + $0x40] sm:$0xf] %vm364_vm5, %v351_v5  ;;  %1608 = vmatprep.mubr.msk.bf16.mxu1 %vm1373_vm4, %v1696_v0 }
  0xee   : > { %1450 = vmatmul.mubr.bf16.vlgmr.msra.gmra.mxu1 %v1694_v41 }
  0xef   : > { %v442_v16 = vpop.permute.xlu1 %441 }
  0xf0   : > { %467 = vst.msk [vmem:[#allocation2 + $0x28] sm:$0xf] %vm461_vm6, %v442_v16  ;;  %v440_v6 = vpop.permute.xlu0 %439 }
  0xf1   : > { %466 = vst.msk [vmem:[#allocation2 + $0x20] sm:$0xf] %vm461_vm6, %v440_v6 }
  0xf3   : > { %v450_v36 = vpop.permute.xlu1 %449 }
  0xf4   : > { %471 = vst.msk [vmem:[#allocation2 + $0x48] sm:$0xf] %vm461_vm6, %v450_v36  ;;  %v448_v18 = vpop.permute.xlu0 %447 }
  0xf5   : > { %470 = vst.msk [vmem:[#allocation2 + $0x40] sm:$0xf] %vm461_vm6, %v448_v18 }
  0xf7   : > { %v796_v34 = vpop.permute.xlu1 %795 }
  0xf8   : > { %v794_v42 = vpop.permute.xlu0 %793  ;;  %v810_v60 = vrot.slane %v796_v34, 4 }
  0xf9   : > { %v809_v55 = vrot.slane %v794_v42, 4 }
  0xfa   : > { %v821_v33 = vsel %vm815_vm10, %v810_v60, %v796_v34 }
  0xfb   : > { %v804_v31 = vpop.permute.xlu1 %803  ;;  %v820_v59 = vsel %vm815_vm10, %v809_v55, %v794_v42 }
  0xfc   : > { %v802_v1 = vpop.permute.xlu0 %801  ;;  %v814_v13 = vrot.slane %v804_v31, 4 }
  0xfd   : > { %v813_v37 = vrot.slane %v802_v1, 4 }
  0xfe   : > { %v825_v61 = vsel %vm815_vm10, %v814_v13, %v804_v31 }
  0xff   : > { %v536_v51 = vpop.permute.xlu1 %535  ;;  %v824_v53 = vsel %vm815_vm10, %v813_v37, %v802_v1 }
 0x100   : > { %561 = vst.msk [vmem:[#allocation2 + $0x28] sm:$0xf] %vm555_vm8, %v536_v51  ;;  %v534_v4 = vpop.permute.xlu0 %533 }
 0x101   : > { %560 = vst.msk [vmem:[#allocation2 + $0x20] sm:$0xf] %vm555_vm8, %v534_v4 }
 0x103   : > { %v544_v29 = vpop.permute.xlu1 %543 }
 0x104   : > { %565 = vst.msk [vmem:[#allocation2 + $0x48] sm:$0xf] %vm555_vm8, %v544_v29  ;;  %v542_v17 = vpop.permute.xlu0 %541 }
 0x105   : > { %564 = vst.msk [vmem:[#allocation2 + $0x40] sm:$0xf] %vm555_vm8, %v542_v17 }
 0x107   : > { %v699_v3 = vpop.permute.xlu1 %698 }
 0x108   : > { %724 = vst.msk [vmem:[#allocation2 + $0x28] sm:$0xf] %vm718_vm12, %v699_v3  ;;  %v697_v35 = vpop.permute.xlu0 %696 }
 0x109   : > { %844 = vst.msk [vmem:[#allocation2 + $0x28] sm:$0xff] %vm2429_vm13, %v821_v33 }
 0x10a   : > { %723 = vst.msk [vmem:[#allocation2 + $0x20] sm:$0xf] %vm718_vm12, %v697_v35 }
 0x10b   : > { %843 = vst.msk [vmem:[#allocation2 + $0x20] sm:$0xff] %vm2429_vm13, %v820_v59  ;;  %v707_v45 = vpop.permute.xlu1 %706 }
 0x10c   : > { %728 = vst.msk [vmem:[#allocation2 + $0x48] sm:$0xf] %vm718_vm12, %v707_v45  ;;  %v705_v25 = vpop.permute.xlu0 %704 }
 0x10d   : > { %848 = vst.msk [vmem:[#allocation2 + $0x48] sm:$0xff] %vm2429_vm13, %v825_v61 }
 0x10e   : > { %727 = vst.msk [vmem:[#allocation2 + $0x40] sm:$0xf] %vm718_vm12, %v705_v25 }
 0x10f   : > { %847 = vst.msk [vmem:[#allocation2 + $0x40] sm:$0xff] %vm2429_vm13, %v824_v53  ;;  %v913_v23 = vpop.permute.xlu1 %912 }
 0x110   : > { %938 = vst.msk [vmem:[#allocation2 + $0x2c] sm:$0xf] %vm932_vm14, %v913_v23  ;;  %v911_v62 = vpop.permute.xlu0 %910 }
 0x111   : > { %937 = vst.msk [vmem:[#allocation2 + $0x24] sm:$0xf] %vm932_vm14, %v911_v62 }
 0x112   : > { %v1699_v32 = vld [vmem:[#allocation2 + $0x20] ss:$8 sps:$4 sm:$0xff]  }
 0x113   : > { %v921_v30 = vpop.permute.xlu1 %920 }
 0x114   : > { %942 = vst.msk [vmem:[#allocation2 + $0x4c] sm:$0xf] %vm932_vm14, %v921_v30  ;;  %v919_v44 = vpop.permute.xlu0 %918 }
 0x115   : > { %941 = vst.msk [vmem:[#allocation2 + $0x44] sm:$0xf] %vm932_vm14, %v919_v44 }
 0x116   : > { %v1702_v49 = vld [vmem:[#allocation2 + $0x40] ss:$8 sps:$4 sm:$0xff]  }
 0x117   : > { %v1076_v43 = vpop.permute.xlu1 %1075 }
 0x118   : > { %1101 = vst.msk [vmem:[#allocation2 + $0x2c] sm:$0xf] %vm1095_vm11, %v1076_v43  ;;  %v1074_v39 = vpop.permute.xlu0 %1073 }
 0x119   : > { %1100 = vst.msk [vmem:[#allocation2 + $0x24] sm:$0xf] %vm1095_vm11, %v1074_v39 }
 0x11b   : > { %v1084_v57 = vpop.permute.xlu1 %1083 }
 0x11c   : > { %1105 = vst.msk [vmem:[#allocation2 + $0x4c] sm:$0xf] %vm1095_vm11, %v1084_v57  ;;  %v1082_v8 = vpop.permute.xlu0 %1081 }
 0x11d   : > { %1104 = vst.msk [vmem:[#allocation2 + $0x44] sm:$0xf] %vm1095_vm11, %v1082_v8 }
 0x11f   : > { %v1173_v12 = vpop.permute.xlu1 %1172 }
 0x120   : > { %1198 = vst.msk [vmem:[#allocation2 + $0x2c] sm:$0xf] %vm1192_vm0, %v1173_v12  ;;  %v1171_v20 = vpop.permute.xlu0 %1170 }
 0x121   : > { %1197 = vst.msk [vmem:[#allocation2 + $0x24] sm:$0xf] %vm1192_vm0, %v1171_v20 }
 0x123   : > { %v1181_v11 = vpop.permute.xlu1 %1180 }
 0x124   : > { %1202 = vst.msk [vmem:[#allocation2 + $0x4c] sm:$0xf] %vm1192_vm0, %v1181_v11  ;;  %v1179_v54 = vpop.permute.xlu0 %1178 }
 0x125   : > { %1201 = vst.msk [vmem:[#allocation2 + $0x44] sm:$0xf] %vm1192_vm0, %v1179_v54 }
 0x128   : > { %v1697_v50 = vld [vmem:[#allocation2 + $0x24] ss:$8 sps:$4 sm:$0xff]  }
 0x129   : > { %1607 = vmatprep.mubr.msk.bf16.mxu0 %vm1373_vm4, %v1697_v50 }
 0x12a   : > { %1442 = vmatmul.mubr.bf16.gmra.mxu0 %v1699_v32 }
 0x12c   : > { %v1700_v48 = vld [vmem:[#allocation2 + $0x44] ss:$8 sps:$4 sm:$0xff]  }
 0x12d   : > { %1609 = vmatprep.mubr.msk.bf16.mxu1 %vm1373_vm4, %v1700_v48 }
 0x12e   : > { %1458 = vmatmul.mubr.bf16.gmra.mxu1 %v1702_v49 }
 0x16e   : > { %v1427_v63 = vpop.f32.mrf.mxu0 }
 0x16f   : > { %v1428_v15 = vadd.f32 %v1580_v27, %v1427_v63 }
 0x170   : > { %v1429_v40 = vpop.f32.mrf.mxu0 }
 0x171   : > { %v1466_v38 = vmax.f32 %v1428_v15, 0.0 }
 0x172   : > { %v1430_v26 = vpop.f32.mrf.mxu0 }
 0x173   : > { %1477 = vst.msk [vmem:[%s2600_s11] sm:$0xff] %vm1476_vm15, %v1466_v38  ;;  %v1431_v52 = vadd.f32 %v1580_v27, %v1430_v26 }
 0x174   : > { %v1432_v58 = vpop.f32.mrf.mxu0 }
 0x175   : > { %v1467_v14 = vmax.f32 %v1431_v52, 0.0 }
 0x177   : > { %1478 = vst.msk [vmem:[%s2600_s11 + $0x8] sm:$0xff] %vm1476_vm15, %v1467_v14 }
 0x1ab   : > { %v1435_v28 = vpop.f32.mrf.mxu0 }
 0x1ac   : > { %v1436_v10 = vadd.f32 %v1580_v27, %v1435_v28 }
 0x1ad   : > { %v1437_v21 = vpop.f32.mrf.mxu0 }
 0x1ae   : > { %v1468_v56 = vmax.f32 %v1436_v10, 0.0  ;;  %v1451_v2 = vpop.f32.mrf.mxu1 }
 0x1af   : > { %v1438_v22 = vpop.f32.mrf.mxu0  ;;  %v1452_v24 = vadd.f32 %v1580_v27, %v1451_v2 }
 0x1b0   : > { %1479 = vst.msk [vmem:[%s2600_s11 + $0x10] sm:$0xff] %vm1476_vm15, %v1468_v56  ;;  %v1439_v19 = vadd.f32 %v1580_v27, %v1438_v22  ;;  %v1453_v9 = vpop.f32.mrf.mxu1 }
 0x1b1   : > { %v1440_v47 = vpop.f32.mrf.mxu0  ;;  %v1472_v46 = vmax.f32 %v1452_v24, 0.0 }
 0x1b2   : > { %v1469_v7 = vmax.f32 %v1439_v19, 0.0  ;;  %v1454_v5 = vpop.f32.mrf.mxu1 }
 0x1b3   : > { %1483 = vst.msk [vmem:[%s2600_s11 + $0x30] sm:$0xff] %vm1476_vm15, %v1472_v46  ;;  %v1455_v41 = vadd.f32 %v1580_v27, %v1454_v5 }
 0x1b4   : > { %1480 = vst.msk [vmem:[%s2600_s11 + $0x18] sm:$0xff] %vm1476_vm15, %v1469_v7  ;;  %v1456_v0 = vpop.f32.mrf.mxu1 }
 0x1b5   : > { %v1473_v16 = vmax.f32 %v1455_v41, 0.0 }
 0x1b7   : > { %1484 = vst.msk [vmem:[%s2600_s11 + $0x38] sm:$0xff] %vm1476_vm15, %v1473_v16 }
 0x1ea   : > { %v1443_v6 = vpop.f32.mrf.mxu0 }
 0x1eb   : > { %v1444_v36 = vadd.f32 %v1580_v27, %v1443_v6 }
 0x1ec   : > { %v1445_v18 = vpop.f32.mrf.mxu0 }
 0x1ed   : > { %v1470_v34 = vmax.f32 %v1444_v36, 0.0 }
 0x1ee   : > { %v1446_v42 = vpop.f32.mrf.mxu0  ;;  %v1459_v31 = vpop.f32.mrf.mxu1 }
 0x1ef   : > { %1481 = vst.msk [vmem:[%s2600_s11 + $0x20] sm:$0xff] %vm1476_vm15, %v1470_v34  ;;  %v1447_v1 = vadd.f32 %v1580_v27, %v1446_v42  ;;  %v1460_v51 = vadd.f32 %v1580_v27, %v1459_v31 }
 0x1f0   : > { %v1448_v4 = vpop.f32.mrf.mxu0  ;;  %v1461_v29 = vpop.f32.mrf.mxu1 }
 0x1f1   : > { %v1471_v60 = vmax.f32 %v1447_v1, 0.0  ;;  %v1474_v17 = vmax.f32 %v1460_v51, 0.0 }
 0x1f2   : > { %v1462_v55 = vpop.f32.mrf.mxu1 }
 0x1f3   : > { %1482 = vst.msk [vmem:[%s2600_s11 + $0x28] sm:$0xff] %vm1476_vm15, %v1471_v60  ;;  %1485 = vst.msk [vmem:[%s2600_s11 + $0x40] sm:$0xff] %vm1476_vm15, %v1474_v17  ;;  %v1463_v3 = vadd.f32 %v1580_v27, %v1462_v55 }
 0x1f4   : > { %v1464_v33 = vpop.f32.mrf.mxu1 }
 0x1f5   : > { %v1475_v13 = vmax.f32 %v1463_v3, 0.0 }
 0x1f7   : > { %1486 = vst.msk [vmem:[%s2600_s11 + $0x48] sm:$0xff] %vm1476_vm15, %v1475_v13 }
 0x1f8 PF: > { %s13_s14 = sadd.s32 1, %s1725_s14   ;;  %s2665_s12 = smov %s1721_s13 }
 0x1f9   : > { %p10_p5 = scmp.ge.s32.totalorder %s13_s14, 4   ;;  %s2666_s13 = smov %s2668_s15 }
 0x1fb   :  { %12 = sbr.rel (!%p10_p5) target bundleno = 2 (0x2), region = 62 }

</bundles_post_ra>
